<compile_context>
chip_gen: v7x
topology: tpu7x:2x2x1
jax: 0.10.0
libtpu: 0.0.40
codegen_flags: <defaults>
</compile_context>

<pallas_src>
import functools

import numpy as np
import jax
import jax.numpy as jnp
from jax import lax
from jax.experimental import pallas as pl
from jax.experimental.pallas import tpu as pltpu

GROUPS = 32
EPS = 1e-6   # matches nn.GroupNorm(..., eps=1e-06)


# ----------------------------------------------------------------------------
# Pallas kernel
# ----------------------------------------------------------------------------
def _make_kernel(H, W, nb, cin, cout, dim_match):
    hw = H * W
    m = nb * hw                      # rows per grid step (MXU M dimension)
    cpg_in = cin // GROUPS
    cpg_out = cout // GROUPS
    # 3x3 taps, offset (oy, ox) = (dy-1, dx-1); tap index ti = dy*3 + dx matches
    # the wrapper's w.reshape(9*C, cout) tap-major row ordering.
    taps = [(dy - 1, dx - 1) for dy in range(3) for dx in range(3)]

    def same_group_matrix(c, cpg):
        # Generic fallback (cpg > 2 only): (C, C) one-hot "same group" matrix.
        r = lax.broadcasted_iota(jnp.int32, (c, c), 0) // cpg
        cc = lax.broadcasted_iota(jnp.int32, (c, c), 1) // cpg
        return (r == cc).astype(jnp.float32)

    def pair_sum_lanes(v, c):
        # v: (nb, c) f32; groups are adjacent lane pairs (2g, 2g+1).
        # pltpu.roll follows jnp.roll semantics: roll(v, s, 1)[j] = v[(j - s) % c].
        nxt = pltpu.roll(v, c - 1, 1)                     # element j -> v[j+1]
        prv = pltpu.roll(v, 1, 1)                         # element j -> v[j-1]
        even = (lax.broadcasted_iota(jnp.int32, (nb, c), 1) % 2) == 0
        return v + jnp.where(even, nxt, prv)              # per-channel group sum

    def group_norm_relu(x2, gamma, beta, c, cpg):
        # x2: (m, c) f32; per-image, per-group statistics (torch GroupNorm, biased var).
        x3 = x2.reshape(nb, hw, c)                        # leading-dim split: free
        s = jnp.sum(x3, axis=1)                           # (nb, c) spatial sums
        ss = jnp.sum(x3 * x3, axis=1)                     # (nb, c)
        if cpg == 1:                                      # group == channel: no reduce at all
            sum_g, sq_g = s, ss
        elif cpg == 2:                                    # lane-pair reduce on the XLU/VPU
            sum_g, sq_g = pair_sum_lanes(s, c), pair_sum_lanes(ss, c)
        else:                                             # generic (not hit in this test)
            mg = same_group_matrix(c, cpg)
            sum_g = jnp.dot(s, mg, preferred_element_type=jnp.float32)
            sq_g = jnp.dot(ss, mg, preferred_element_type=jnp.float32)
        cnt = float(hw * cpg)
        mean_c = sum_g / cnt
        var_c = jnp.maximum(sq_g / cnt - mean_c * mean_c, 0.0)   # clamp tiny negatives
        inv = lax.rsqrt(var_c + EPS)
        scale = inv * gamma                               # (nb, c)
        shift = beta - mean_c * scale                     # (nb, c)
        y = x3 * scale[:, None, :] + shift[:, None, :]
        return jnp.maximum(y, 0.0).reshape(m, c)

    def conv3x3(a, w_ref, bias, mask_bool):
        # a: (m, c) f32 activations; w_ref: (9*c, cout) bf16 (tap-major rows);
        # bias: (1, cout) f32; mask_bool: (m, 9) bool tap-validity masks.
        zero = jnp.zeros((), jnp.bfloat16)
        parts = []
        for ti, (oy, ox) in enumerate(taps):
            off = oy * W + ox
            if off == 0:
                parts.append(a.astype(jnp.bfloat16))
            else:
                sh = (-off) % m                           # jnp.roll semantics: v[p] = a[p + off]
                v = pltpu.roll(a, sh, 0).astype(jnp.bfloat16)
                parts.append(jnp.where(mask_bool[:, ti:ti + 1], v, zero))
        slab = jnp.concatenate(parts, axis=1)             # (m, 9*c) bf16 im2col slab
        # Single MXU dot with K = 9*c; accumulation stays inside the MXU (f32).
        return jnp.dot(slab, w_ref[...], preferred_element_type=jnp.float32) + bias

    def body(x_ref, masks_ref, g1, b1, w1, c1b, g2, b2, w2, c2b, ws, bs, out_ref):
        x2 = x_ref[...]                                   # (m, cin) f32
        mask_bool = masks_ref[...] > 0.5                  # (m, 9), reused by both convs

        # GroupNorm(32, cin) + ReLU -> Conv2d(cin, cout, 3, 1, 1)
        y1 = group_norm_relu(x2, g1[...], b1[...], cin, cpg_in)
        h1 = conv3x3(y1, w1, c1b[...], mask_bool)         # (m, cout) f32

        # GroupNorm(32, cout) + ReLU -> Conv2d(cout, cout, 3, 1, 1)
        y2 = group_norm_relu(h1, g2[...], b2[...], cout, cpg_out)
        h2 = conv3x3(y2, w2, c2b[...], mask_bool)         # (m, cout) f32

        # Skip connection
        if dim_match:
            skip = x2
        else:                                             # 1x1 conv == per-pixel matmul
            skip = jnp.dot(x2.astype(jnp.bfloat16), ws[...],
                           preferred_element_type=jnp.float32) + bs[...]

        out_ref[...] = skip + h2

    if dim_match:
        def kernel(x_ref, masks_ref, g1, b1, w1, c1b, g2, b2, w2, c2b, out_ref):
            body(x_ref, masks_ref, g1, b1, w1, c1b, g2, b2, w2, c2b, None, None, out_ref)
    else:
        def kernel(x_ref, masks_ref, g1, b1, w1, c1b, g2, b2, w2, c2b, ws, bs, out_ref):
            body(x_ref, masks_ref, g1, b1, w1, c1b, g2, b2, w2, c2b, ws, bs, out_ref)
    return kernel


# ----------------------------------------------------------------------------
# Wrapper
# ----------------------------------------------------------------------------
def _full_spec(shape):
    nd = len(shape)
    return pl.BlockSpec(shape, lambda i, _nd=nd: (0,) * _nd)


def _pick_nb(N, H, W, row_cap=4096):
    # Largest divisor of N with nb*H*W <= row_cap while keeping >= 2 grid steps
    # (pipelining on every gen, dual-TC sharding on v7x).
    hw = H * W
    if hw > row_cap or N <= 1:
        return 1    # TODO(synk): spatial row tiling (1-row halo) for very large H*W.
    best = 1
    for d in range(1, N + 1):
        if N % d:
            continue
        if d * hw > row_cap:
            continue
        if N // d < 2:
            continue
        best = d
    return best


def _build_tap_masks(H, W, m):
    # (m, 9) f32: column ti is 1.0 where tap (dy,dx) stays inside the image for that
    # output pixel (also kills wrap-around across images in the folded batch block).
    p = np.arange(m)
    wi = p % W
    hi = (p // W) % H
    cols = []
    for dy in range(3):
        for dx in range(3):
            ok = np.ones((m,), bool)
            if dy == 0:
                ok &= hi >= 1
            if dy == 2:
                ok &= hi <= H - 2
            if dx == 0:
                ok &= wi >= 1
            if dx == 2:
                ok &= wi <= W - 2
            cols.append(ok)
    return jnp.asarray(np.stack(cols, axis=1).astype(np.float32))


def _vmem_limit_bytes(m, cin, cout):
    # Derived from the actual footprint (double-buffered operands + live intermediates),
    # 2x headroom for compiler scratch, floored at 16 MiB, capped below v7x's 64 MiB.
    f32, bf16 = 4, 2
    cmax = max(cin, cout)
    est = (2 * m * cin * f32                       # x blocks (double-buffered)
           + 2 * m * cout * f32                    # out blocks
           + 2 * (9 * cin + 9 * cout + cin) * cout * bf16   # weight operands
           + 2 * m * 128 * f32                     # mask operand (lane-padded)
           + m * 9 * cmax * bf16                   # im2col slab
           + 8 * m * cmax * f32)                   # live f32 intermediates
    return int(min(max(2 * est, 16 << 20), 64 << 20))


@functools.partial(jax.jit, static_argnames=("cin", "cout"))
def residual_block_pallas(x, params, *, cin, cout):
    N, H, W, _ = x.shape
    dim_match = (cin == cout)
    nb = _pick_nb(N, H, W)
    m = nb * H * W

    g1 = params["g1"].reshape(1, cin).astype(jnp.float32)
    b1 = params["b1"].reshape(1, cin).astype(jnp.float32)
    w1 = params["w1"].reshape(9 * cin, cout).astype(jnp.bfloat16)    # im2col weights
    c1b = params["c1b"].reshape(1, cout).astype(jnp.float32)
    g2 = params["g2"].reshape(1, cout).astype(jnp.float32)
    b2 = params["b2"].reshape(1, cout).astype(jnp.float32)
    w2 = params["w2"].reshape(9 * cout, cout).astype(jnp.bfloat16)   # im2col weights
    c2b = params["c2b"].reshape(1, cout).astype(jnp.float32)

    x2 = x.reshape(N * H * W, cin)          # lane-dense 2-D slab (channels -> lanes)
    masks = _build_tap_masks(H, W, m)       # precomputed, constant-index operand

    kernel = _make_kernel(H, W, nb, cin, cout, dim_match)

    in_specs = [
        pl.BlockSpec((m, cin), lambda i: (i, 0)),          # x block: nb images per step
        pl.BlockSpec((m, 9), lambda i: (0, 0)),            # tap masks (resident)
        _full_spec((1, cin)), _full_spec((1, cin)),        # gn1 gamma / beta
        _full_spec((9 * cin, cout)), _full_spec((1, cout)),   # conv1 w / b
        _full_spec((1, cout)), _full_spec((1, cout)),      # gn2 gamma / beta
        _full_spec((9 * cout, cout)), _full_spec((1, cout)),  # conv2 w / b
    ]
    args = [x2, masks, g1, b1, w1, c1b, g2, b2, w2, c2b]
    if not dim_match:                                      # 1x1-skip params only if used
        ws = params["ws"].reshape(cin, cout).astype(jnp.bfloat16)
        bs = params["bs"].reshape(1, cout).astype(jnp.float32)
        in_specs += [_full_spec((cin, cout)), _full_spec((1, cout))]
        args += [ws, bs]

    out2 = pl.pallas_call(
        kernel,
        out_shape=jax.ShapeDtypeStruct((N * H * W, cout), jnp.float32),
        grid=(N // nb,),
        in_specs=in_specs,
        out_specs=pl.BlockSpec((m, cout), lambda i: (i, 0)),
        compiler_params=pltpu.CompilerParams(
            dimension_semantics=("parallel",),             # independent batch blocks
            vmem_limit_bytes=_vmem_limit_bytes(m, cin, cout),
        ),
    )(*args)
    return out2.reshape(N, H, W, cout)


# ----------------------------------------------------------------------------
# Pure-JAX reference (same math / same bf16 matmul inputs, NHWC) for validation
# ----------------------------------------------------------------------------
def _gn_ref(x, gamma, beta):
    N, H, W, C = x.shape
    cpg = C // GROUPS
    xg = x.reshape(N, H, W, GROUPS, cpg)
    mean = jnp.mean(xg, axis=(1, 2, 4), keepdims=True)
    var = jnp.mean((xg - mean) ** 2, axis=(1, 2, 4), keepdims=True)
    xn = ((xg - mean) / jnp.sqrt(var + EPS)).reshape(N, H, W, C)
    return xn * gamma + beta


def _conv3x3_ref(x, w, b):
    N, H, W, _ = x.shape
    xp = jnp.pad(x.astype(jnp.bfloat16), ((0, 0), (1, 1), (1, 1), (0, 0)))
    wb = w.astype(jnp.bfloat16)
    out = jnp.zeros((N, H, W, w.shape[-1]), jnp.float32) + b
    for dy in range(3):
        for dx in range(3):
            out = out + jnp.einsum("nhwc,co->nhwo",
                                   xp[:, dy:dy + H, dx:dx + W, :], wb[dy, dx],
                                   preferred_element_type=jnp.float32)
    return out


def residual_block_ref(x, p, cin, cout):
    h = jnp.maximum(_gn_ref(x, p["g1"], p["b1"]), 0.0)
    h = _conv3x3_ref(h, p["w1"], p["c1b"])
    h = jnp.maximum(_gn_ref(h, p["g2"], p["b2"]), 0.0)
    h = _conv3x3_ref(h, p["w2"], p["c2b"])
    if cin == cout:
        skip = x
    else:
        skip = jnp.einsum("nhwc,co->nhwo", x.astype(jnp.bfloat16),
                          p["ws"].astype(jnp.bfloat16),
                          preferred_element_type=jnp.float32) + p["bs"]
    return skip + h


# ----------------------------------------------------------------------------
# Main
# ----------------------------------------------------------------------------
def _init_params(key, cin, cout):
    ks = jax.random.split(key, 10)
    return {
        "g1": 1.0 + 0.1 * jax.random.normal(ks[0], (cin,), jnp.float32),
        "b1": 0.1 * jax.random.normal(ks[1], (cin,), jnp.float32),
        "w1": 0.1 * jax.random.normal(ks[2], (3, 3, cin, cout), jnp.float32),
        "c1b": 0.1 * jax.random.normal(ks[3], (cout,), jnp.float32),
        "g2": 1.0 + 0.1 * jax.random.normal(ks[4], (cout,), jnp.float32),
        "b2": 0.1 * jax.random.normal(ks[5], (cout,), jnp.float32),
        "w2": 0.1 * jax.random.normal(ks[6], (3, 3, cout, cout), jnp.float32),
        "c2b": 0.1 * jax.random.normal(ks[7], (cout,), jnp.float32),
        "ws": 0.1 * jax.random.normal(ks[8], (cin, cout), jnp.float32),
        "bs": 0.1 * jax.random.normal(ks[9], (cout,), jnp.float32),
    }


if __name__ == "__main__":
    key = jax.random.PRNGKey(0)
    N, H, W = 4, 8, 8   # nb=2 images folded per grid step -> grid=2, M = 128 MXU rows

    # GroupNorm(32) requires channels divisible by 32; exercise both forward() branches.
    for (cin, cout) in [(32, 64), (32, 32)]:
        kx, kp, key = jax.random.split(key, 3)
        x = jax.random.normal(kx, (N, H, W, cin), jnp.float32)   # NHWC (NCHW equiv: (N, cin, H, W))
        params = _init_params(kp, cin, cout)

        out = residual_block_pallas(x, params, cin=cin, cout=cout)
        out = jax.block_until_ready(out)

        ref = residual_block_ref(x, params, cin, cout)
        assert out.shape == (N, H, W, cout)
        err = float(jnp.max(jnp.abs(out - ref)))
        assert err < 1e-2, f"mismatch for cin={cin}, cout={cout}: max err {err}"

    print("KERNEL_OK")
</pallas_src>

<mosaic_0001>
module attributes {stable_mosaic.version = 11 : i64} {
  func.func @kernel(%arg0: i32, %arg1: memref<128x32xf32, #tpu.memory_space<vmem>>, %arg2: memref<128x9xf32, #tpu.memory_space<vmem>>, %arg3: memref<1x32xf32, #tpu.memory_space<vmem>>, %arg4: memref<1x32xf32, #tpu.memory_space<vmem>>, %arg5: memref<288x64xbf16, #tpu.memory_space<vmem>>, %arg6: memref<1x64xf32, #tpu.memory_space<vmem>>, %arg7: memref<1x64xf32, #tpu.memory_space<vmem>>, %arg8: memref<1x64xf32, #tpu.memory_space<vmem>>, %arg9: memref<576x64xbf16, #tpu.memory_space<vmem>>, %arg10: memref<1x64xf32, #tpu.memory_space<vmem>>, %arg11: memref<32x64xbf16, #tpu.memory_space<vmem>>, %arg12: memref<1x64xf32, #tpu.memory_space<vmem>>, %arg13: memref<128x64xf32, #tpu.memory_space<vmem>>) attributes {dimension_semantics = [#tpu.dimension_semantics<parallel>], iteration_bounds = array<i64: 2>, scalar_prefetch = 0 : i64, scratch_operands = 0 : i64, tpu.core_type = #tpu.core_type<tc>, window_params = [{transform_indices = @transform_0, window_bounds = array<i64: 128, 32>}, {pipeline_mode = #tpu.pipeline_mode<synchronous>, transform_indices = @transform_1, window_bounds = array<i64: 128, 9>}, {pipeline_mode = #tpu.pipeline_mode<synchronous>, transform_indices = @transform_2, window_bounds = array<i64: 1, 32>}, {pipeline_mode = #tpu.pipeline_mode<synchronous>, transform_indices = @transform_3, window_bounds = array<i64: 1, 32>}, {pipeline_mode = #tpu.pipeline_mode<synchronous>, transform_indices = @transform_4, window_bounds = array<i64: 288, 64>}, {pipeline_mode = #tpu.pipeline_mode<synchronous>, transform_indices = @transform_5, window_bounds = array<i64: 1, 64>}, {pipeline_mode = #tpu.pipeline_mode<synchronous>, transform_indices = @transform_6, window_bounds = array<i64: 1, 64>}, {pipeline_mode = #tpu.pipeline_mode<synchronous>, transform_indices = @transform_7, window_bounds = array<i64: 1, 64>}, {pipeline_mode = #tpu.pipeline_mode<synchronous>, transform_indices = @transform_8, window_bounds = array<i64: 576, 64>}, {pipeline_mode = #tpu.pipeline_mode<synchronous>, transform_indices = @transform_9, window_bounds = array<i64: 1, 64>}, {pipeline_mode = #tpu.pipeline_mode<synchronous>, transform_indices = @transform_10, window_bounds = array<i64: 32, 64>}, {pipeline_mode = #tpu.pipeline_mode<synchronous>, transform_indices = @transform_11, window_bounds = array<i64: 1, 64>}, {transform_indices = @transform_12, window_bounds = array<i64: 128, 64>}]} {
    %c0 = arith.constant 0 : index
    %c0_0 = arith.constant 0 : index
    %0 = vector.load %arg1[%c0, %c0_0] : memref<128x32xf32, #tpu.memory_space<vmem>>, vector<128x32xf32>
    %c0_1 = arith.constant 0 : index
    %c0_2 = arith.constant 0 : index
    %1 = vector.load %arg2[%c0_1, %c0_2] : memref<128x9xf32, #tpu.memory_space<vmem>>, vector<128x9xf32>
    %cst = arith.constant 5.000000e-01 : f32
    %2 = vector.broadcast %cst : f32 to vector<128x9xf32>
    %3 = arith.cmpf ogt, %1, %2 : vector<128x9xf32>
    %c0_3 = arith.constant 0 : index
    %c0_4 = arith.constant 0 : index
    %4 = vector.load %arg3[%c0_3, %c0_4] : memref<1x32xf32, #tpu.memory_space<vmem>>, vector<1x32xf32>
    %c0_5 = arith.constant 0 : index
    %c0_6 = arith.constant 0 : index
    %5 = vector.load %arg4[%c0_5, %c0_6] : memref<1x32xf32, #tpu.memory_space<vmem>>, vector<1x32xf32>
    %6 = vector.shape_cast %0 : vector<128x32xf32> to vector<2x64x32xf32>
    %cst_7 = arith.constant dense<0.000000e+00> : vector<2x32xf32>
    %7 = vector.multi_reduction <add>, %6, %cst_7 [1] : vector<2x64x32xf32> to vector<2x32xf32>
    %8 = arith.mulf %6, %6 : vector<2x64x32xf32>
    %cst_8 = arith.constant dense<0.000000e+00> : vector<2x32xf32>
    %9 = vector.multi_reduction <add>, %8, %cst_8 [1] : vector<2x64x32xf32> to vector<2x32xf32>
    %cst_9 = arith.constant 6.400000e+01 : f32
    %10 = vector.broadcast %cst_9 : f32 to vector<2x32xf32>
    %11 = arith.divf %7, %10 : vector<2x32xf32>
    %cst_10 = arith.constant 6.400000e+01 : f32
    %12 = vector.broadcast %cst_10 : f32 to vector<2x32xf32>
    %13 = arith.divf %9, %12 : vector<2x32xf32>
    %14 = arith.mulf %11, %11 : vector<2x32xf32>
    %15 = arith.subf %13, %14 : vector<2x32xf32>
    %cst_11 = arith.constant 0.000000e+00 : f32
    %16 = vector.broadcast %cst_11 : f32 to vector<2x32xf32>
    %17 = arith.maximumf %15, %16 : vector<2x32xf32>
    %cst_12 = arith.constant 9.99999997E-7 : f32
    %18 = vector.broadcast %cst_12 : f32 to vector<2x32xf32>
    %19 = arith.addf %17, %18 : vector<2x32xf32>
    %20 = math.rsqrt %19 : vector<2x32xf32>
    %21 = vector.broadcast %4 : vector<1x32xf32> to vector<2x32xf32>
    %22 = arith.mulf %20, %21 : vector<2x32xf32>
    %23 = arith.mulf %11, %22 : vector<2x32xf32>
    %24 = vector.broadcast %5 : vector<1x32xf32> to vector<2x32xf32>
    %25 = arith.subf %24, %23 : vector<2x32xf32>
    %26 = vector.shape_cast %22 : vector<2x32xf32> to vector<2x1x32xf32>
    %27 = vector.broadcast %26 : vector<2x1x32xf32> to vector<2x64x32xf32>
    %28 = arith.mulf %6, %27 : vector<2x64x32xf32>
    %29 = vector.shape_cast %25 : vector<2x32xf32> to vector<2x1x32xf32>
    %30 = vector.broadcast %29 : vector<2x1x32xf32> to vector<2x64x32xf32>
    %31 = arith.addf %28, %30 : vector<2x64x32xf32>
    %cst_13 = arith.constant 0.000000e+00 : f32
    %32 = vector.broadcast %cst_13 : f32 to vector<2x64x32xf32>
    %33 = arith.maximumf %31, %32 : vector<2x64x32xf32>
    %34 = vector.shape_cast %33 : vector<2x64x32xf32> to vector<128x32xf32>
    %c0_14 = arith.constant 0 : index
    %c0_15 = arith.constant 0 : index
    %35 = vector.load %arg6[%c0_14, %c0_15] : memref<1x64xf32, #tpu.memory_space<vmem>>, vector<1x64xf32>
    %c9_i32 = arith.constant 9 : i32
    %36 = tpu.dynamic_rotate %34 by %c9_i32 dim 0 : vector<128x32xf32>, i32 -> vector<128x32xf32>
    %37 = arith.truncf %36 : vector<128x32xf32> to vector<128x32xbf16>
    %38 = vector.extract_strided_slice %3 {offsets = [0, 0], sizes = [128, 1], strides = [1, 1]} : vector<128x9xi1> to vector<128x1xi1>
    %cst_16 = arith.constant 0.000000e+00 : bf16
    %39 = vector.shape_cast %38 : vector<128x1xi1> to vector<128x1xi1>
    %40 = vector.broadcast %39 : vector<128x1xi1> to vector<128x32xi1>
    %41 = vector.broadcast %cst_16 : bf16 to vector<128x32xbf16>
    %42 = arith.select %40, %37, %41 : vector<128x32xi1>, vector<128x32xbf16>
    %c8_i32 = arith.constant 8 : i32
    %43 = tpu.dynamic_rotate %34 by %c8_i32 dim 0 : vector<128x32xf32>, i32 -> vector<128x32xf32>
    %44 = arith.truncf %43 : vector<128x32xf32> to vector<128x32xbf16>
    %45 = vector.extract_strided_slice %3 {offsets = [0, 1], sizes = [128, 1], strides = [1, 1]} : vector<128x9xi1> to vector<128x1xi1>
    %cst_17 = arith.constant 0.000000e+00 : bf16
    %46 = vector.shape_cast %45 : vector<128x1xi1> to vector<128x1xi1>
    %47 = vector.broadcast %46 : vector<128x1xi1> to vector<128x32xi1>
    %48 = vector.broadcast %cst_17 : bf16 to vector<128x32xbf16>
    %49 = arith.select %47, %44, %48 : vector<128x32xi1>, vector<128x32xbf16>
    %c7_i32 = arith.constant 7 : i32
    %50 = tpu.dynamic_rotate %34 by %c7_i32 dim 0 : vector<128x32xf32>, i32 -> vector<128x32xf32>
    %51 = arith.truncf %50 : vector<128x32xf32> to vector<128x32xbf16>
    %52 = vector.extract_strided_slice %3 {offsets = [0, 2], sizes = [128, 1], strides = [1, 1]} : vector<128x9xi1> to vector<128x1xi1>
    %cst_18 = arith.constant 0.000000e+00 : bf16
    %53 = vector.shape_cast %52 : vector<128x1xi1> to vector<128x1xi1>
    %54 = vector.broadcast %53 : vector<128x1xi1> to vector<128x32xi1>
    %55 = vector.broadcast %cst_18 : bf16 to vector<128x32xbf16>
    %56 = arith.select %54, %51, %55 : vector<128x32xi1>, vector<128x32xbf16>
    %c1_i32 = arith.constant 1 : i32
    %57 = tpu.dynamic_rotate %34 by %c1_i32 dim 0 : vector<128x32xf32>, i32 -> vector<128x32xf32>
    %58 = arith.truncf %57 : vector<128x32xf32> to vector<128x32xbf16>
    %59 = vector.extract_strided_slice %3 {offsets = [0, 3], sizes = [128, 1], strides = [1, 1]} : vector<128x9xi1> to vector<128x1xi1>
    %cst_19 = arith.constant 0.000000e+00 : bf16
    %60 = vector.shape_cast %59 : vector<128x1xi1> to vector<128x1xi1>
    %61 = vector.broadcast %60 : vector<128x1xi1> to vector<128x32xi1>
    %62 = vector.broadcast %cst_19 : bf16 to vector<128x32xbf16>
    %63 = arith.select %61, %58, %62 : vector<128x32xi1>, vector<128x32xbf16>
    %64 = arith.truncf %34 : vector<128x32xf32> to vector<128x32xbf16>
    %c127_i32 = arith.constant 127 : i32
    %65 = tpu.dynamic_rotate %34 by %c127_i32 dim 0 : vector<128x32xf32>, i32 -> vector<128x32xf32>
    %66 = arith.truncf %65 : vector<128x32xf32> to vector<128x32xbf16>
    %67 = vector.extract_strided_slice %3 {offsets = [0, 5], sizes = [128, 1], strides = [1, 1]} : vector<128x9xi1> to vector<128x1xi1>
    %cst_20 = arith.constant 0.000000e+00 : bf16
    %68 = vector.shape_cast %67 : vector<128x1xi1> to vector<128x1xi1>
    %69 = vector.broadcast %68 : vector<128x1xi1> to vector<128x32xi1>
    %70 = vector.broadcast %cst_20 : bf16 to vector<128x32xbf16>
    %71 = arith.select %69, %66, %70 : vector<128x32xi1>, vector<128x32xbf16>
    %c121_i32 = arith.constant 121 : i32
    %72 = tpu.dynamic_rotate %34 by %c121_i32 dim 0 : vector<128x32xf32>, i32 -> vector<128x32xf32>
    %73 = arith.truncf %72 : vector<128x32xf32> to vector<128x32xbf16>
    %74 = vector.extract_strided_slice %3 {offsets = [0, 6], sizes = [128, 1], strides = [1, 1]} : vector<128x9xi1> to vector<128x1xi1>
    %cst_21 = arith.constant 0.000000e+00 : bf16
    %75 = vector.shape_cast %74 : vector<128x1xi1> to vector<128x1xi1>
    %76 = vector.broadcast %75 : vector<128x1xi1> to vector<128x32xi1>
    %77 = vector.broadcast %cst_21 : bf16 to vector<128x32xbf16>
    %78 = arith.select %76, %73, %77 : vector<128x32xi1>, vector<128x32xbf16>
    %c120_i32 = arith.constant 120 : i32
    %79 = tpu.dynamic_rotate %34 by %c120_i32 dim 0 : vector<128x32xf32>, i32 -> vector<128x32xf32>
    %80 = arith.truncf %79 : vector<128x32xf32> to vector<128x32xbf16>
    %81 = vector.extract_strided_slice %3 {offsets = [0, 7], sizes = [128, 1], strides = [1, 1]} : vector<128x9xi1> to vector<128x1xi1>
    %cst_22 = arith.constant 0.000000e+00 : bf16
    %82 = vector.shape_cast %81 : vector<128x1xi1> to vector<128x1xi1>
    %83 = vector.broadcast %82 : vector<128x1xi1> to vector<128x32xi1>
    %84 = vector.broadcast %cst_22 : bf16 to vector<128x32xbf16>
    %85 = arith.select %83, %80, %84 : vector<128x32xi1>, vector<128x32xbf16>
    %c119_i32 = arith.constant 119 : i32
    %86 = tpu.dynamic_rotate %34 by %c119_i32 dim 0 : vector<128x32xf32>, i32 -> vector<128x32xf32>
    %87 = arith.truncf %86 : vector<128x32xf32> to vector<128x32xbf16>
    %88 = vector.extract_strided_slice %3 {offsets = [0, 8], sizes = [128, 1], strides = [1, 1]} : vector<128x9xi1> to vector<128x1xi1>
    %cst_23 = arith.constant 0.000000e+00 : bf16
    %89 = vector.shape_cast %88 : vector<128x1xi1> to vector<128x1xi1>
    %90 = vector.broadcast %89 : vector<128x1xi1> to vector<128x32xi1>
    %91 = vector.broadcast %cst_23 : bf16 to vector<128x32xbf16>
    %92 = arith.select %90, %87, %91 : vector<128x32xi1>, vector<128x32xbf16>
    %93 = tpu.concatenate %42, %49, %56, %63, %64, %71, %78, %85, %92 in 1 : vector<128x32xbf16>, vector<128x32xbf16>, vector<128x32xbf16>, vector<128x32xbf16>, vector<128x32xbf16>, vector<128x32xbf16>, vector<128x32xbf16>, vector<128x32xbf16>, vector<128x32xbf16> -> vector<128x288xbf16>
    %c0_24 = arith.constant 0 : index
    %c0_25 = arith.constant 0 : index
    %94 = vector.load %arg5[%c0_24, %c0_25] : memref<288x64xbf16, #tpu.memory_space<vmem>>, vector<288x64xbf16>
    %cst_26 = arith.constant dense<0.000000e+00> : vector<128x64xf32>
    %95 = tpu.matmul %93, %94, %cst_26 {dimension_numbers = #tpu.dot_dimension_numbers<[1], [0], [0], [1], [0, 0, 1, 1], [], []>} : vector<128x288xbf16>, vector<288x64xbf16>, vector<128x64xf32> -> vector<128x64xf32>
    %96 = vector.broadcast %35 : vector<1x64xf32> to vector<128x64xf32>
    %97 = arith.addf %95, %96 : vector<128x64xf32>
    %c0_27 = arith.constant 0 : index
    %c0_28 = arith.constant 0 : index
    %98 = vector.load %arg7[%c0_27, %c0_28] : memref<1x64xf32, #tpu.memory_space<vmem>>, vector<1x64xf32>
    %c0_29 = arith.constant 0 : index
    %c0_30 = arith.constant 0 : index
    %99 = vector.load %arg8[%c0_29, %c0_30] : memref<1x64xf32, #tpu.memory_space<vmem>>, vector<1x64xf32>
    %100 = vector.shape_cast %97 : vector<128x64xf32> to vector<2x64x64xf32>
    %cst_31 = arith.constant dense<0.000000e+00> : vector<2x64xf32>
    %101 = vector.multi_reduction <add>, %100, %cst_31 [1] : vector<2x64x64xf32> to vector<2x64xf32>
    %102 = arith.mulf %100, %100 : vector<2x64x64xf32>
    %cst_32 = arith.constant dense<0.000000e+00> : vector<2x64xf32>
    %103 = vector.multi_reduction <add>, %102, %cst_32 [1] : vector<2x64x64xf32> to vector<2x64xf32>
    %c63_i32 = arith.constant 63 : i32
    %104 = tpu.dynamic_rotate %101 by %c63_i32 dim 1 : vector<2x64xf32>, i32 -> vector<2x64xf32>
    %c1_i32_33 = arith.constant 1 : i32
    %105 = tpu.dynamic_rotate %101 by %c1_i32_33 dim 1 : vector<2x64xf32>, i32 -> vector<2x64xf32>
    %106 = tpu.iota {dimensions = array<i32: 1>} : vector<2x64xi32>
    %c2_i32 = arith.constant 2 : i32
    %c0_i32 = arith.constant 0 : i32
    %107 = arith.cmpi eq, %c2_i32, %c0_i32 : i32
    %c1_i32_34 = arith.constant 1 : i32
    %108 = arith.select %107, %c1_i32_34, %c2_i32 : i32
    %109 = vector.broadcast %108 : i32 to vector<2x64xi32>
    %110 = arith.remsi %106, %109 : vector<2x64xi32>
    %c0_i32_35 = arith.constant 0 : i32
    %111 = vector.broadcast %c0_i32_35 : i32 to vector<2x64xi32>
    %112 = arith.cmpi ne, %110, %111 : vector<2x64xi32>
    %c0_i32_36 = arith.constant 0 : i32
    %113 = vector.broadcast %c0_i32_36 : i32 to vector<2x64xi32>
    %114 = arith.cmpi slt, %110, %113 : vector<2x64xi32>
    %c0_i32_37 = arith.constant 0 : i32
    %115 = arith.cmpi slt, %108, %c0_i32_37 : i32
    %116 = vector.broadcast %115 : i1 to vector<2x64xi1>
    %117 = vector.broadcast %116 : vector<2x64xi1> to vector<2x64xi1>
    %118 = arith.xori %114, %117 : vector<2x64xi1>
    %119 = arith.andi %118, %112 : vector<2x64xi1>
    %120 = vector.broadcast %108 : i32 to vector<2x64xi32>
    %121 = arith.addi %110, %120 : vector<2x64xi32>
    %122 = arith.select %119, %121, %110 : vector<2x64xi1>, vector<2x64xi32>
    %c0_i32_38 = arith.constant 0 : i32
    %123 = vector.broadcast %c0_i32_38 : i32 to vector<2x64xi32>
    %124 = arith.cmpi eq, %122, %123 : vector<2x64xi32>
    %125 = arith.select %124, %104, %105 : vector<2x64xi1>, vector<2x64xf32>
    %126 = arith.addf %101, %125 : vector<2x64xf32>
    %c63_i32_39 = arith.constant 63 : i32
    %127 = tpu.dynamic_rotate %103 by %c63_i32_39 dim 1 : vector<2x64xf32>, i32 -> vector<2x64xf32>
    %c1_i32_40 = arith.constant 1 : i32
    %128 = tpu.dynamic_rotate %103 by %c1_i32_40 dim 1 : vector<2x64xf32>, i32 -> vector<2x64xf32>
    %129 = tpu.iota {dimensions = array<i32: 1>} : vector<2x64xi32>
    %c2_i32_41 = arith.constant 2 : i32
    %c0_i32_42 = arith.constant 0 : i32
    %130 = arith.cmpi eq, %c2_i32_41, %c0_i32_42 : i32
    %c1_i32_43 = arith.constant 1 : i32
    %131 = arith.select %130, %c1_i32_43, %c2_i32_41 : i32
    %132 = vector.broadcast %131 : i32 to vector<2x64xi32>
    %133 = arith.remsi %129, %132 : vector<2x64xi32>
    %c0_i32_44 = arith.constant 0 : i32
    %134 = vector.broadcast %c0_i32_44 : i32 to vector<2x64xi32>
    %135 = arith.cmpi ne, %133, %134 : vector<2x64xi32>
    %c0_i32_45 = arith.constant 0 : i32
    %136 = vector.broadcast %c0_i32_45 : i32 to vector<2x64xi32>
    %137 = arith.cmpi slt, %133, %136 : vector<2x64xi32>
    %c0_i32_46 = arith.constant 0 : i32
    %138 = arith.cmpi slt, %131, %c0_i32_46 : i32
    %139 = vector.broadcast %138 : i1 to vector<2x64xi1>
    %140 = vector.broadcast %139 : vector<2x64xi1> to vector<2x64xi1>
    %141 = arith.xori %137, %140 : vector<2x64xi1>
    %142 = arith.andi %141, %135 : vector<2x64xi1>
    %143 = vector.broadcast %131 : i32 to vector<2x64xi32>
    %144 = arith.addi %133, %143 : vector<2x64xi32>
    %145 = arith.select %142, %144, %133 : vector<2x64xi1>, vector<2x64xi32>
    %c0_i32_47 = arith.constant 0 : i32
    %146 = vector.broadcast %c0_i32_47 : i32 to vector<2x64xi32>
    %147 = arith.cmpi eq, %145, %146 : vector<2x64xi32>
    %148 = arith.select %147, %127, %128 : vector<2x64xi1>, vector<2x64xf32>
    %149 = arith.addf %103, %148 : vector<2x64xf32>
    %cst_48 = arith.constant 1.280000e+02 : f32
    %150 = vector.broadcast %cst_48 : f32 to vector<2x64xf32>
    %151 = arith.divf %126, %150 : vector<2x64xf32>
    %cst_49 = arith.constant 1.280000e+02 : f32
    %152 = vector.broadcast %cst_49 : f32 to vector<2x64xf32>
    %153 = arith.divf %149, %152 : vector<2x64xf32>
    %154 = arith.mulf %151, %151 : vector<2x64xf32>
    %155 = arith.subf %153, %154 : vector<2x64xf32>
    %cst_50 = arith.constant 0.000000e+00 : f32
    %156 = vector.broadcast %cst_50 : f32 to vector<2x64xf32>
    %157 = arith.maximumf %155, %156 : vector<2x64xf32>
    %cst_51 = arith.constant 9.99999997E-7 : f32
    %158 = vector.broadcast %cst_51 : f32 to vector<2x64xf32>
    %159 = arith.addf %157, %158 : vector<2x64xf32>
    %160 = math.rsqrt %159 : vector<2x64xf32>
    %161 = vector.broadcast %98 : vector<1x64xf32> to vector<2x64xf32>
    %162 = arith.mulf %160, %161 : vector<2x64xf32>
    %163 = arith.mulf %151, %162 : vector<2x64xf32>
    %164 = vector.broadcast %99 : vector<1x64xf32> to vector<2x64xf32>
    %165 = arith.subf %164, %163 : vector<2x64xf32>
    %166 = vector.shape_cast %162 : vector<2x64xf32> to vector<2x1x64xf32>
    %167 = vector.broadcast %166 : vector<2x1x64xf32> to vector<2x64x64xf32>
    %168 = arith.mulf %100, %167 : vector<2x64x64xf32>
    %169 = vector.shape_cast %165 : vector<2x64xf32> to vector<2x1x64xf32>
    %170 = vector.broadcast %169 : vector<2x1x64xf32> to vector<2x64x64xf32>
    %171 = arith.addf %168, %170 : vector<2x64x64xf32>
    %cst_52 = arith.constant 0.000000e+00 : f32
    %172 = vector.broadcast %cst_52 : f32 to vector<2x64x64xf32>
    %173 = arith.maximumf %171, %172 : vector<2x64x64xf32>
    %174 = vector.shape_cast %173 : vector<2x64x64xf32> to vector<128x64xf32>
    %c0_53 = arith.constant 0 : index
    %c0_54 = arith.constant 0 : index
    %175 = vector.load %arg10[%c0_53, %c0_54] : memref<1x64xf32, #tpu.memory_space<vmem>>, vector<1x64xf32>
    %c9_i32_55 = arith.constant 9 : i32
    %176 = tpu.dynamic_rotate %174 by %c9_i32_55 dim 0 : vector<128x64xf32>, i32 -> vector<128x64xf32>
    %177 = arith.truncf %176 : vector<128x64xf32> to vector<128x64xbf16>
    %178 = vector.extract_strided_slice %3 {offsets = [0, 0], sizes = [128, 1], strides = [1, 1]} : vector<128x9xi1> to vector<128x1xi1>
    %cst_56 = arith.constant 0.000000e+00 : bf16
    %179 = vector.shape_cast %178 : vector<128x1xi1> to vector<128x1xi1>
    %180 = vector.broadcast %179 : vector<128x1xi1> to vector<128x64xi1>
    %181 = vector.broadcast %cst_56 : bf16 to vector<128x64xbf16>
    %182 = arith.select %180, %177, %181 : vector<128x64xi1>, vector<128x64xbf16>
    %c8_i32_57 = arith.constant 8 : i32
    %183 = tpu.dynamic_rotate %174 by %c8_i32_57 dim 0 : vector<128x64xf32>, i32 -> vector<128x64xf32>
    %184 = arith.truncf %183 : vector<128x64xf32> to vector<128x64xbf16>
    %185 = vector.extract_strided_slice %3 {offsets = [0, 1], sizes = [128, 1], strides = [1, 1]} : vector<128x9xi1> to vector<128x1xi1>
    %cst_58 = arith.constant 0.000000e+00 : bf16
    %186 = vector.shape_cast %185 : vector<128x1xi1> to vector<128x1xi1>
    %187 = vector.broadcast %186 : vector<128x1xi1> to vector<128x64xi1>
    %188 = vector.broadcast %cst_58 : bf16 to vector<128x64xbf16>
    %189 = arith.select %187, %184, %188 : vector<128x64xi1>, vector<128x64xbf16>
    %c7_i32_59 = arith.constant 7 : i32
    %190 = tpu.dynamic_rotate %174 by %c7_i32_59 dim 0 : vector<128x64xf32>, i32 -> vector<128x64xf32>
    %191 = arith.truncf %190 : vector<128x64xf32> to vector<128x64xbf16>
    %192 = vector.extract_strided_slice %3 {offsets = [0, 2], sizes = [128, 1], strides = [1, 1]} : vector<128x9xi1> to vector<128x1xi1>
    %cst_60 = arith.constant 0.000000e+00 : bf16
    %193 = vector.shape_cast %192 : vector<128x1xi1> to vector<128x1xi1>
    %194 = vector.broadcast %193 : vector<128x1xi1> to vector<128x64xi1>
    %195 = vector.broadcast %cst_60 : bf16 to vector<128x64xbf16>
    %196 = arith.select %194, %191, %195 : vector<128x64xi1>, vector<128x64xbf16>
    %c1_i32_61 = arith.constant 1 : i32
    %197 = tpu.dynamic_rotate %174 by %c1_i32_61 dim 0 : vector<128x64xf32>, i32 -> vector<128x64xf32>
    %198 = arith.truncf %197 : vector<128x64xf32> to vector<128x64xbf16>
    %199 = vector.extract_strided_slice %3 {offsets = [0, 3], sizes = [128, 1], strides = [1, 1]} : vector<128x9xi1> to vector<128x1xi1>
    %cst_62 = arith.constant 0.000000e+00 : bf16
    %200 = vector.shape_cast %199 : vector<128x1xi1> to vector<128x1xi1>
    %201 = vector.broadcast %200 : vector<128x1xi1> to vector<128x64xi1>
    %202 = vector.broadcast %cst_62 : bf16 to vector<128x64xbf16>
    %203 = arith.select %201, %198, %202 : vector<128x64xi1>, vector<128x64xbf16>
    %204 = arith.truncf %174 : vector<128x64xf32> to vector<128x64xbf16>
    %c127_i32_63 = arith.constant 127 : i32
    %205 = tpu.dynamic_rotate %174 by %c127_i32_63 dim 0 : vector<128x64xf32>, i32 -> vector<128x64xf32>
    %206 = arith.truncf %205 : vector<128x64xf32> to vector<128x64xbf16>
    %207 = vector.extract_strided_slice %3 {offsets = [0, 5], sizes = [128, 1], strides = [1, 1]} : vector<128x9xi1> to vector<128x1xi1>
    %cst_64 = arith.constant 0.000000e+00 : bf16
    %208 = vector.shape_cast %207 : vector<128x1xi1> to vector<128x1xi1>
    %209 = vector.broadcast %208 : vector<128x1xi1> to vector<128x64xi1>
    %210 = vector.broadcast %cst_64 : bf16 to vector<128x64xbf16>
    %211 = arith.select %209, %206, %210 : vector<128x64xi1>, vector<128x64xbf16>
    %c121_i32_65 = arith.constant 121 : i32
    %212 = tpu.dynamic_rotate %174 by %c121_i32_65 dim 0 : vector<128x64xf32>, i32 -> vector<128x64xf32>
    %213 = arith.truncf %212 : vector<128x64xf32> to vector<128x64xbf16>
    %214 = vector.extract_strided_slice %3 {offsets = [0, 6], sizes = [128, 1], strides = [1, 1]} : vector<128x9xi1> to vector<128x1xi1>
    %cst_66 = arith.constant 0.000000e+00 : bf16
    %215 = vector.shape_cast %214 : vector<128x1xi1> to vector<128x1xi1>
    %216 = vector.broadcast %215 : vector<128x1xi1> to vector<128x64xi1>
    %217 = vector.broadcast %cst_66 : bf16 to vector<128x64xbf16>
    %218 = arith.select %216, %213, %217 : vector<128x64xi1>, vector<128x64xbf16>
    %c120_i32_67 = arith.constant 120 : i32
    %219 = tpu.dynamic_rotate %174 by %c120_i32_67 dim 0 : vector<128x64xf32>, i32 -> vector<128x64xf32>
    %220 = arith.truncf %219 : vector<128x64xf32> to vector<128x64xbf16>
    %221 = vector.extract_strided_slice %3 {offsets = [0, 7], sizes = [128, 1], strides = [1, 1]} : vector<128x9xi1> to vector<128x1xi1>
    %cst_68 = arith.constant 0.000000e+00 : bf16
    %222 = vector.shape_cast %221 : vector<128x1xi1> to vector<128x1xi1>
    %223 = vector.broadcast %222 : vector<128x1xi1> to vector<128x64xi1>
    %224 = vector.broadcast %cst_68 : bf16 to vector<128x64xbf16>
    %225 = arith.select %223, %220, %224 : vector<128x64xi1>, vector<128x64xbf16>
    %c119_i32_69 = arith.constant 119 : i32
    %226 = tpu.dynamic_rotate %174 by %c119_i32_69 dim 0 : vector<128x64xf32>, i32 -> vector<128x64xf32>
    %227 = arith.truncf %226 : vector<128x64xf32> to vector<128x64xbf16>
    %228 = vector.extract_strided_slice %3 {offsets = [0, 8], sizes = [128, 1], strides = [1, 1]} : vector<128x9xi1> to vector<128x1xi1>
    %cst_70 = arith.constant 0.000000e+00 : bf16
    %229 = vector.shape_cast %228 : vector<128x1xi1> to vector<128x1xi1>
    %230 = vector.broadcast %229 : vector<128x1xi1> to vector<128x64xi1>
    %231 = vector.broadcast %cst_70 : bf16 to vector<128x64xbf16>
    %232 = arith.select %230, %227, %231 : vector<128x64xi1>, vector<128x64xbf16>
    %233 = tpu.concatenate %182, %189, %196, %203, %204, %211, %218, %225, %232 in 1 : vector<128x64xbf16>, vector<128x64xbf16>, vector<128x64xbf16>, vector<128x64xbf16>, vector<128x64xbf16>, vector<128x64xbf16>, vector<128x64xbf16>, vector<128x64xbf16>, vector<128x64xbf16> -> vector<128x576xbf16>
    %c0_71 = arith.constant 0 : index
    %c0_72 = arith.constant 0 : index
    %234 = vector.load %arg9[%c0_71, %c0_72] : memref<576x64xbf16, #tpu.memory_space<vmem>>, vector<576x64xbf16>
    %cst_73 = arith.constant dense<0.000000e+00> : vector<128x64xf32>
    %235 = tpu.matmul %233, %234, %cst_73 {dimension_numbers = #tpu.dot_dimension_numbers<[1], [0], [0], [1], [0, 0, 1, 1], [], []>} : vector<128x576xbf16>, vector<576x64xbf16>, vector<128x64xf32> -> vector<128x64xf32>
    %236 = vector.broadcast %175 : vector<1x64xf32> to vector<128x64xf32>
    %237 = arith.addf %235, %236 : vector<128x64xf32>
    %238 = arith.truncf %0 : vector<128x32xf32> to vector<128x32xbf16>
    %c0_74 = arith.constant 0 : index
    %c0_75 = arith.constant 0 : index
    %239 = vector.load %arg11[%c0_74, %c0_75] : memref<32x64xbf16, #tpu.memory_space<vmem>>, vector<32x64xbf16>
    %cst_76 = arith.constant dense<0.000000e+00> : vector<128x64xf32>
    %240 = tpu.matmul %238, %239, %cst_76 {dimension_numbers = #tpu.dot_dimension_numbers<[1], [0], [0], [1], [0, 0, 1, 1], [], []>} : vector<128x32xbf16>, vector<32x64xbf16>, vector<128x64xf32> -> vector<128x64xf32>
    %c0_77 = arith.constant 0 : index
    %c0_78 = arith.constant 0 : index
    %241 = vector.load %arg12[%c0_77, %c0_78] : memref<1x64xf32, #tpu.memory_space<vmem>>, vector<1x64xf32>
    %242 = vector.broadcast %241 : vector<1x64xf32> to vector<128x64xf32>
    %243 = arith.addf %240, %242 : vector<128x64xf32>
    %244 = arith.addf %243, %237 : vector<128x64xf32>
    %c0_79 = arith.constant 0 : index
    %c0_80 = arith.constant 0 : index
    %245 = vector.load %arg13[%c0_79, %c0_80] : memref<128x64xf32, #tpu.memory_space<vmem>>, vector<128x64xf32>
    tpu.vector_store %arg13[%c0_79, %c0_80], %244 {strides = array<i32>} : memref<128x64xf32, #tpu.memory_space<vmem>>, vector<128x64xf32>,
    return
  }
  func.func @transform_0(%arg0: i32) -> (i32, i32) {
    %c0_i32 = arith.constant 0 : i32
    %c0_i32_0 = arith.constant 0 : i32
    return %arg0, %c0_i32 : i32, i32
  }
  func.func @transform_1(%arg0: i32) -> (i32, i32) {
    %c0_i32 = arith.constant 0 : i32
    %c0_i32_0 = arith.constant 0 : i32
    %c0_i32_1 = arith.constant 0 : i32
    return %c0_i32, %c0_i32_0 : i32, i32
  }
  func.func @transform_2(%arg0: i32) -> (i32, i32) {
    %c0_i32 = arith.constant 0 : i32
    %c0_i32_0 = arith.constant 0 : i32
    %c0_i32_1 = arith.constant 0 : i32
    return %c0_i32, %c0_i32_0 : i32, i32
  }
  func.func @transform_3(%arg0: i32) -> (i32, i32) {
    %c0_i32 = arith.constant 0 : i32
    %c0_i32_0 = arith.constant 0 : i32
    %c0_i32_1 = arith.constant 0 : i32
    return %c0_i32, %c0_i32_0 : i32, i32
  }
  func.func @transform_4(%arg0: i32) -> (i32, i32) {
    %c0_i32 = arith.constant 0 : i32
    %c0_i32_0 = arith.constant 0 : i32
    %c0_i32_1 = arith.constant 0 : i32
    return %c0_i32, %c0_i32_0 : i32, i32
  }
  func.func @transform_5(%arg0: i32) -> (i32, i32) {
    %c0_i32 = arith.constant 0 : i32
    %c0_i32_0 = arith.constant 0 : i32
    %c0_i32_1 = arith.constant 0 : i32
    return %c0_i32, %c0_i32_0 : i32, i32
  }
  func.func @transform_6(%arg0: i32) -> (i32, i32) {
    %c0_i32 = arith.constant 0 : i32
    %c0_i32_0 = arith.constant 0 : i32
    %c0_i32_1 = arith.constant 0 : i32
    return %c0_i32, %c0_i32_0 : i32, i32
  }
  func.func @transform_7(%arg0: i32) -> (i32, i32) {
    %c0_i32 = arith.constant 0 : i32
    %c0_i32_0 = arith.constant 0 : i32
    %c0_i32_1 = arith.constant 0 : i32
    return %c0_i32, %c0_i32_0 : i32, i32
  }
  func.func @transform_8(%arg0: i32) -> (i32, i32) {
    %c0_i32 = arith.constant 0 : i32
    %c0_i32_0 = arith.constant 0 : i32
    %c0_i32_1 = arith.constant 0 : i32
    return %c0_i32, %c0_i32_0 : i32, i32
  }
  func.func @transform_9(%arg0: i32) -> (i32, i32) {
    %c0_i32 = arith.constant 0 : i32
    %c0_i32_0 = arith.constant 0 : i32
    %c0_i32_1 = arith.constant 0 : i32
    return %c0_i32, %c0_i32_0 : i32, i32
  }
  func.func @transform_10(%arg0: i32) -> (i32, i32) {
    %c0_i32 = arith.constant 0 : i32
    %c0_i32_0 = arith.constant 0 : i32
    %c0_i32_1 = arith.constant 0 : i32
    return %c0_i32, %c0_i32_0 : i32, i32
  }
  func.func @transform_11(%arg0: i32) -> (i32, i32) {
    %c0_i32 = arith.constant 0 : i32
    %c0_i32_0 = arith.constant 0 : i32
    %c0_i32_1 = arith.constant 0 : i32
    return %c0_i32, %c0_i32_0 : i32, i32
  }
  func.func @transform_12(%arg0: i32) -> (i32, i32) {
    %c0_i32 = arith.constant 0 : i32
    %c0_i32_0 = arith.constant 0 : i32
    return %arg0, %c0_i32 : i32, i32
  }
}

</mosaic_0001>

<bundles_post_ra>
// kernel: residual_block_pallas.1
= control target key start
LH: loop header
LB: loop body
LE: loop exit
PB: predicated region body
PF: predicated region fallthrough
CT: control target
= control target key end

     0   :  { %s8014_s0 = inlined_call_operand.vmem [shape: f32[256,32], index: 0, kind: input, shape index: {}]   ;;  %s8015_s1 = inlined_call_operand.vmem [shape: f32[128,9], index: 1, kind: input, shape index: {}]   ;;  %s8016_s2 = inlined_call_operand.vmem [shape: f32[1,32], index: 2, kind: input, shape index: {}]   ;;  %s8017_s3 = inlined_call_operand.vmem [shape: f32[1,32], index: 3, kind: input, shape index: {}]   ;;  %s8018_s4 = inlined_call_operand.vmem [shape: bf16[288,64], index: 4, kind: input, shape index: {}]   ;;  %s8019_s5 = inlined_call_operand.vmem [shape: f32[1,64], index: 5, kind: input, shape index: {}]   ;;  %s8020_s6 = inlined_call_operand.vmem [shape: f32[1,64], index: 6, kind: input, shape index: {}]   ;;  %s8021_s7 = inlined_call_operand.vmem [shape: f32[1,64], index: 7, kind: input, shape index: {}]   ;;  %s8022_s8 = inlined_call_operand.vmem [shape: bf16[576,64], index: 8, kind: input, shape index: {}]   ;;  %s8023_s9 = inlined_call_operand.vmem [shape: f32[1,64], index: 9, kind: input, shape index: {}]   ;;  %s8024_s10 = inlined_call_operand.vmem [shape: bf16[32,64], index: 10, kind: input, shape index: {}]   ;;  %s8025_s11 = inlined_call_operand.vmem [shape: f32[1,64], index: 11, kind: input, shape index: {}]   ;;  %s8026_s12 = inlined_call_operand.hbm [shape: f32[256,64], index: 12, kind: output, shape index: {}]  }
   0x1   :  { %8241 = sst [smem:[#allocation89_spill]] %s8014_s0 }
   0x2   :  { %8242 = sst [smem:[#allocation90_spill]] %s8015_s1 }
   0x3   :  { %17 = vsyncpa [#allocation3], 0 }
   0x4   :  { %19 = vsyncpa [#allocation3 + $0x1], 0  ;;  %s4970_s21 = smov 0   ;;  %s4972_s22 = smov 0  }
   0x5   :  { %s4974_s23 = smov 0   ;;  %s4976_s24 = smov 0  }
   0x6 LB: > { %s4991_s25 = sadd.s32 4294967295, %s4886_s24   ;;  %s4121_s26 = sadd.s32 4294967294, %s4886_s24   ;;  %s4886_s24 = sphi %s4976_s24, %s8941_s24   ;;  %s4882_s23 = sphi %s4974_s23, %s8940_s23   ;;  %s4878_s22 = sphi %s4972_s22, %s8939_s22   ;;  %s4874_s21 = sphi %s4970_s21, %s8938_s21  }
   0x7   : > { %s4995_s27 = sadd.s32 1, %s4886_s24   ;;  %s289_s28 = sadd.s32 1, %s4882_s23 }
   0x8   : > { %s286_s29 = ssub.s32 %s4886_s24, %s4995_s27  ;;  %p299_p0 = scmp.ne.s32.totalorder %s4882_s23, %s4878_s22 }
   0x9   : > { %p287_p1 = scmp.eq.s32.totalorder %s286_s29, 0  ;;  %p300_p2 = scmp.eq.s32.totalorder %s4991_s25, 1 }
   0xa   : > { %p305_p3 = scmp.ne.s32.totalorder %s4878_s22, %s4874_s21  ;;  %p306_p4 = scmp.eq.s32.totalorder %s4121_s26, 1 }
   0xb   : > { %s5006_s30 = scalar_select %p287_p1, %s4882_s23, %s289_s28  }
   0xc   : > { %p5008_p5 = por %p300_p2, %p299_p0  ;;  %p5012_p6 = por %p306_p4, %p305_p3 }
   0xd   : > { %p4124_p7 = scmp.ge.s32.totalorder %s4886_s24, 1  ;;  %p366_p8 = scmp.lt.s32.totalorder %s4886_s24, 3 }
   0xf   : > { %p367_p9 = pnand %p4124_p7, %p366_p8 }
  0x11   : > { %370 = sbr.rel (%p367_p9) target bundleno = 1749 (0x6d5), region = 68 }
  0x18   : > { %s8245_s1 = sld [smem:[#allocation90_spill]]  ;;  %v8042_v2 = vmov 5   ;;  %v8045_v3 = vmov 1   ;;  %v8037_v4 = vmov 0   ;;  %s4126_s20 = sshll.u32 %s4991_s25, 4  ;;  %v8039_v20 = vmov 6  }
  0x19   : > { %4676 = vset.pattern.permute.xlu0 %v8042_v2  ;;  %4677 = vset.pattern.permute.xlu1 %v8045_v3  ;;  %p409_p10 = scmp.lt.s32.totalorder %s4126_s20, 31  ;;  %s8251_s0 = sld [smem:[#allocation89_spill]]  ;;  %vm8091_vm10 = vcmask 261120   ;;  %v8032_v32 = vmov 2   ;;  %v8028_v61 = vmov 7  }
  0x1a   : > { %s8222_s29 = smov 64   ;;  %s4898_s15 = smov 96  }
  0x1b   : > { %s8943_s20 = smov (!%p409_p10, %s4126_s20), 31  ;;  %s4900_s17 = smov 65  }
  0x1c   : > { %s4127_s18 = sshll.u32 %s8943_s20, 3  ;;  %s4896_s20 = smov 32  }
  0x1e   : > { %v434_v0 = vld [vmem:[%s8245_s1] sm:$0xff]  ;;  %v435_v1 = vld [vmem:[%s8245_s1 + $0x8] sm:$0xff]  ;;  %v437_v6 = vld [vmem:[%s8245_s1 + $0x18] sm:$0xff] }
  0x1f   : > { %vm450_vm0 = vcmp.gt.f32.partialorder %v434_v0, 0.5  ;;  %vm451_vm1 = vcmp.gt.f32.partialorder %v435_v1, 0.5  ;;  %v439_v7 = vld [vmem:[%s8245_s1 + $0x28] sm:$0xff]  ;;  %v441_v9 = vld [vmem:[%s8245_s1 + $0x38] sm:$0xff]  ;;  %vm453_vm2 = vcmp.gt.f32.partialorder %v437_v6, 0.5  ;;  %v436_v16 = vld [vmem:[%s8245_s1 + $0x10] sm:$0xff]  ;;  %s5082_s28 = scalar_lea.vmem %s8251_s0, %s4127_s18 }
  0x20   : > { %v5027_v5 = vsel %vm450_vm0, 1, %v8037_v4  ;;  %v5038_v8 = vsel %vm451_vm1, 1, %v8037_v4  ;;  %v443_v10 = vld [vmem:[%s8245_s1 + $0x48] sm:$0xff]  ;;  %v445_v11 = vld [vmem:[%s8245_s1 + $0x58] sm:$0xff]  ;;  %vm455_vm3 = vcmp.gt.f32.partialorder %v439_v7, 0.5  ;;  %vm457_vm4 = vcmp.gt.f32.partialorder %v441_v9, 0.5 }
  0x21   : > { %8246 = vst [vmem:[#allocation5_spill] sm:$0xff] %v5027_v5  ;;  %901 = vperm.xlu1 %4677, %v5027_v5   ;;  %1374 = vperm.xlu0 %4676, %v5027_v5   ;;  %vm459_vm5 = vcmp.gt.f32.partialorder %v443_v10, 0.5  ;;  %vm461_vm6 = vcmp.gt.f32.partialorder %v445_v11, 0.5  ;;  %v5053_v12 = vsel %vm453_vm2, 1, %v8037_v4  ;;  %v447_v13 = vld [vmem:[%s8245_s1 + $0x68] sm:$0xff]  ;;  %v449_v14 = vld [vmem:[%s8245_s1 + $0x78] sm:$0xff] }
  0x22   : > { %8247 = vst [vmem:[#allocation6_spill] sm:$0xff] %v5053_v12  ;;  %v5062_v15 = vsel %vm455_vm3, 1, %v8037_v4  ;;  %v5068_v17 = vsel %vm457_vm4, 1, %v8037_v4  ;;  %v5071_v18 = vsel %vm459_vm5, 1, %v8037_v4  ;;  %v5074_v19 = vsel %vm461_vm6, 1, %v8037_v4  ;;  %v5091_v23 = vld [vmem:[%s5082_s28] sm:$0xff] }
  0x23   : > { %8248 = vst [vmem:[#allocation7_spill] sm:$0xff] %v5062_v15  ;;  %8249 = vst [vmem:[#allocation8_spill] sm:$0xff] %v5068_v17  ;;  %vm463_vm7 = vcmp.gt.f32.partialorder %v447_v13, 0.5  ;;  %vm465_vm8 = vcmp.gt.f32.partialorder %v449_v14, 0.5  ;;  %vm452_vm9 = vcmp.gt.f32.partialorder %v436_v16, 0.5  ;;  %v5094_v24 = vld [vmem:[%s5082_s28 + $0x8] sm:$0xff]  ;;  %v511_v63 = vmul.f32 %v5091_v23, %v5091_v23 }
  0x24   : > { %8250 = vst [vmem:[#allocation9_spill] sm:$0xff] %v5071_v18  ;;  %v5085_v21 = vsel %vm463_vm7, 1, %v8037_v4  ;;  %v5088_v22 = vsel %vm465_vm8, 1, %v8037_v4  ;;  %v5097_v25 = vld [vmem:[%s5082_s28 + $0x10] sm:$0xff]  ;;  %v5101_v26 = vld [vmem:[%s5082_s28 + $0x18] sm:$0xff]  ;;  %v5104_v27 = vld [vmem:[%s5082_s28 + $0x20] sm:$0xff]  ;;  %v512_v0 = vmul.f32 %v5094_v24, %v5094_v24 }
  0x25   : > { %904 = vperm.xlu1 %4677, %v5038_v8   ;;  %1377 = vperm.xlu0 %4676, %v5038_v8   ;;  %v5107_v28 = vld [vmem:[%s5082_s28 + $0x28] sm:$0xff]  ;;  %v469_v29 = vsel %vm8091_vm10, %v5091_v23, 0.0  ;;  %v470_v30 = vsel %vm8091_vm10, %v5094_v24, 0.0  ;;  %v472_v31 = vsel %vm8091_vm10, %v5097_v25, 0.0  ;;  %v5118_v33 = vsel %vm452_vm9, 1, %v8037_v4  ;;  %v5121_v34 = vld [vmem:[%s5082_s28 + $0x30] sm:$0xff] }
  0x26   : > { %v5124_v35 = vld [vmem:[%s5082_s28 + $0x38] sm:$0xff]  ;;  %v5127_v36 = vld [vmem:[%s5082_s28 + $0x40] sm:$0xff]  ;;  %v471_v37 = vadd.f32 %v470_v30, %v469_v29  ;;  %v474_v38 = vsel %vm8091_vm10, %v5101_v26, 0.0  ;;  %v476_v39 = vsel %vm8091_vm10, %v5104_v27, 0.0  ;;  %v5135_v40 = vld [vmem:[%s5082_s28 + $0x48] sm:$0xff]  ;;  %v478_v43 = vsel %vm8091_vm10, %v5107_v28, 0.0 }
  0x27   : > { %v428_v41 = vld [vmem:[%s5082_s28 + $0x50] sm:$0xff]  ;;  %v429_v42 = vld [vmem:[%s5082_s28 + $0x58] sm:$0xff]  ;;  %v480_v44 = vsel %vm8091_vm10, %v5121_v34, 0.0  ;;  %v490_v45 = vsel %vm8091_vm10, %v5127_v36, 0.0  ;;  %v430_v46 = vld [vmem:[%s5082_s28 + $0x60] sm:$0xff]  ;;  %v482_v50 = vsel %vm8091_vm10, %v5124_v35, 0.0  ;;  %v513_v1 = vmul.f32 %v5097_v25, %v5097_v25 }
  0x28   : > { %v431_v47 = vld [vmem:[%s5082_s28 + $0x68] sm:$0xff]  ;;  %v432_v48 = vld [vmem:[%s5082_s28 + $0x70] sm:$0xff]  ;;  %v473_v49 = vadd.f32 %v472_v31, %v471_v37  ;;  %v491_v51 = vsel %vm8091_vm10, %v5135_v40, 0.0  ;;  %v493_v52 = vsel %vm8091_vm10, %v428_v41, 0.0  ;;  %v5155_v53 = vld [vmem:[%s5082_s28 + $0x78] sm:$0xff]  ;;  %v495_v55 = vsel %vm8091_vm10, %v429_v42, 0.0 }
  0x29   : > { %4678 = vset.pattern.permute.xlu1 %v8039_v20  ;;  %1383 = vperm.xlu0 %4676, %v5053_v12   ;;  %v492_v54 = vadd.f32 %v491_v51, %v490_v45  ;;  %v497_v56 = vsel %vm8091_vm10, %v430_v46, 0.0  ;;  %v499_v57 = vsel %vm8091_vm10, %v431_v47, 0.0  ;;  %v501_v59 = vsel %vm8091_vm10, %v432_v48, 0.0  ;;  %s4901_s18 = smov 127   ;;  %s8732_s0 = smov 64  }
  0x2a   : > { %1513 = vperm.xlu1 %4678, %v5038_v8   ;;  %v475_v58 = vadd.f32 %v474_v38, %v473_v49  ;;  %v503_v60 = vsel %vm8091_vm10, %v5155_v53, 0.0  ;;  %v514_v7 = vmul.f32 %v5101_v26, %v5101_v26  ;;  %v515_v9 = vmul.f32 %v5104_v27, %v5104_v27 }
  0x2b   : > { %v494_v62 = vadd.f32 %v493_v52, %v492_v54  ;;  %v516_v10 = vmul.f32 %v5107_v28, %v5107_v28  ;;  %v517_v13 = vmul.f32 %v5121_v34, %v5121_v34  ;;  %v518_v14 = vmul.f32 %v5124_v35, %v5124_v35 }
  0x2c   : > { %v477_v6 = vadd.f32 %v476_v39, %v475_v58  ;;  %v519_v16 = vmul.f32 %v5127_v36, %v5127_v36  ;;  %v520_v30 = vmul.f32 %v5135_v40, %v5135_v40  ;;  %v521_v31 = vmul.f32 %v428_v41, %v428_v41 }
  0x2d   : > { %1389 = vperm.xlu0 %4676, %v5062_v15   ;;  %v496_v11 = vadd.f32 %v495_v55, %v494_v62  ;;  %v522_v37 = vmul.f32 %v429_v42, %v429_v42  ;;  %v527_v39 = vsel %vm8091_vm10, %v511_v63, 0.0  ;;  %v528_v45 = vsel %vm8091_vm10, %v512_v0, 0.0 }
  0x2e   : > { %4679 = vset.pattern.permute.xlu1 %v8032_v32  ;;  %v479_v29 = vadd.f32 %v478_v43, %v477_v6  ;;  %v530_v49 = vsel %vm8091_vm10, %v513_v1, 0.0  ;;  %v523_v52 = vmul.f32 %v430_v46, %v430_v46  ;;  %v524_v54 = vmul.f32 %v431_v47, %v431_v47 }
  0x2f   : > { %1078 = vperm.xlu1 %4679, %v5027_v5   ;;  %v498_v38 = vadd.f32 %v497_v56, %v496_v11  ;;  %v529_v55 = vadd.f32 %v528_v45, %v527_v39  ;;  %v525_v58 = vmul.f32 %v432_v48, %v432_v48  ;;  %v532_v41 = vsel %vm8091_vm10, %v514_v7, 0.0 }
  0x30   : > { %v481_v51 = vadd.f32 %v480_v44, %v479_v29  ;;  %v534_v42 = vsel %vm8091_vm10, %v515_v9, 0.0  ;;  %v548_v63 = vsel %vm8091_vm10, %v519_v16, 0.0  ;;  %v549_v0 = vsel %vm8091_vm10, %v520_v30, 0.0 }
  0x31   : > { %1395 = vperm.xlu0 %4676, %v5068_v17   ;;  %v500_v43 = vadd.f32 %v499_v57, %v498_v38  ;;  %v531_v62 = vadd.f32 %v530_v49, %v529_v55  ;;  %v536_v44 = vsel %vm8091_vm10, %v516_v10, 0.0  ;;  %v550_v46 = vadd.f32 %v549_v0, %v548_v63 }
  0x32   : > { %v483_v56 = vadd.f32 %v482_v50, %v481_v51  ;;  %v551_v47 = vsel %vm8091_vm10, %v521_v31, 0.0  ;;  %v8035_v6 = vmov 3   ;;  %v538_v7 = vsel %vm8091_vm10, %v517_v13, 0.0 }
  0x33   : > { %4680 = vset.pattern.permute.xlu1 %v8028_v61  ;;  %v502_v1 = vadd.f32 %v501_v59, %v500_v43  ;;  %v533_v57 = vadd.f32 %v532_v41, %v531_v62  ;;  %v553_v50 = vsel %vm8091_vm10, %v522_v37, 0.0  ;;  %v540_v59 = vsel %vm8091_vm10, %v518_v14, 0.0  ;;  %v440_v62 = vld [vmem:[%s8245_s1 + $0x30] sm:$0xff] }
  0x34   : > { %1646 = vperm.xlu1 %4680, %v5027_v5   ;;  %v484_v48 = vrot.slane %v483_v56, 4  ;;  %v552_v10 = vadd.f32 %v551_v47, %v550_v46  ;;  %v555_v11 = vsel %vm8091_vm10, %v523_v52, 0.0  ;;  %v557_v38 = vsel %vm8091_vm10, %v524_v54, 0.0  ;;  %v438_v52 = vld [vmem:[%s8245_s1 + $0x20] sm:$0xff] }
  0x35   : > { %1401 = vperm.xlu0 %4676, %v5071_v18   ;;  %v504_v9 = vadd.f32 %v503_v60, %v502_v1  ;;  %v535_v29 = vadd.f32 %v534_v42, %v533_v57  ;;  %v526_v13 = vmul.f32 %v5155_v53, %v5155_v53  ;;  %v559_v45 = vsel %vm8091_vm10, %v525_v58, 0.0  ;;  %v442_v46 = vld [vmem:[%s8245_s1 + $0x40] sm:$0xff] }
  0x36   : > { %v485_v16 = vadd.f32 %v484_v48, %v483_v56  ;;  %v554_v31 = vadd.f32 %v553_v50, %v552_v10  ;;  %vm454_vm11 = vcmp.gt.f32.partialorder %v438_v52, 0.5  ;;  %vm456_vm12 = vcmp.gt.f32.partialorder %v440_v62, 0.5 }
  0x37   : > { %v505_v30 = vrot.slane %v504_v9, 4  ;;  %v537_v37 = vadd.f32 %v536_v44, %v535_v29  ;;  %v561_v58 = vsel %vm8091_vm10, %v526_v13, 0.0  ;;  %vm458_vm13 = vcmp.gt.f32.partialorder %v442_v46, 0.5 }
  0x38   : > { %1649 = vperm.xlu1 %4680, %v5038_v8   ;;  %v486_v39 = vrot.slane %v485_v16, 2  ;;  %v556_v14 = vadd.f32 %v555_v11, %v554_v31  ;;  %v5234_v11 = vsel %vm456_vm12, 1, %v8037_v4  ;;  %vm8090_vm1 = vcmask 1041409  }
  0x39   : > { %1407 = vperm.xlu0 %4676, %v5074_v19   ;;  %v506_v60 = vadd.f32 %v505_v30, %v504_v9  ;;  %v539_v51 = vadd.f32 %v538_v7, %v537_v37  ;;  %v5228_v7 = vsel %vm454_vm11, 1, %v8037_v4  ;;  %v444_v9 = vld [vmem:[%s8245_s1 + $0x50] sm:$0xff]  ;;  %8253 = vst [vmem:[#allocation11_spill] sm:$0xff] %v5234_v11 }
  0x3a   : > { %v487_v49 = vadd.f32 %v486_v39, %v485_v16  ;;  %v558_v55 = vadd.f32 %v557_v38, %v556_v14  ;;  %8252 = vst [vmem:[#allocation10_spill] sm:$0xff] %v5228_v7  ;;  %v446_v16 = vld [vmem:[%s8245_s1 + $0x60] sm:$0xff]  ;;  %v5243_v39 = vsel %vm458_vm13, 1, %v8037_v4  ;;  %vm460_vm14 = vcmp.gt.f32.partialorder %v444_v9, 0.5 }
  0x3b   : > { %v507_v54 = vrot.slane %v506_v60, 2  ;;  %v541_v43 = vadd.f32 %v540_v59, %v539_v51  ;;  %vm462_vm15 = vcmp.gt.f32.partialorder %v446_v16, 0.5  ;;  %v448_v51 = vld [vmem:[%s8245_s1 + $0x70] sm:$0xff] }
  0x3c   : > { %4681 = vset.pattern.permute.xlu1 %v8035_v6  ;;  %v488_v53 = vrot.slane %v487_v49, 1  ;;  %v560_v42 = vadd.f32 %v559_v45, %v558_v55  ;;  %vm464_vm0 = vcmp.gt.f32.partialorder %v448_v51, 0.5 }
  0x3d   : > { %1225 = vperm.xlu1 %4681, %v5038_v8   ;;  %1413 = vperm.xlu0 %4676, %v5085_v21   ;;  %v508_v41 = vadd.f32 %v507_v54, %v506_v60  ;;  %v542_v56 = vrot.slane %v541_v43, 4  ;;  %v5252_v54 = vsel %vm460_vm14, 1, %v8037_v4  ;;  %v5264_v62 = vsel %vm464_vm0, 1, %v8037_v4 }
  0x3e   : > { %v562_v0 = vadd.f32 %v561_v58, %v560_v42  ;;  %v489_v1 = vadd.f32 %v488_v53, %v487_v49  ;;  %8254 = vst [vmem:[#allocation12_spill] sm:$0xff] %v5252_v54  ;;  %v5256_v53 = vsel %vm462_vm15, 1, %v8037_v4  ;;  %8255 = vst [vmem:[#allocation13_spill] sm:$0xff] %v5264_v62 }
  0x3f   : > { %v509_v63 = vrot.slane %v508_v41, 1  ;;  %v543_v44 = vadd.f32 %v542_v56, %v541_v43 }
  0x40   : > { %v563_v47 = vrot.slane %v562_v0, 4  ;;  %v570_v10 = vmul.f32 0.015625, %v489_v1  ;;  %v8027_v1 = vlaneseq }
  0x41   : > { %4682 = vset.pattern.permute.xlu1 %v8042_v2  ;;  %1419 = vperm.xlu0 %4676, %v5088_v22   ;;  %v510_v48 = vadd.f32 %v509_v63, %v508_v41  ;;  %v544_v57 = vrot.slane %v543_v44, 2 }
  0x42   : > { %1380 = vperm.xlu1 %4682, %v5118_v33   ;;  %v564_v50 = vadd.f32 %v563_v47, %v562_v0  ;;  %v574_v37 = vmul.f32 %v570_v10, %v570_v10  ;;  %v4128_v0 = vld [vmem:[%s8016_s2] ss:$0 sm:$0xff] }
  0x43   : > { %v545_v59 = vadd.f32 %v544_v57, %v543_v44  ;;  %v571_v31 = vmul.f32 0.015625, %v510_v48  ;;  %v4895_v44 = vmov 1966171168  }
  0x44   : > { %v565_v29 = vrot.slane %v564_v50, 2  ;;  %v633_v46 = vunpack.c.l.s4 %v4895_v44 }
  0x45   : > { %4719 = vset.pattern.permute.xlu0 %v8039_v20  ;;  %v546_v30 = vrot.slane %v545_v59, 1  ;;  %v575_v49 = vmul.f32 %v571_v31, %v571_v31 }
  0x46   : > { %4683 = vset.pattern.permute.xlu1 %v8045_v3  ;;  %1510 = vperm.xlu0 %4719, %v5027_v5   ;;  %v566_v38 = vadd.f32 %v565_v29, %v564_v50  ;;  %v5279_v50 = vshrl.u32 %v8027_v1, 7  ;;  %v634_v9 = vunpack.c.0.s8 %v633_v46  ;;  %v4129_v29 = vld [vmem:[%s8017_s3] ss:$0 sm:$0xff] }
  0x47   : > { %907 = vperm.xlu1 %4683, %v5118_v33   ;;  %v547_v13 = vadd.f32 %v546_v30, %v545_v59 }
  0x48   : > { %v567_v45 = vrot.slane %v566_v38, 1  ;;  %8256 = vst [vmem:[#allocation14_spill] sm:$0xff] %v5279_v50  ;;  %vm8093_vm2 = vcmp.lt.s32.totalorder %v5279_v50, 7  ;;  %vm8092_vm3 = vcmp.lt.s32.totalorder %v5279_v50, 1 }
  0x49   : > { %v572_v60 = vmul.f32 0.015625, %v547_v13  ;;  %v5292_v13 = vsub.s32 %v634_v9, %v5279_v50 }
  0x4a   : > { %1516 = vperm.xlu0 %4719, %v5118_v33   ;;  %v568_v14 = vadd.f32 %v567_v45, %v566_v38  ;;  %v5289_v38 = vsub.s32 0, %v5279_v50 }
  0x4b   : > { %910 = vperm.xlu1 %4683, %v5053_v12   ;;  %v576_v52 = vsub.f32 %v572_v60, %v574_v37  ;;  %8258 = vst [vmem:[#allocation16_spill] sm:$0xff] %v5292_v13 }
  0x4c   : > { %v573_v55 = vmul.f32 0.015625, %v568_v14  ;;  %8257 = vst [vmem:[#allocation15_spill] sm:$0xff] %v5289_v38 }
  0x4d   : > { %v578_v43 = vmax.f32 %v576_v52, 0.0 }
  0x4e   : > { %1522 = vperm.xlu0 %4719, %v5228_v7   ;;  %v577_v58 = vsub.f32 %v573_v55, %v575_v49 }
  0x4f   : > { %4684 = vset.pattern.permute.xlu1 %v8039_v20  ;;  %v580_v41 = vadd.f32 1e-06, %v578_v43 }
  0x50   : > { %1519 = vperm.xlu1 %4684, %v5053_v12   ;;  %v579_v42 = vmax.f32 %v577_v58, 0.0 }
  0x51   : > { %4794 = vrsqrt.f32 %v580_v41 }
  0x52   : > { %1528 = vperm.xlu0 %4719, %v5234_v11   ;;  %v581_v56 = vadd.f32 1e-06, %v579_v42 }
  0x54   : > { %4685 = vset.pattern.permute.xlu1 %v8032_v32  ;;  %4796 = vrsqrt.f32 %v581_v56 }
  0x55   : > { %1084 = vperm.xlu1 %4685, %v5118_v33  }
  0x56   : > { %1534 = vperm.xlu0 %4719, %v5243_v39  }
  0x59   : > { %4686 = vset.pattern.permute.xlu1 %v8028_v61 }
  0x5a   : > { %1652 = vperm.xlu1 %4686, %v5118_v33   ;;  %1540 = vperm.xlu0 %4719, %v5252_v54  }
  0x5b   : > { %v4795_v63 = vpop.eup %4794 }
  0x5c   : > { %v590_v47 = vmul.f32 %v4795_v63, %v4128_v0 }
  0x5e   : > { %1655 = vperm.xlu1 %4686, %v5053_v12   ;;  %1546 = vperm.xlu0 %4719, %v5256_v53   ;;  %v4797_v48 = vpop.eup %4796  ;;  %v592_v59 = vmul.f32 %v590_v47, %v570_v10  ;;  %v5298_v37 = vrot.slane %v590_v47, %v5289_v38 }
  0x5f   : > { %v5276_v57 = vmul.f32 %v4797_v48, %v4128_v0 }
  0x60   : > { %v616_v60 = vmul.f32 %v5298_v37, %v5094_v24  ;;  %v617_v14 = vmul.f32 %v5298_v37, %v5097_v25  ;;  %v618_v51 = vmul.f32 %v5298_v37, %v5101_v26  ;;  %v619_v52 = vmul.f32 %v5298_v37, %v5104_v27 }
  0x61   : > { %v593_v16 = vmul.f32 %v5276_v57, %v571_v31  ;;  %v620_v55 = vmul.f32 %v5298_v37, %v5107_v28  ;;  %v621_v43 = vmul.f32 %v5298_v37, %v5121_v34 }
  0x62   : > { %4687 = vset.pattern.permute.xlu1 %v8035_v6  ;;  %1552 = vperm.xlu0 %4719, %v5264_v62  }
  0x63   : > { %1231 = vperm.xlu1 %4687, %v5053_v12   ;;  %v602_v30 = vrot.slane %v593_v16, 7 }
  0x65   : > { %v604_v10 = vsel %vm8090_vm1, %v602_v30, %v592_v59 }
  0x66   : > { %4721 = vset.pattern.permute.xlu0 %v8032_v32  ;;  %v606_v31 = vsub.f32 %v4129_v29, %v604_v10 }
  0x67   : > { %4688 = vset.pattern.permute.xlu1 %v8042_v2  ;;  %1081 = vperm.xlu0 %4721, %v5038_v8  }
  0x68   : > { %1386 = vperm.xlu1 %4688, %v5228_v7   ;;  %v5301_v45 = vrot.slane %v606_v31, %v5292_v13 }
  0x6a   : > { %v646_v49 = vrot.slane %v5301_v45, %v5292_v13 }
  0x6b   : > { %1087 = vperm.xlu0 %4721, %v5053_v12  }
  0x6c   : > { %4689 = vset.pattern.permute.xlu1 %v8045_v3  ;;  %v5320_v24 = vrot.slane %v646_v49, %v5289_v38 }
  0x6d   : > { %913 = vperm.xlu1 %4689, %v5228_v7  }
  0x6e   : > { %v665_v25 = vadd.f32 %v5320_v24, %v616_v60  ;;  %v666_v26 = vadd.f32 %v5320_v24, %v617_v14  ;;  %v667_v27 = vadd.f32 %v5320_v24, %v618_v51  ;;  %v668_v28 = vadd.f32 %v5320_v24, %v619_v52 }
  0x6f   : > { %1093 = vperm.xlu0 %4721, %v5062_v15   ;;  %v669_v58 = vadd.f32 %v5320_v24, %v620_v55  ;;  %v670_v34 = vadd.f32 %v5320_v24, %v621_v43 }
  0x70   : > { %v5330_v41 = vmax.f32 %v665_v25, 0.0  ;;  %v5332_v42 = vmax.f32 %v666_v26, 0.0  ;;  %v5334_v56 = vmax.f32 %v667_v27, 0.0  ;;  %v5342_v44 = vmax.f32 %v668_v28, 0.0 }
  0x71   : > { %916 = vperm.xlu1 %4689, %v5062_v15   ;;  %v5345_v47 = vmax.f32 %v669_v58, 0.0  ;;  %v5347_v48 = vmax.f32 %v670_v34, 0.0 }
  0x72   : > { %8259 = vst [vmem:[#allocation17_spill] sm:$0xff] %v5332_v42  ;;  %8260 = vst [vmem:[#allocation18_spill] sm:$0xff] %v5334_v56  ;;  %v1037_v63 = vrot.slane %v5330_v41, 1  ;;  %v1038_v0 = vrot.slane %v5332_v42, 1  ;;  %v1039_v46 = vrot.slane %v5334_v56, 1  ;;  %v699_v9 = vrot.slane %v5332_v42, 7 }
  0x73   : > { %1099 = vperm.xlu0 %4721, %v5068_v17   ;;  %8261 = vst [vmem:[#allocation19_spill] sm:$0xff] %v5342_v44  ;;  %8262 = vst [vmem:[#allocation20_spill] sm:$0xff] %v5345_v47  ;;  %v700_v59 = vrot.slane %v5334_v56, 7  ;;  %v1040_v31 = vrot.slane %v5342_v44, 1  ;;  %v1041_v60 = vrot.slane %v5345_v47, 1  ;;  %v701_v14 = vrot.slane %v5342_v44, 7 }
  0x74   : > { %8263 = vst [vmem:[#allocation21_spill] sm:$0xff] %v5347_v48  ;;  %v5356_v16 = vsel %vm8093_vm2, %v1037_v63, %v1038_v0  ;;  %v5360_v29 = vsel %vm8093_vm2, %v1038_v0, %v1039_v46  ;;  %v702_v49 = vrot.slane %v5345_v47, 7  ;;  %v1042_v51 = vrot.slane %v5347_v48, 1 }
  0x75   : > { %4690 = vset.pattern.permute.xlu1 %v8039_v20  ;;  %8264 = vst [vmem:[#allocation22_spill] sm:$0xff] %v5360_v29  ;;  %v5366_v30 = vpack.c.bf16 %v5360_v29, %v5356_v16  ;;  %v5370_v10 = vsel %vm8092_vm3, %v699_v9, %v700_v59  ;;  %v5380_v52 = vsel %vm8093_vm2, %v1039_v46, %v1040_v31  ;;  %v703_v55 = vrot.slane %v5347_v48, 7 }
  0x76   : > { %1525 = vperm.xlu1 %4690, %v5062_v15   ;;  %v5385_v43 = vsel %vm8093_vm2, %v1040_v31, %v1041_v60  ;;  %v5389_v25 = vsel %vm8092_vm3, %v701_v14, %v702_v49  ;;  %v5393_v26 = vsel %vm8092_vm3, %v700_v59, %v701_v14  ;;  %v5405_v58 = vsel %vm8093_vm2, %v1041_v60, %v1042_v51 }
  0x77   : > { %1105 = vperm.xlu0 %4721, %v5071_v18   ;;  %8265 = vst [vmem:[#allocation23_spill] sm:$0xff] %v5366_v30  ;;  %v5400_v28 = vpack.c.bf16 %v5393_v26, %v5370_v10  ;;  %8267 = vst [vmem:[#allocation25_spill] sm:$0xff] %v5405_v58  ;;  %v5411_v34 = vsel %vm8092_vm3, %v702_v49, %v703_v55  ;;  %v622_v59 = vmul.f32 %v5298_v37, %v5124_v35 }
  0x78   : > { %8268 = vst [vmem:[#allocation26_spill] sm:$0xff] %v5411_v34  ;;  %v5417_v46 = vpack.c.bf16 %v5411_v34, %v5389_v25  ;;  %v8034_v31 = vrot.slane %v5330_v41, 7  ;;  %v615_v49 = vmul.f32 %v5298_v37, %v5091_v23 }
  0x79   : > { %8266 = vst [vmem:[#allocation24_spill] sm:$0xff] %v5400_v28  ;;  %v671_v60 = vadd.f32 %v5320_v24, %v622_v59 }
  0x7a   : > { %4691 = vset.pattern.permute.xlu1 %v8032_v32  ;;  %8269 = vst [vmem:[#allocation27_spill] sm:$0xff] %v5417_v46  ;;  %v5434_v14 = vsel %vm8092_vm3, %v8034_v31, %v699_v9  ;;  %v664_v9 = vadd.f32 %v5320_v24, %v615_v49 }
  0x7b   : > { %1090 = vperm.xlu1 %4691, %v5228_v7   ;;  %1111 = vperm.xlu0 %4721, %v5074_v19   ;;  %v5450_v59 = vmax.f32 %v671_v60, 0.0 }
  0x7c   : > { %v5452_v1 = vmax.f32 %v664_v9, 0.0 }
  0x7d   : > { %8270 = vst [vmem:[#allocation28_spill] sm:$0xff] %v5450_v59  ;;  %v8031_v23 = vrot.slane %v5450_v59, 1 }
  0x7e   : > { %v8030_v37 = vrot.slane %v5452_v1, 1 }
  0x7f   : > { %4692 = vset.pattern.permute.xlu1 %v8028_v61  ;;  %1117 = vperm.xlu0 %4721, %v5085_v21   ;;  %v5468_v49 = vsel %vm8093_vm2, %v1042_v51, %v8031_v23  ;;  %v8274_v23 = vmov 0 }
  0x80   : > { %1658 = vperm.xlu1 %4692, %v5228_v7   ;;  %v5481_v9 = vpack.c.bf16 %v5468_v49, %v5405_v58 }
  0x82   : > { %8272 = vst [vmem:[#allocation30_spill] sm:$0xff] %v5481_v9  ;;  %v8056_v9 = vrot.slane %v5452_v1, 7 }
  0x83   : > { %1123 = vperm.xlu0 %4721, %v5088_v22  }
  0x84   : > { %1661 = vperm.xlu1 %4692, %v5062_v15  }
  0x87   : > { %4724 = vset.pattern.permute.xlu0 %v8035_v6 }
  0x88   : > { %4693 = vset.pattern.permute.xlu1 %v8035_v6  ;;  %1222 = vperm.xlu0 %4724, %v5027_v5  }
  0x89   : > { %1237 = vperm.xlu1 %4693, %v5062_v15  }
  0x8c   : > { %1228 = vperm.xlu0 %4724, %v5118_v33  }
  0x8d   : > { %4694 = vset.pattern.permute.xlu1 %v8042_v2 }
  0x8e   : > { %1392 = vperm.xlu1 %4694, %v5234_v11  }
  0x90   : > { %1234 = vperm.xlu0 %4724, %v5228_v7  }
  0x92   : > { %4695 = vset.pattern.permute.xlu1 %v8045_v3 }
  0x93   : > { %919 = vperm.xlu1 %4695, %v5234_v11  }
  0x94   : > { %1240 = vperm.xlu0 %4724, %v5234_v11  }
  0x97   : > { %922 = vperm.xlu1 %4695, %v5068_v17  }
  0x98   : > { %1246 = vperm.xlu0 %4724, %v5243_v39  }
  0x9b   : > { %4696 = vset.pattern.permute.xlu1 %v8039_v20 }
  0x9c   : > { %1531 = vperm.xlu1 %4696, %v5068_v17   ;;  %1252 = vperm.xlu0 %4724, %v5252_v54  }
  0xa0   : > { %4697 = vset.pattern.permute.xlu1 %v8032_v32  ;;  %v5455_v0 = vpop.permute.xlu1 %901  ;;  %v1375_v27 = vpop.permute.xlu0 %1374  ;;  %1258 = vperm.xlu0 %4724, %v5256_v53  }
  0xa1   : > { %1096 = vperm.xlu1 %4697, %v5234_v11   ;;  %vm1421_vm4 = vcmp.eq.s32.totalorder %v1375_v27, 1  ;;  %v5477_v27 = vsel %vm8093_vm2, %v8030_v37, %v1037_v63 }
  0xa2   : > { %vm1437_vm5 = vmpackc.low %vm1421_vm4, %vm1421_vm4  ;;  %8271 = vst [vmem:[#allocation29_spill] sm:$0xff] %v5477_v27 }
  0xa3   : > { %v1453_v35 = vsel %vm1437_vm5, 65537, %v8037_v4 }
  0xa4   : > { %v5461_v24 = vpop.permute.xlu1 %904  ;;  %v1378_v60 = vpop.permute.xlu0 %1377  ;;  %1267 = vperm.xlu0 %4724, %v5088_v22  }
  0xa5   : > { %4698 = vset.pattern.permute.xlu1 %v8028_v61  ;;  %vm1422_vm6 = vcmp.eq.s32.totalorder %v1378_v60, 1  ;;  %v1365_v61 = vpack.c.bf16 %v5356_v16, %v5477_v27 }
  0xa6   : > { %1664 = vperm.xlu1 %4698, %v5234_v11   ;;  %vm1438_vm7 = vmpackc.low %vm1422_vm6, %vm1422_vm6 }
  0xa7   : > { %v1454_v51 = vsel %vm1438_vm7, 65537, %v8037_v4 }
  0xa8   : > { %v5486_v60 = vpop.permute.xlu0 %1383  ;;  %4728 = vset.pattern.permute.xlu0 %v8037_v4  ;;  %v4162_v37 = vcombine.low %v1453_v35, %v1454_v51  ;;  %v8044_v35 = vrot.slane %v5450_v59, 7  ;;  %v639_v4 = vcombine.high %v5301_v45, %v5301_v45 }
  0xa9   : > { %8273 = vst [vmem:[#allocation31_spill] sm:$0xff] %v5486_v60  ;;  %v1514_v63 = vpop.permute.xlu1 %1513  ;;  %757 = vperm.xlu0 %4728, %v5027_v5   ;;  %v8292_v5 = vrot.slane %v5450_v59, 1  ;;  %v8318_v60 = vmov 0 }
  0xaa   : > { %1667 = vperm.xlu1 %4698, %v5068_v17   ;;  %vm5493_vm8 = vcmp.ne.s16.totalorder %v4162_v37, 0  ;;  %vm1558_vm11 = vcmp.eq.s32.totalorder %v1514_v63, 1 }
  0xab   : > { %v8275_v23 = vsel %vm5493_vm8, 4294967295, %v8274_v23  ;;  %v1501_v31 = vsel %vm5493_vm8, %v1365_v61, 0  ;;  %v5515_v61 = vsel %vm8092_vm3, %v703_v55, %v8044_v35  ;;  %v5530_v55 = vrot.slane %v5276_v57, %v5289_v38  ;;  %vm1574_vm14 = vmpackc.low %vm1558_vm11, %vm1558_vm11 }
  0xac   : > { %8276 = vst [vmem:[#allocation32_spill] sm:$0xff] %v8275_v23  ;;  %v5497_v32 = vpop.permute.xlu0 %1389 }
  0xad   : > { %8277 = vst [vmem:[#allocation33_spill] sm:$0xff] %v5497_v32  ;;  %1997 = vrot.lane.b32.xlu0 %v1501_v31, %s4896_s20  ;;  %v623_v51 = vmul.f32 %v5530_v55, %v5127_v36  ;;  %v624_v35 = vmul.f32 %v5530_v55, %v5135_v40  ;;  %v8282_v40 = vmov 6   ;;  %v8294_v32 = vmov 7  }
  0xae   : > { %4699 = vset.pattern.permute.xlu1 %v8035_v6  ;;  %v5503_v16 = vpop.permute.xlu1 %1078 }
  0xaf   : > { %1243 = vperm.xlu1 %4699, %v5068_v17  }
  0xb0   : > { %v5507_v37 = vpop.permute.xlu0 %1395 }
  0xb3   : > { %4700 = vset.pattern.permute.xlu1 %v8042_v2  ;;  %v1647_v31 = vpop.permute.xlu1 %1646  ;;  %v653_v2 = vrot.slane %v639_v4, %v5292_v13 }
  0xb4   : > { %1398 = vperm.xlu1 %4700, %v5243_v39   ;;  %v5521_v6 = vpop.permute.xlu0 %1401  ;;  %vm1693_vm12 = vcmp.eq.s32.totalorder %v1647_v31, 1 }
  0xb5   : > { %v5545_v57 = vrot.slane %v653_v2, %v5289_v38  ;;  %vm1709_vm15 = vmpackc.low %vm1693_vm12, %vm1693_vm12 }
  0xb7   : > { %v1650_v20 = vpop.permute.xlu1 %1649  ;;  %v672_v4 = vadd.f32 %v5545_v57, %v623_v51  ;;  %v673_v13 = vadd.f32 %v5545_v57, %v624_v35  ;;  %v8286_v35 = vrot.slane %v5330_v41, 7  ;;  %v8288_v51 = vmov 0  }
  0xb8   : > { %4701 = vset.pattern.permute.xlu1 %v8045_v3  ;;  %v5526_v23 = vpop.permute.xlu0 %1407  ;;  %vm1694_vm9 = vcmp.eq.s32.totalorder %v1650_v20, 1  ;;  %v1725_v48 = vsel %vm1709_vm15, 65537, %v8288_v51 }
  0xb9   : > { %8278 = vst [vmem:[#allocation34_spill] sm:$0xff] %v5526_v23  ;;  %925 = vperm.xlu1 %4701, %v5243_v39   ;;  %v5557_v2 = vmax.f32 %v672_v4, 0.0  ;;  %v5559_v38 = vmax.f32 %v673_v13, 0.0  ;;  %vm1710_vm13 = vmpackc.low %vm1694_vm9, %vm1694_vm9  ;;  %v5567_v63 = vsel %vm8092_vm3, %v8056_v9, %v8286_v35 }
  0xba   : > { %8287 = vst [vmem:[#allocation41_spill] sm:$0xff] %v5567_v63  ;;  %v1726_v31 = vsel %vm1710_vm13, 65537, %v8288_v51  ;;  %v5579_v9 = vpack.c.bf16 %v5434_v14, %v5567_v63  ;;  %v8314_v63 = vmov 1  }
  0xbb   : > { %8284 = vst [vmem:[#allocation39_spill] sm:$0xff] %v5557_v2  ;;  %8285 = vst [vmem:[#allocation40_spill] sm:$0xff] %v5559_v38  ;;  %v1044_v13 = vrot.slane %v5557_v2, 1  ;;  %v4178_v46 = vcombine.low %v1725_v48, %v1726_v31  ;;  %v8293_v28 = vrot.slane %v5559_v38, 1 }
  0xbc   : > { %v5540_v3 = vpop.permute.xlu1 %1225  ;;  %v5542_v34 = vpop.permute.xlu0 %1413  ;;  %8290 = vst [vmem:[#allocation42_spill] sm:$0xff] %v5579_v9 }
  0xbd   : > { %8279 = vst [vmem:[#allocation35_spill] sm:$0xff] %v5540_v3  ;;  %8280 = vst [vmem:[#allocation36_spill] sm:$0xff] %v5542_v34  ;;  %928 = vperm.xlu1 %4701, %v5071_v18   ;;  %v1590_v34 = vsel %vm1574_vm14, 65537, %v8288_v51  ;;  %v5587_v17 = vsel %vm8093_vm2, %v8292_v5, %v1044_v13  ;;  %v5593_v29 = vsel %vm8093_vm2, %v1044_v13, %v8293_v28  ;;  %vm5613_vm12 = vcmp.ne.s16.totalorder %v4178_v46, 0 }
  0xbe   : > { %v5602_v48 = vpack.c.bf16 %v5593_v29, %v5587_v17  ;;  %v893_v28 = vpack.c.bf16 %v5332_v42, %v5330_v41 }
  0xc0   : > { %v5550_v36 = vpop.permute.xlu0 %1419  ;;  %8298 = vst [vmem:[#allocation45_spill] sm:$0xff] %v5602_v48  ;;  %v8077_v48 = vrot.slane %v5559_v38, 7 }
  0xc1   : > { %8281 = vst [vmem:[#allocation37_spill] sm:$0xff] %v5550_v36  ;;  %4702 = vset.pattern.permute.xlu1 %v8282_v40  ;;  %v5553_v45 = vpop.permute.xlu1 %1380  ;;  %v8289_v36 = vmov 2  }
  0xc2   : > { %8283 = vst [vmem:[#allocation38_spill] sm:$0xff] %v5553_v45  ;;  %1537 = vperm.xlu1 %4702, %v5071_v18  }
  0xc5   : > { %v1511_v20 = vpop.permute.xlu0 %1510 }
  0xc6   : > { %vm1557_vm0 = vcmp.eq.s32.totalorder %v1511_v20, 1  ;;  %4703 = vset.pattern.permute.xlu1 %v8289_v36  ;;  %v908_v4 = vpop.permute.xlu1 %907 }
  0xc7   : > { %vm1573_vm4 = vmpackc.low %vm1557_vm0, %vm1557_vm0  ;;  %1102 = vperm.xlu1 %4703, %v5243_v39   ;;  %vm950_vm5 = vcmp.eq.s32.totalorder %v908_v4, 1 }
  0xc8   : > { %v1589_v35 = vsel %vm1573_vm4, 65537, %v8288_v51  ;;  %vm966_vm11 = vmpackc.low %vm950_vm5, %vm950_vm5 }
  0xc9   : > { %v5581_v20 = vpop.permute.xlu0 %1516  ;;  %v4170_v47 = vcombine.low %v1589_v35, %v1590_v34  ;;  %v8295_v34 = vmov 0  ;;  %v982_v13 = vsel %vm966_vm11, 65537, %v8288_v51  ;;  %v1773_v35 = vsel %vm5613_vm12, %v893_v28, 0 }
  0xca   : > { %8291 = vst [vmem:[#allocation43_spill] sm:$0xff] %v5581_v20  ;;  %v911_v58 = vpop.permute.xlu1 %910 }
  0xcb   : > { %vm951_vm6 = vcmp.eq.s32.totalorder %v911_v58, 1  ;;  %4704 = vset.pattern.permute.xlu1 %v8294_v32  ;;  %vm5596_vm7 = vcmp.ne.s16.totalorder %v4170_v47, 0  ;;  %v8300_v58 = vmov 0 }
  0xcc   : > { %v8296_v34 = vsel %vm5596_vm7, 4294967295, %v8295_v34  ;;  %vm967_vm9 = vmpackc.low %vm951_vm6, %vm951_vm6  ;;  %1670 = vperm.xlu1 %4704, %v5243_v39   ;;  %v1637_v5 = vsel %vm5596_vm7, %v5579_v9, 0  ;;  %v8301_v58 = vsel %vm5613_vm12, 4294967295, %v8300_v58  ;;  %v705_v9 = vrot.slane %v5557_v2, 7 }
  0xcd   : > { %8297 = vst [vmem:[#allocation44_spill] sm:$0xff] %v8296_v34  ;;  %2021 = vrot.lane.b32.xlu0 %v1637_v5, %s8222_s29  ;;  %v5611_v47 = vpop.permute.xlu0 %1522  ;;  %8302 = vst [vmem:[#allocation47_spill] sm:$0xff] %v8301_v58  ;;  %v983_v31 = vsel %vm967_vm9, 65537, %v8288_v51  ;;  %v8304_v34 = vmov 3  }
  0xce   : > { %8299 = vst [vmem:[#allocation46_spill] sm:$0xff] %v5611_v47  ;;  %v4139_v46 = vcombine.low %v982_v13, %v983_v31  ;;  %v8305_v47 = vmov 0  ;;  %v8308_v13 = vrot.slane %v5450_v59, 7 }
  0xcf   : > { %v5618_v4 = vpop.permute.xlu1 %1519 }
  0xd0   : > { %8303 = vst [vmem:[#allocation48_spill] sm:$0xff] %v5618_v4  ;;  %1673 = vperm.xlu1 %4704, %v5071_v18   ;;  %vm5634_vm13 = vcmp.ne.s16.totalorder %v4139_v46, 0  ;;  %v8309_v46 = vmov 5  }
  0xd1   : > { %2045 = vrot.lane.b32.xlu0 %v1773_v35, %s4898_s15  ;;  %v5625_v5 = vpop.permute.xlu0 %1528  ;;  %v8306_v47 = vsel %vm5634_vm13, 4294967295, %v8305_v47  ;;  %v1029_v31 = vsel %vm5634_vm13, %v893_v28, 0  ;;  %v5644_v35 = vsel %vm8092_vm3, %v8308_v13, %v705_v9 }
  0xd2   : > { %8307 = vst [vmem:[#allocation49_spill] sm:$0xff] %v8306_v47 }
  0xd4   : > { %4705 = vset.pattern.permute.xlu1 %v8304_v34  ;;  %v1085_v42 = vpop.permute.xlu1 %1084 }
  0xd5   : > { %1249 = vperm.xlu1 %4705, %v5071_v18   ;;  %772 = vperm.xlu0 %4728, %v5062_v15   ;;  %v5632_v58 = vpop.permute.xlu0 %1534  ;;  %v5650_v15 = vsel %vm8092_vm3, %v705_v9, %v8077_v48  ;;  %v4802_v9 = vld [vmem:[%s5082_s28 + $0x50] sm:$0xff]  ;;  %vm1127_vm14 = vcmp.eq.s32.totalorder %v1085_v42, 1 }
  0xd6   : > { %v625_v48 = vmul.f32 %v4802_v9, %v5530_v55  ;;  %vm1143_vm15 = vmpackc.low %vm1127_vm14, %vm1127_vm14 }
  0xd7   : > { %v1159_v27 = vsel %vm1143_vm15, 65537, %v8288_v51 }
  0xd8   : > { %v674_v28 = vadd.f32 %v5545_v57, %v625_v48 }
  0xd9   : > { %4706 = vset.pattern.permute.xlu1 %v8309_v46  ;;  %v5653_v18 = vpop.permute.xlu1 %1652  ;;  %1927 = vrot.lane.b32.xlu0 %v1029_v31, %s4896_s20  ;;  %v5656_v47 = vpop.permute.xlu0 %1540 }
  0xda   : > { %8310 = vst [vmem:[#allocation50_spill] sm:$0xff] %v5653_v18  ;;  %8311 = vst [vmem:[#allocation51_spill] sm:$0xff] %v5656_v47  ;;  %1404 = vperm.xlu1 %4706, %v5252_v54   ;;  %v4803_v18 = vld [vmem:[%s5082_s28 + $0x58] sm:$0xff] }
  0xdb   : > { %v626_v31 = vmul.f32 %v4803_v18, %v5530_v55  ;;  %v5684_v18 = vmax.f32 %v674_v28, 0.0 }
  0xdd   : > { %v5661_v13 = vpop.permute.xlu1 %1655  ;;  %v5663_v7 = vpop.permute.xlu0 %1546  ;;  %8317 = vst [vmem:[#allocation56_spill] sm:$0xff] %v5684_v18 }
  0xde   : > { %8312 = vst [vmem:[#allocation52_spill] sm:$0xff] %v5661_v13  ;;  %8313 = vst [vmem:[#allocation53_spill] sm:$0xff] %v5663_v7  ;;  %4707 = vset.pattern.permute.xlu1 %v8314_v63  ;;  %v675_v7 = vadd.f32 %v5545_v57, %v626_v31  ;;  %v1046_v31 = vrot.slane %v5684_v18, 1 }
  0xdf   : > { %931 = vperm.xlu1 %4707, %v5252_v54  }
  0xe0   : > { %v5686_v9 = vmax.f32 %v675_v7, 0.0 }
  0xe1   : > { %v5671_v47 = vpop.permute.xlu0 %1552 }
  0xe2   : > { %8315 = vst [vmem:[#allocation54_spill] sm:$0xff] %v5671_v47  ;;  %v5673_v4 = vpop.permute.xlu1 %1231  ;;  %v8082_v42 = vrot.slane %v5686_v9, 1 }
  0xe3   : > { %934 = vperm.xlu1 %4707, %v5074_v19   ;;  %vm1272_vm6 = vcmp.eq.s32.totalorder %v5673_v4, 1 }
  0xe4   : > { %v5708_v3 = vsel %vm8093_vm2, %v1046_v31, %v8082_v42  ;;  %vm5767_vm14 = vmpackc.low %vm1272_vm6, %vm1272_vm6 }
  0xe5   : > { %8322 = vst [vmem:[#allocation58_spill] sm:$0xff] %v5708_v3 }
  0xe6   : > { %v5678_v13 = vpop.permute.xlu0 %1081 }
  0xe7   : > { %4708 = vset.pattern.permute.xlu1 %v8282_v40  ;;  %v5681_v20 = vpop.permute.xlu1 %1386 }
  0xe8   : > { %8316 = vst [vmem:[#allocation55_spill] sm:$0xff] %v5681_v20  ;;  %1543 = vperm.xlu1 %4708, %v5074_v19  }
  0xea   : > { %v1088_v47 = vpop.permute.xlu0 %1087 }
  0xeb   : > { %vm1128_vm0 = vcmp.eq.s32.totalorder %v1088_v47, 1  ;;  %v8321_v47 = vrot.slane %v5559_v38, 1 }
  0xec   : > { %vm1144_vm4 = vmpackc.low %vm1128_vm0, %vm1128_vm0  ;;  %4709 = vset.pattern.permute.xlu1 %v8289_v36  ;;  %v914_v48 = vpop.permute.xlu1 %913 }
  0xed   : > { %v1160_v20 = vsel %vm1144_vm4, 65537, %v8288_v51  ;;  %1108 = vperm.xlu1 %4709, %v5252_v54   ;;  %v5702_v12 = vsel %vm8093_vm2, %v8321_v47, %v1046_v31  ;;  %vm952_vm11 = vcmp.eq.s32.totalorder %v914_v48, 1 }
  0xee   : > { %v1094_v28 = vpop.permute.xlu0 %1093  ;;  %v4147_v7 = vcombine.low %v1159_v27, %v1160_v20  ;;  %v5716_v20 = vpack.c.bf16 %v5708_v3, %v5702_v12  ;;  %vm968_vm1 = vmpackc.low %vm952_vm11, %vm952_vm11 }
  0xef   : > { %vm1130_vm15 = vcmp.eq.s32.totalorder %v1094_v28, 1 }
  0xf0   : > { %v917_v45 = vpop.permute.xlu1 %916  ;;  %vm5694_vm5 = vcmp.ne.s16.totalorder %v4147_v7, 0  ;;  %8323 = vst [vmem:[#allocation59_spill] sm:$0xff] %v5716_v20  ;;  %vm5774_vm10 = vmpackc.low %vm1130_vm15, %vm1130_vm15 }
  0xf1   : > { %v8319_v60 = vsel %vm5694_vm5, 4294967295, %v8318_v60  ;;  %4710 = vset.pattern.permute.xlu1 %v8294_v32  ;;  %v1206_v27 = vsel %vm5694_vm5, %v5366_v30, 0  ;;  %v707_v30 = vrot.slane %v5684_v18, 7  ;;  %vm953_vm9 = vcmp.eq.s32.totalorder %v917_v45, 1 }
  0xf2   : > { %8320 = vst [vmem:[#allocation57_spill] sm:$0xff] %v8319_v60  ;;  %1676 = vperm.xlu1 %4710, %v5252_v54   ;;  %1951 = vrot.lane.b32.xlu0 %v1206_v27, %s8222_s29  ;;  %v5720_v7 = vpop.permute.xlu0 %1099  ;;  %v8089_v27 = vrot.slane %v5686_v9, 7  ;;  %v8329_v54 = vrot.slane %v5559_v38, 7  ;;  %vm969_vm0 = vmpackc.low %vm953_vm9, %vm953_vm9 }
  0xf3   : > { %8324 = vst [vmem:[#allocation60_spill] sm:$0xff] %v5720_v7 }
  0xf5   : > { %v5722_v47 = vpop.permute.xlu1 %1525 }
  0xf6   : > { %8325 = vst [vmem:[#allocation61_spill] sm:$0xff] %v5722_v47  ;;  %1679 = vperm.xlu1 %4710, %v5074_v19   ;;  %v5725_v31 = vpop.permute.xlu0 %1105  ;;  %775 = vperm.xlu0 %4728, %v5234_v11   ;;  %v5740_v11 = vsel %vm8092_vm3, %v8329_v54, %v707_v30  ;;  %v4804_v54 = vld [vmem:[%s5082_s28 + $0x60] sm:$0xff] }
  0xf7   : > { %8326 = vst [vmem:[#allocation62_spill] sm:$0xff] %v5725_v31  ;;  %8330 = vst [vmem:[#allocation65_spill] sm:$0xff] %v5740_v11 }
  0xfa   : > { %4711 = vset.pattern.permute.xlu1 %v8304_v34  ;;  %v1091_v42 = vpop.permute.xlu1 %1090  ;;  %v5729_v60 = vpop.permute.xlu0 %1111 }
  0xfb   : > { %8327 = vst [vmem:[#allocation63_spill] sm:$0xff] %v5729_v60  ;;  %1255 = vperm.xlu1 %4711, %v5074_v19   ;;  %v5746_v60 = vsel %vm8092_vm3, %v707_v30, %v8089_v27  ;;  %v627_v30 = vmul.f32 %v4804_v54, %v5530_v55  ;;  %v4805_v27 = vld [vmem:[%s5082_s28 + $0x68] sm:$0xff]  ;;  %vm1129_vm4 = vcmp.eq.s32.totalorder %v1091_v42, 1  ;;  %v985_v54 = vsel %vm969_vm0, 65537, %v8288_v51 }
  0xfc   : > { %8331 = vst [vmem:[#allocation66_spill] sm:$0xff] %v5746_v60  ;;  %vm1145_vm6 = vmpackc.low %vm1129_vm4, %vm1129_vm4 }
  0xfd   : > { %v676_v4 = vadd.f32 %v5545_v57, %v627_v30  ;;  %v1304_v30 = vsel %vm5767_vm14, 65537, %v8288_v51  ;;  %v1161_v18 = vsel %vm1145_vm6, 65537, %v8288_v51  ;;  %vm8350_vm14 = vcmp.lt.s32.totalorder %v5279_v50, 7 }
  0xfe   : > { %v5734_v20 = vpop.permute.xlu0 %1117  ;;  %vm8351_vm15 = vmmov %vm8350_vm14  ;;  %vm1428_vm6 = vcmp.eq.s32.totalorder %v5507_v37, 1 }
  0xff   : > { %8328 = vst [vmem:[#allocation64_spill] sm:$0xff] %v5734_v20  ;;  %4712 = vset.pattern.permute.xlu1 %v8309_v46  ;;  %v5749_v31 = vpop.permute.xlu1 %1658  ;;  %v5780_v28 = vmax.f32 %v676_v4, 0.0  ;;  %v1162_v4 = vsel %vm5774_vm10, 65537, %v8288_v51 }
 0x100   : > { %8332 = vst [vmem:[#allocation67_spill] sm:$0xff] %v5749_v31  ;;  %1410 = vperm.xlu1 %4712, %v5256_v53   ;;  %v628_v31 = vmul.f32 %v4805_v27, %v5530_v55 }
 0x101   : > { %8340 = vst [vmem:[#allocation71_spill] sm:$0xff] %v5780_v28  ;;  %v1048_v27 = vrot.slane %v5780_v28, 1 }
 0x102   : > { %v5754_v20 = vpop.permute.xlu0 %1123  ;;  %v677_v45 = vadd.f32 %v5545_v57, %v628_v31  ;;  %v984_v31 = vsel %vm968_vm1, 65537, %v8288_v51 }
 0x103   : > { %8333 = vst [vmem:[#allocation68_spill] sm:$0xff] %v5754_v20  ;;  %v5756_v47 = vpop.permute.xlu1 %1661  ;;  %v4140_v23 = vcombine.low %v984_v31, %v985_v54  ;;  %v8341_v20 = vmov 0 }
 0x104   : > { %8334 = vst [vmem:[#allocation69_spill] sm:$0xff] %v5756_v47  ;;  %4713 = vset.pattern.permute.xlu1 %v8314_v63  ;;  %v5788_v3 = vmax.f32 %v677_v45, 0.0  ;;  %v8344_v45 = vpack.c.bf16 %v5370_v10, %v5434_v14  ;;  %v5816_v10 = vpack.c.bf16 %v5342_v44, %v5334_v56  ;;  %v5820_v14 = vpack.c.bf16 %v5385_v43, %v5380_v52 }
 0x105   : > { %937 = vperm.xlu1 %4713, %v5256_v53   ;;  %vm5810_vm10 = vcmp.ne.s16.totalorder %v4140_v23, 0  ;;  %v8362_v44 = vrot.slane %v5686_v9, 7 }
 0x106   : > { %v8103_v54 = vrot.slane %v5788_v3, 1  ;;  %8348 = vst [vmem:[#allocation74_spill] sm:$0xff] %v5820_v14  ;;  %v1030_v23 = vsel %vm5810_vm10, %v5816_v10, 0 }
 0x107   : > { %v5765_v7 = vpop.permute.xlu0 %1222 }
 0x108   : > { %8335 = vst [vmem:[#allocation70_spill] sm:$0xff] %v5765_v7  ;;  %v1238_v47 = vpop.permute.xlu1 %1237 }
 0x109   : > { %940 = vperm.xlu1 %4713, %v5085_v21  }
 0x10b   : > { %v1229_v48 = vpop.permute.xlu0 %1228 }
 0x10c   : > { %vm1271_vm3 = vcmp.eq.s32.totalorder %v1229_v48, 1 }
 0x10d   : > { %vm1287_vm2 = vmpackc.low %vm1271_vm3, %vm1271_vm3  ;;  %4714 = vset.pattern.permute.xlu1 %v8282_v40  ;;  %v1393_v42 = vpop.permute.xlu1 %1392 }
 0x10e   : > { %v1303_v60 = vsel %vm1287_vm2, 65537, %v8288_v51  ;;  %1549 = vperm.xlu1 %4714, %v5085_v21   ;;  %vm1274_vm2 = vcmp.eq.s32.totalorder %v1238_v47, 1  ;;  %vm1427_vm11 = vcmp.eq.s32.totalorder %v1393_v42, 1  ;;  %v8352_v42 = vmov 0 }
 0x10f   : > { %v1235_v7 = vpop.permute.xlu0 %1234  ;;  %v4155_v48 = vcombine.low %v1303_v60, %v1304_v30  ;;  %v4148_v30 = vcombine.low %v1161_v18, %v1162_v4  ;;  %v8349_v18 = vrot.slane %v5686_v9, 1  ;;  %v5839_v4 = vsel %vm8351_vm15, %v1048_v27, %v8103_v54  ;;  %vm1290_vm0 = vmpackc.low %vm1274_vm2, %vm1274_vm2 }
 0x110   : > { %vm1273_vm1 = vcmp.eq.s32.totalorder %v1235_v7, 1  ;;  %v8345_v7 = vmov 0  ;;  %vm1443_vm2 = vmpackc.low %vm1427_vm11, %vm1427_vm11 }
 0x111   : > { %vm5794_vm3 = vcmp.ne.s16.totalorder %v4155_v48, 0  ;;  %v8346_v7 = vsel %vm5810_vm10, 4294967295, %v8345_v7  ;;  %vm1289_vm9 = vmpackc.low %vm1273_vm1, %vm1273_vm1  ;;  %v5833_v47 = vsel %vm8350_vm14, %v8349_v18, %v1048_v27  ;;  %vm5843_vm4 = vcmp.ne.s16.totalorder %v4148_v30, 0 }
 0x112   : > { %v8342_v20 = vsel %vm5794_vm3, 4294967295, %v8341_v20  ;;  %4715 = vset.pattern.permute.xlu1 %v8289_v36  ;;  %v5799_v38 = vpop.permute.xlu1 %919  ;;  %v1350_v60 = vsel %vm5794_vm3, %v8344_v45, 0  ;;  %8347 = vst [vmem:[#allocation73_spill] sm:$0xff] %v8346_v7  ;;  %v8353_v42 = vsel %vm5843_vm4, 4294967295, %v8352_v42  ;;  %v5849_v45 = vpack.c.bf16 %v5839_v4, %v5833_v47  ;;  %vm1444_vm14 = vmpackc.low %vm1428_vm6, %vm1428_vm6 }
 0x113   : > { %8343 = vst [vmem:[#allocation72_spill] sm:$0xff] %v8342_v20  ;;  %1114 = vperm.xlu1 %4715, %v5256_v53   ;;  %1975 = vrot.lane.b32.xlu0 %v1350_v60, %s4898_s15  ;;  %v5822_v31 = vpop.permute.xlu0 %1240  ;;  %8354 = vst [vmem:[#allocation75_spill] sm:$0xff] %v8353_v42  ;;  %v1305_v60 = vsel %vm1289_vm9, 65537, %v8288_v51  ;;  %vm1563_vm1 = vcmp.eq.s32.totalorder %v5625_v5, 1  ;;  %v1306_v27 = vsel %vm1290_vm0, 65537, %v8288_v51  ;;  %v1207_v30 = vsel %vm5843_vm4, %v5820_v14, 0 }
 0x114   : > { %8355 = vst [vmem:[#allocation76_spill] sm:$0xff] %v5849_v45  ;;  %v4156_v18 = vcombine.low %v1305_v60, %v1306_v27  ;;  %vm1579_vm15 = vmpackc.low %vm1563_vm1, %vm1563_vm1  ;;  %v1459_v37 = vsel %vm1443_vm2, 65537, %v8288_v51  ;;  %v1460_v5 = vsel %vm1444_vm14, 65537, %v8288_v51  ;;  %v1215_v42 = vpack.c.bf16 %v5389_v25, %v5393_v26 }
 0x115   : > { %v8356_v7 = vmov 0  ;;  %v4165_v60 = vcombine.low %v1459_v37, %v1460_v5  ;;  %v1595_v27 = vsel %vm1579_vm15, 65537, %v8288_v51  ;;  %v709_v20 = vrot.slane %v5780_v28, 7 }
 0x116   : > { %v5824_v48 = vpop.permute.xlu1 %922  ;;  %vm5868_vm0 = vcmp.ne.s16.totalorder %v4156_v18, 0  ;;  %v1368_v18 = vpack.c.bf16 %v5587_v17, %v5468_v49  ;;  %v8359_v37 = vmov 0  ;;  %vm8363_vm1 = vcmp.lt.s32.totalorder %v5279_v50, 1 }
 0x117   : > { %4716 = vset.pattern.permute.xlu1 %v8294_v32  ;;  %1929 = vrot.lane.b32.xlu0 %v1030_v23, %s4896_s20  ;;  %v5860_v54 = vpop.permute.xlu0 %1246  ;;  %v8357_v7 = vsel %vm5868_vm0, 4294967295, %v8356_v7  ;;  %v1351_v26 = vsel %vm5868_vm0, %v1215_v42, 0  ;;  %vm5887_vm6 = vcmp.ne.s16.totalorder %v4165_v60, 0  ;;  %v5895_v14 = vsel %vm8363_vm1, %v8362_v44, %v709_v20  ;;  %vm8365_vm2 = vmmov %vm8363_vm1 }
 0x118   : > { %1682 = vperm.xlu1 %4716, %v5256_v53   ;;  %8358 = vst [vmem:[#allocation77_spill] sm:$0xff] %v8357_v7  ;;  %v8360_v37 = vsel %vm5887_vm6, 4294967295, %v8359_v37  ;;  %v8364_v45 = vrot.slane %v5788_v3, 7  ;;  %v1504_v60 = vsel %vm5887_vm6, %v1368_v18, 0  ;;  %v5911_v44 = vpack.c.bf16 %v5644_v35, %v5515_v61  ;;  %v8398_v7 = vld [vmem:[#allocation40_spill] sm:$0xff] }
 0x119   : > { %8361 = vst [vmem:[#allocation78_spill] sm:$0xff] %v8360_v37  ;;  %v5930_v18 = vpack.c.bf16 %v5557_v2, %v5450_v59  ;;  %v8406_v59 = vld [vmem:[#allocation6_spill] sm:$0xff] }
 0x11a   : > { %v5901_v42 = vsel %vm8365_vm2, %v709_v20, %v8364_v45  ;;  %8366 = vst [vmem:[#allocation79_spill] sm:$0xff] %v5911_v44  ;;  %v8367_v20 = vmov 0 }
 0x11b   : > { %v1532_v23 = vpop.permute.xlu1 %1531  ;;  %1953 = vrot.lane.b32.xlu0 %v1207_v30, %s8222_s29  ;;  %v5880_v25 = vpop.permute.xlu0 %1252 }
 0x11c   : > { %vm1564_vm9 = vcmp.eq.s32.totalorder %v1532_v23, 1  ;;  %1685 = vperm.xlu1 %4716, %v5085_v21  }
 0x11d   : > { %vm1580_vm11 = vmpackc.low %vm1564_vm9, %vm1564_vm9 }
 0x11e   : > { %v1596_v30 = vsel %vm1580_vm11, 65537, %v8288_v51 }
 0x11f   : > { %781 = vperm.xlu0 %4728, %v5243_v39   ;;  %v4173_v5 = vcombine.low %v1595_v27, %v1596_v30 }
 0x120   : > { %4717 = vset.pattern.permute.xlu1 %v8304_v34  ;;  %v5875_v23 = vpop.permute.xlu1 %1096 }
 0x121   : > { %1261 = vperm.xlu1 %4717, %v5085_v21   ;;  %vm5914_vm15 = vcmp.ne.s16.totalorder %v4173_v5, 0  ;;  %v4806_v5 = vld [vmem:[%s5082_s28 + $0x70] sm:$0xff] }
 0x122   : > { %v8368_v20 = vsel %vm5914_vm15, 4294967295, %v8367_v20  ;;  %v1640_v27 = vsel %vm5914_vm15, %v5911_v44, 0  ;;  %vm8120_vm15 = vcmask 523264   ;;  %v8401_v44 = vld [vmem:[#allocation70_spill] sm:$0xff] }
 0x123   : > { %1977 = vrot.lane.b32.xlu0 %v1351_v26, %s4898_s15  ;;  %8369 = vst [vmem:[#allocation80_spill] sm:$0xff] %v8368_v20  ;;  %v4807_v20 = vld [vmem:[%s5082_s28 + $0x78] sm:$0xff] }
 0x125   : > { %4718 = vset.pattern.permute.xlu1 %v8309_v46  ;;  %v1665_v17 = vpop.permute.xlu1 %1664  ;;  %v5918_v46 = vpop.permute.xlu0 %1258 }
 0x126   : > { %vm1699_vm14 = vcmp.eq.s32.totalorder %v1665_v17, 1  ;;  %1416 = vperm.xlu1 %4718, %v5264_v62   ;;  %8370 = vst [vmem:[#allocation81_spill] sm:$0xff] %v5918_v46  ;;  %v4750_v46 = vld [vmem:[%s8018_s4 + $0x70] sm:$0xff]  }
 0x127   : > { %2003 = vrot.lane.b32.xlu0 %v1504_v60, %s4896_s20  ;;  %vm1715_vm9 = vmpackc.low %vm1699_vm14, %vm1699_vm14  ;;  %vm1430_vm14 = vcmp.eq.s32.totalorder %v5521_v6, 1 }
 0x128   : > { %v1731_v30 = vsel %vm1715_vm9, 65537, %v8288_v51  ;;  %vm1446_vm9 = vmpackc.low %vm1430_vm14, %vm1430_vm14 }
 0x129   : > { %v1668_v45 = vpop.permute.xlu1 %1667  ;;  %v5934_v60 = vpop.permute.xlu0 %1267 }
 0x12a   : > { %vm1700_vm11 = vcmp.eq.s32.totalorder %v1668_v45, 1  ;;  %4720 = vset.pattern.permute.xlu1 %v8314_v63  ;;  %v629_v63 = vmul.f32 %v4806_v5, %v5530_v55  ;;  %8371 = vst [vmem:[#allocation82_spill] sm:$0xff] %v5934_v60  ;;  %v630_v5 = vmul.f32 %v4807_v20, %v5530_v55  ;;  %v1462_v55 = vsel %vm1446_vm9, 65537, %v8288_v51 }
 0x12b   : > { %vm1716_vm1 = vmpackc.low %vm1700_vm11, %vm1700_vm11  ;;  %943 = vperm.xlu1 %4720, %v5264_v62   ;;  %2027 = vrot.lane.b32.xlu0 %v1640_v27, %s8222_s29  ;;  %v8372_v27 = vmov 0  ;;  %vm8380_vm9 = vcmp.lt.s32.totalorder %v5279_v50, 7  ;;  %v8410_v60 = vmov 0 }
 0x12c   : > { %v1732_v26 = vsel %vm1716_vm1, 65537, %v8288_v51  ;;  %v679_v6 = vadd.f32 %v5545_v57, %v630_v5 }
 0x12d   : > { %v4181_v17 = vcombine.low %v1731_v30, %v1732_v26  ;;  %v678_v30 = vadd.f32 %v5545_v57, %v629_v63 }
 0x12e   : > { %v5936_v45 = vpop.permute.xlu1 %1243 }
 0x12f   : > { %946 = vperm.xlu1 %4720, %v5088_v22   ;;  %vm5939_vm2 = vcmp.ne.s16.totalorder %v4181_v17, 0  ;;  %v5952_v17 = vpop.permute.xlu0 %757 }
 0x130   : > { %v8373_v27 = vsel %vm5939_vm2, 4294967295, %v8372_v27  ;;  %v1776_v49 = vsel %vm5939_vm2, %v5930_v18, 0 }
 0x131   : > { %8374 = vst [vmem:[#allocation83_spill] sm:$0xff] %v8373_v27  ;;  %2051 = vrot.lane.b32.xlu0 %v1776_v49, %s4898_s15  ;;  %v5956_v27 = vmax.f32 %v678_v30, 0.0  ;;  %v8376_v30 = vmov 0 }
 0x133   : > { %4722 = vset.pattern.permute.xlu1 %v8282_v40  ;;  %v1399_v26 = vpop.permute.xlu1 %1398  ;;  %v1369_v40 = vpack.c.bf16 %v5702_v12, %v5593_v29  ;;  %v1050_v57 = vrot.slane %v5956_v27, 1  ;;  %v1998_v5 = vpop.permute.xlu0 %1997 }
 0x134   : > { %vm1429_vm11 = vcmp.eq.s32.totalorder %v1399_v26, 1  ;;  %1555 = vperm.xlu1 %4722, %v5088_v22   ;;  %v5966_v26 = vmax.f32 %v679_v6, 0.0 }
 0x135   : > { %vm1445_vm1 = vmpackc.low %vm1429_vm11, %vm1429_vm11  ;;  %790 = vperm.xlu0 %4728, %v5074_v19  }
 0x136   : > { %v1461_v49 = vsel %vm1445_vm1, 65537, %v8288_v51  ;;  %8375 = vst [vmem:[#allocation84_spill] sm:$0xff] %v5966_v26  ;;  %v8117_v12 = vrot.slane %v5966_v26, 1  ;;  %vm8381_vm11 = vmmov %vm8380_vm9  ;;  %vm1565_vm1 = vcmp.eq.s32.totalorder %v5632_v58, 1 }
 0x137   : > { %v4166_v20 = vcombine.low %v1461_v49, %v1462_v55  ;;  %vm1581_vm7 = vmpackc.low %vm1565_vm1, %vm1565_vm1 }
 0x138   : > { %4723 = vset.pattern.permute.xlu1 %v8289_v36  ;;  %v5964_v63 = vpop.permute.xlu1 %925  ;;  %v8379_v36 = vrot.slane %v5788_v3, 1  ;;  %v5990_v55 = vsel %vm8381_vm11, %v1050_v57, %v8117_v12  ;;  %vm8119_vm11 = vcmask 785408   ;;  %v1597_v58 = vsel %vm1581_vm7, 65537, %v8288_v51 }
 0x139   : > { %1120 = vperm.xlu1 %4723, %v5264_v62   ;;  %vm5970_vm14 = vcmp.ne.s16.totalorder %v4166_v20, 0 }
 0x13a   : > { %v8377_v30 = vsel %vm5970_vm14, 4294967295, %v8376_v30  ;;  %v1505_v37 = vsel %vm5970_vm14, %v1369_v40, 0  ;;  %v5984_v6 = vsel %vm8380_vm9, %v8379_v36, %v1050_v57  ;;  %v8383_v40 = vpack.c.bf16 %v5330_v41, %v5452_v1 }
 0x13b   : > { %8378 = vst [vmem:[#allocation85_spill] sm:$0xff] %v8377_v30  ;;  %2005 = vrot.lane.b32.xlu0 %v1505_v37, %s4896_s20  ;;  %v5995_v49 = vpack.c.bf16 %v5990_v55, %v5984_v6  ;;  %vm8384_vm9 = vcmask 261120   ;;  %v6010_v41 = vpack.c.bf16 %v5740_v11, %v5650_v15 }
 0x13c   : > { %v5978_v29 = vpop.permute.xlu1 %928  ;;  %v2129_v20 = vsel %vm8384_vm9, %v8383_v40, %v1998_v5  ;;  %v4738_v5 = vld [vmem:[%s8018_s4 + $0x40] sm:$0xff]   ;;  %vm1126_vm9 = vcmp.eq.s32.totalorder %v5678_v13, 1 }
 0x13d   : > { %4725 = vset.pattern.permute.xlu1 %v8294_v32  ;;  %8382 = vst [vmem:[#allocation86_spill] sm:$0xff] %v5995_v49  ;;  %8385 = vst [vmem:[#allocation87_spill] sm:$0xff] %v6010_v41  ;;  %4285 = vmatprep.subr.bf16.mxu0 %v4738_v5  ;;  %v8407_v49 = vmov 0 }
 0x13e   : > { %1688 = vperm.xlu1 %4725, %v5264_v62  }
 0x13f   : > { %v2022_v37 = vpop.permute.xlu0 %2021 }
 0x140   : > { %v2152_v32 = vsel %vm8120_vm15, %v2129_v20, %v2022_v37  ;;  %v4739_v37 = vld [vmem:[%s8018_s4] sm:$0xff]  }
 0x141   : > { %v1538_v57 = vpop.permute.xlu1 %1537  ;;  %4286 = vmatpush3.bf16.msra.mxu0 %v4739_v37 }
 0x142   : > { %vm1566_vm4 = vcmp.eq.s32.totalorder %v1538_v57, 1  ;;  %1691 = vperm.xlu1 %4725, %v5088_v22   ;;  %v8386_v57 = vmov 0 }
 0x143   : > { %vm1582_vm5 = vmpackc.low %vm1566_vm4, %vm1566_vm4  ;;  %v2046_v36 = vpop.permute.xlu0 %2045  ;;  %vm948_vm4 = vcmp.eq.s32.totalorder %v5455_v0, 1  ;;  %v8124_v0 = vrot.slane %v5966_v26, 7 }
 0x144   : > { %v1598_v12 = vsel %vm1582_vm5, 65537, %v8288_v51  ;;  %v2168_v30 = vsel %vm8119_vm11, %v2152_v32, %v2046_v36  ;;  %vm949_vm5 = vcmp.eq.s32.totalorder %v5461_v24, 1  ;;  %v4741_v32 = vld [vmem:[%s8018_s4 + $0x8] sm:$0xff]   ;;  %v711_v36 = vrot.slane %v5956_v27, 7  ;;  %vm964_vm15 = vmpackc.low %vm948_vm4, %vm948_vm4 }
 0x145   : > { %v4174_v40 = vcombine.low %v1597_v58, %v1598_v12  ;;  %2397 = vmatprep.mubr.bf16.mxu0 %v2168_v30  ;;  %v4740_v12 = vld [vmem:[%s8018_s4 + $0x48] sm:$0xff]   ;;  %vm965_vm1 = vmpackc.low %vm949_vm5, %vm949_vm5  ;;  %v4742_v58 = vld [vmem:[%s8018_s4 + $0x50] sm:$0xff]   ;;  %vm8394_vm4 = vcmp.lt.s32.totalorder %v5279_v50, 1 }
 0x146   : > { %4726 = vset.pattern.permute.xlu1 %v8288_v51  ;;  %v6019_v20 = vpop.permute.xlu1 %1102  ;;  %4287 = vmatprep.subr.bf16.mxu0 %v4740_v12  ;;  %v981_v13 = vsel %vm965_vm1, 65537, %v8288_v51  ;;  %vm6051_vm5 = vmpackc.low %vm1126_vm9, %vm1126_vm9 }
 0x147   : > { %760 = vperm.xlu1 %4726, %v5038_v8   ;;  %vm6022_vm7 = vcmp.ne.s16.totalorder %v4174_v40, 0  ;;  %4288 = vmatpush3.bf16.msra.mxu0 %v4741_v32  ;;  %vm8395_vm1 = vmmov %vm8394_vm4  ;;  %v980_v32 = vsel %vm964_vm15, 65537, %v8288_v51  ;;  %v6106_v40 = vpack.c.bf16 %v5452_v1, %v5966_v26 }
 0x148   : > { %v8387_v57 = vsel %vm6022_vm7, 4294967295, %v8386_v57  ;;  %v1641_v30 = vsel %vm6022_vm7, %v6010_v41, 0  ;;  %vm1125_vm7 = vcmp.eq.s32.totalorder %v5503_v16, 1  ;;  %4289 = vmatprep.subr.bf16.mxu0 %v4742_v58  ;;  %v8393_v16 = vrot.slane %v5788_v3, 7  ;;  %v4744_v58 = vld [vmem:[%s8018_s4 + $0x58] sm:$0xff]  }
 0x149   : > { %8388 = vst [vmem:[#allocation88_spill] sm:$0xff] %v8387_v57  ;;  %2029 = vrot.lane.b32.xlu0 %v1641_v30, %s8222_s29  ;;  %v6069_v12 = vsel %vm8395_vm1, %v711_v36, %v8124_v0  ;;  %v4138_v57 = vcombine.low %v980_v32, %v981_v13  ;;  %v8400_v32 = vld [vmem:[#allocation34_spill] sm:$0xff] }
 0x14a   : > { %v6063_v30 = vsel %vm8394_vm4, %v8393_v16, %v711_v36  ;;  %v4745_v36 = vld [vmem:[%s8018_s4 + $0x18] sm:$0xff]   ;;  %vm1432_vm15 = vcmp.eq.s32.totalorder %v8400_v32, 1 }
 0x14b   : > { %4727 = vset.pattern.permute.xlu1 %v8304_v34  ;;  %v1671_v24 = vpop.permute.xlu1 %1670  ;;  %v4743_v34 = vld [vmem:[%s8018_s4 + $0x10] sm:$0xff]   ;;  %v8399_v16 = vld [vmem:[#allocation56_spill] sm:$0xff] }
 0x14c   : > { %vm1701_vm11 = vcmp.eq.s32.totalorder %v1671_v24, 1  ;;  %1264 = vperm.xlu1 %4727, %v5264_v62   ;;  %4290 = vmatpush3.bf16.msra.mxu0 %v4743_v34  ;;  %v1158_v34 = vsel %vm6051_vm5, 65537, %v8288_v51  ;;  %v6095_v13 = vpack.c.bf16 %v8399_v16, %v8398_v7  ;;  %v8402_v7 = vrot.slane %v5452_v1, 1  ;;  %v4746_v24 = vld [vmem:[%s8018_s4 + $0x60] sm:$0xff]  }
 0x14d   : > { %vm6055_vm14 = vmpackc.low %vm1701_vm11, %vm1701_vm11  ;;  %4291 = vmatprep.subr.bf16.mxu0 %v4744_v58  ;;  %v8403_v58 = vrot.slane %v5966_v26, 1 }
 0x14e   : > { %vm6072_vm11 = vmpackc.low %vm1125_vm7, %vm1125_vm7  ;;  %vm1269_vm7 = vcmp.eq.s32.totalorder %v8401_v44, 1 }
 0x14f   : > { %v1674_v37 = vpop.permute.xlu1 %1673  ;;  %v1157_v5 = vsel %vm6072_vm11, 65537, %v8288_v51  ;;  %vm6125_vm11 = vcmp.ne.s16.totalorder %v4138_v57, 0  ;;  %v8416_v57 = vld [vmem:[#allocation38_spill] sm:$0xff]  ;;  %vm1285_vm2 = vmpackc.low %vm1269_vm7, %vm1269_vm7 }
 0x150   : > { %vm1702_vm9 = vcmp.eq.s32.totalorder %v1674_v37, 1  ;;  %4729 = vset.pattern.permute.xlu1 %v8288_v51  ;;  %v1733_v37 = vsel %vm6055_vm14, 65537, %v8288_v51  ;;  %4292 = vmatpush3.bf16.msra.mxu0 %v4745_v36  ;;  %vm8404_vm14 = vcmp.lt.s32.totalorder %v5279_v50, 7  ;;  %v8405_v36 = vld [vmem:[#allocation35_spill] sm:$0xff]  ;;  %v8411_v60 = vsel %vm6125_vm11, 4294967295, %v8410_v60 }
 0x151   : > { %vm1718_vm4 = vmpackc.low %vm1702_vm9, %vm1702_vm9  ;;  %763 = vperm.xlu1 %4729, %v5118_v33   ;;  %vm1270_vm5 = vcmp.eq.s32.totalorder %v8405_v36, 1  ;;  %8412 = vst [vmem:[#allocation70_spill] sm:$0xff] %v8411_v60  ;;  %4293 = vmatprep.subr.bf16.mxu0 %v4746_v24  ;;  %v1028_v32 = vsel %vm6125_vm11, %v6106_v40, 0  ;;  %v4748_v24 = vld [vmem:[%s8018_s4 + $0x68] sm:$0xff]   ;;  %v8427_v60 = vld [vmem:[#allocation48_spill] sm:$0xff] }
 0x152   : > { %v1734_v0 = vsel %vm1718_vm4, 65537, %v8288_v51  ;;  %vm6136_vm4 = vmpackc.low %vm1432_vm15, %vm1432_vm15 }
 0x153   : > { %v4182_v41 = vcombine.low %v1733_v37, %v1734_v0  ;;  %v6114_v0 = vsel %vm8404_vm14, %v8403_v58, %v8402_v7  ;;  %v4146_v37 = vcombine.low %v1157_v5, %v1158_v34  ;;  %v4747_v7 = vld [vmem:[%s8018_s4 + $0x20] sm:$0xff]   ;;  %v8413_v58 = vld [vmem:[#allocation31_spill] sm:$0xff]  ;;  %vm1423_vm14 = vcmp.eq.s32.totalorder %v8416_v57, 1  ;;  %vm1286_vm6 = vmpackc.low %vm1270_vm5, %vm1270_vm5 }
 0x154   : > { %v6102_v2 = vpop.permute.xlu1 %1249  ;;  %vm1424_vm9 = vcmp.eq.s32.totalorder %v8413_v58, 1  ;;  %4294 = vmatpush3.bf16.msra.mxu0 %v4747_v7  ;;  %v8417_v5 = vld [vmem:[#allocation29_spill] sm:$0xff]  ;;  %v8421_v7 = vmov 0  ;;  %vm6170_vm5 = vmpackc.low %vm1423_vm14, %vm1423_vm14  ;;  %vm1560_vm14 = vcmp.eq.s32.totalorder %v8427_v60, 1  ;;  %v8430_v60 = vrot.slane %v5966_v26, 7 }
 0x155   : > { %766 = vperm.xlu1 %4729, %v8406_v59   ;;  %vm6121_vm1 = vcmp.ne.s16.totalorder %v4182_v41, 0  ;;  %v6153_v36 = vpack.c.bf16 %v8417_v5, %v6114_v0  ;;  %vm6158_vm15 = vmpackc.low %vm1424_vm9, %vm1424_vm9  ;;  %vm6163_vm7 = vcmp.ne.s16.totalorder %v4146_v37, 0  ;;  %v1301_v5 = vsel %vm1285_vm2, 65537, %v8288_v51  ;;  %4295 = vmatprep.subr.bf16.mxu0 %v4748_v24  ;;  %v8436_v57 = vld [vmem:[#allocation41_spill] sm:$0xff] }
 0x156   : > { %v8408_v49 = vsel %vm6121_vm1, 4294967295, %v8407_v49  ;;  %v1777_v41 = vsel %vm6121_vm1, %v6095_v13, 0  ;;  %v8422_v7 = vsel %vm6163_vm7, 4294967295, %v8421_v7  ;;  %v1302_v37 = vsel %vm1286_vm6, 65537, %v8288_v51  ;;  %vm1576_vm2 = vmpackc.low %vm1560_vm14, %vm1560_vm14 }
 0x157   : > { %8409 = vst [vmem:[#allocation34_spill] sm:$0xff] %v8408_v49  ;;  %2053 = vrot.lane.b32.xlu0 %v1777_v41, %s4898_s15  ;;  %8418 = vst [vmem:[#allocation35_spill] sm:$0xff] %v6153_v36  ;;  %v4749_v41 = vld [vmem:[%s8018_s4 + $0x28] sm:$0xff]   ;;  %v8426_v49 = vld [vmem:[#allocation43_spill] sm:$0xff]  ;;  %v1205_v24 = vsel %vm6163_vm7, %v6153_v36, 0  ;;  %v4154_v16 = vcombine.low %v1301_v5, %v1302_v37  ;;  %v8432_v5 = vmov 0 }
 0x158   : > { %8423 = vst [vmem:[#allocation6_spill] sm:$0xff] %v8422_v7  ;;  %vm1559_vm1 = vcmp.eq.s32.totalorder %v8426_v49, 1  ;;  %4296 = vmatpush3.bf16.msra.mxu0 %v4749_v41  ;;  %v8429_v41 = vrot.slane %v5452_v1, 7  ;;  %v4752_v49 = vld [vmem:[%s8018_s4 + $0x78] sm:$0xff]   ;;  %v4754_v36 = vld [vmem:[%s8018_s4 + $0x80] sm:$0xff]  }
 0x159   : > { %v1405_v58 = vpop.permute.xlu1 %1404  ;;  %1925 = vrot.lane.b32.xlu1 %v1028_v32, %s4896_s20  ;;  %v1464_v32 = vsel %vm6136_vm4, 65537, %v8288_v51  ;;  %vm1575_vm6 = vmpackc.low %vm1559_vm1, %vm1559_vm1  ;;  %4297 = vmatprep.subr.bf16.mxu0 %v4750_v46  ;;  %v8437_v46 = vld [vmem:[#allocation10_spill] sm:$0xff]  ;;  %vm6228_vm1 = vcmp.ne.s16.totalorder %v4154_v16, 0 }
 0x15a   : > { %vm1431_vm9 = vcmp.eq.s32.totalorder %v1405_v58, 1  ;;  %v8428_v58 = vld [vmem:[#allocation58_spill] sm:$0xff]  ;;  %4509 = vmatprep.subr.bf16.mxu1 %v4754_v36 }
 0x15b   : > { %vm1447_vm12 = vmpackc.low %vm1431_vm9, %vm1431_vm9  ;;  %796 = vperm.xlu0 %4728, %v5085_v21   ;;  %v1370_v34 = vpack.c.bf16 %v5833_v47, %v8428_v58  ;;  %v4751_v47 = vld [vmem:[%s8018_s4 + $0x30] sm:$0xff]   ;;  %v1456_v58 = vsel %vm6158_vm15, 65537, %v8288_v51  ;;  %4510 = vmatpush3.bf16.msra.mxu1 %v4754_v36  ;;  %v8500_v36 = vmov 0 }
 0x15c   : > { %v1463_v56 = vsel %vm1447_vm12, 65537, %v8288_v51  ;;  %vm8431_vm12 = vcmp.lt.s32.totalorder %v5279_v50, 1  ;;  %4298 = vmatpush3.bf16.msra.mxu0 %v4751_v47  ;;  %v8441_v47 = vld [vmem:[#allocation50_spill] sm:$0xff] }
 0x15d   : > { %v4167_v11 = vcombine.low %v1463_v56, %v1464_v32  ;;  %1949 = vrot.lane.b32.xlu1 %v1205_v24, %s8222_s29  ;;  %v6198_v62 = vsel %vm8431_vm12, %v8430_v60, %v8429_v41  ;;  %v1455_v56 = vsel %vm6170_vm5, 65537, %v8288_v51  ;;  %v8435_v32 = vld [vmem:[#allocation52_spill] sm:$0xff]  ;;  %v1591_v41 = vsel %vm1575_vm6, 65537, %v8288_v51  ;;  %4299 = vmatprep.subr.bf16.mxu0 %v4752_v49  ;;  %v8447_v49 = vld [vmem:[#allocation55_spill] sm:$0xff] }
 0x15e   : > { %v6212_v1 = vpop.permute.xlu1 %931  ;;  %vm1696_vm9 = vcmp.eq.s32.totalorder %v8435_v32, 1  ;;  %v1213_v37 = vpack.c.bf16 %v8436_v57, %v6198_v62  ;;  %v4163_v24 = vcombine.low %v1455_v56, %v1456_v58  ;;  %v1592_v60 = vsel %vm1576_vm2, 65537, %v8288_v51  ;;  %v8442_v58 = vld [vmem:[#allocation51_spill] sm:$0xff]  ;;  %v8443_v56 = vld [vmem:[#allocation33_spill] sm:$0xff] }
 0x15f   : > { %vm6214_vm4 = vcmp.ne.s16.totalorder %v4167_v11, 0  ;;  %v8438_v11 = vmov 0  ;;  %vm1695_vm15 = vcmp.eq.s32.totalorder %v8441_v47, 1  ;;  %vm1712_vm5 = vmpackc.low %vm1696_vm9, %vm1696_vm9  ;;  %vm1567_vm14 = vcmp.eq.s32.totalorder %v8442_v58, 1 }
 0x160   : > { %v8433_v5 = vsel %vm6214_vm4, 4294967295, %v8432_v5  ;;  %v1506_v44 = vsel %vm6214_vm4, %v1370_v34, 0  ;;  %v8439_v11 = vsel %vm6228_vm1, 4294967295, %v8438_v11  ;;  %v4753_v34 = vld [vmem:[%s8018_s4 + $0x38] sm:$0xff]   ;;  %v1349_v16 = vsel %vm6228_vm1, %v1213_v37, 0  ;;  %vm1711_vm7 = vmpackc.low %vm1695_vm15, %vm1695_vm15 }
 0x161   : > { %8434 = vst [vmem:[#allocation31_spill] sm:$0xff] %v8433_v5  ;;  %769 = vperm.xlu1 %4729, %v8437_v46   ;;  %2007 = vrot.lane.b32.xlu0 %v1506_v44, %s4896_s20  ;;  %8440 = vst [vmem:[#allocation38_spill] sm:$0xff] %v8439_v11  ;;  %vm1426_vm12 = vcmp.eq.s32.totalorder %v8443_v56, 1  ;;  %v4171_v44 = vcombine.low %v1591_v41, %v1592_v60  ;;  %vm6245_vm6 = vcmp.ne.s16.totalorder %v4163_v24, 0  ;;  %v8444_v57 = vmov 0  ;;  %v8450_v41 = vld [vmem:[#allocation22_spill] sm:$0xff] }
 0x162   : > { %v6238_v32 = vpop.permute.xlu1 %934  ;;  %4300 = vmatpush3.bf16.msra.mxu0 %v4753_v34  ;;  %v8445_v57 = vsel %vm6245_vm6, 4294967295, %v8444_v57  ;;  %v1728_v47 = vsel %vm1712_vm5, 65537, %v8288_v51  ;;  %vm1583_vm2 = vmpackc.low %vm1567_vm14, %vm1567_vm14  ;;  %vm1425_vm9 = vcmp.eq.s32.totalorder %v8447_v49, 1  ;;  %v1727_v37 = vsel %vm1711_vm7, 65537, %v8288_v51 }
 0x163   : > { %8446 = vst [vmem:[#allocation29_spill] sm:$0xff] %v8445_v57  ;;  %vm6251_vm4 = vmpackc.low %vm1426_vm12, %vm1426_vm12  ;;  %v8451_v60 = vpack.c.bf16 %v5380_v52, %v8450_v41  ;;  %vm6262_vm5 = vcmp.ne.s16.totalorder %v4171_v44, 0  ;;  %v8452_v56 = vmov 0  ;;  %v1599_v49 = vsel %vm1583_vm2, 65537, %v8288_v51  ;;  %v8457_v52 = vld [vmem:[#allocation46_spill] sm:$0xff]  ;;  %v8459_v44 = vld [vmem:[#allocation24_spill] sm:$0xff] }
 0x164   : > { %v8453_v56 = vsel %vm6262_vm5, 4294967295, %v8452_v56  ;;  %vm1441_vm14 = vmpackc.low %vm1425_vm9, %vm1425_vm9  ;;  %vm1561_vm7 = vcmp.eq.s32.totalorder %v8457_v52, 1  ;;  %v8460_v11 = vmov 0  ;;  %v8466_v52 = vld [vmem:[#allocation69_spill] sm:$0xff] }
 0x165   : > { %1973 = vrot.lane.b32.xlu1 %v1349_v16, %s4898_s15  ;;  %v1502_v24 = vsel %vm6245_vm6, %v8451_v60, 0  ;;  %v4179_v16 = vcombine.low %v1727_v37, %v1728_v47  ;;  %8454 = vst [vmem:[#allocation43_spill] sm:$0xff] %v8453_v56  ;;  %v8458_v47 = vld [vmem:[#allocation61_spill] sm:$0xff]  ;;  %v1638_v60 = vsel %vm6262_vm5, %v8459_v44, 0  ;;  %v1457_v57 = vsel %vm1441_vm14, 65537, %v8288_v51  ;;  %vm1577_vm9 = vmpackc.low %vm1561_vm7, %vm1561_vm7 }
 0x167   : > { %v1544_v34 = vpop.permute.xlu1 %1543  ;;  %vm6288_vm2 = vcmp.ne.s16.totalorder %v4179_v16, 0 }
 0x168   : > { %vm1568_vm8 = vcmp.eq.s32.totalorder %v1544_v34, 1  ;;  %v8455_v34 = vld [vmem:[#allocation66_spill] sm:$0xff] }
 0x169   : > { %vm1584_vm15 = vmpackc.low %vm1568_vm8, %vm1568_vm8  ;;  %1999 = vrot.lane.b32.xlu1 %v1502_v24, %s4896_s20  ;;  %v6270_v5 = vpack.c.bf16 %v5895_v14, %v8455_v34  ;;  %vm1562_vm8 = vcmp.eq.s32.totalorder %v8458_v47, 1  ;;  %v1458_v24 = vsel %vm6251_vm4, 65537, %v8288_v51  ;;  %vm1698_vm4 = vcmp.eq.s32.totalorder %v8466_v52, 1  ;;  %v8467_v47 = vld [vmem:[#allocation67_spill] sm:$0xff] }
 0x16a   : > { %v1600_v7 = vsel %vm1584_vm15, 65537, %v8288_v51  ;;  %vm1578_vm15 = vmpackc.low %vm1562_vm8, %vm1562_vm8  ;;  %v4164_v58 = vcombine.low %v1457_v57, %v1458_v24  ;;  %vm1697_vm14 = vcmp.eq.s32.totalorder %v8467_v47, 1  ;;  %v8468_v57 = vmov 0 }
 0x16b   : > { %8456 = vst [vmem:[#allocation48_spill] sm:$0xff] %v6270_v5  ;;  %v4175_v41 = vcombine.low %v1599_v49, %v1600_v7  ;;  %v8463_v7 = vmov 0  ;;  %vm1714_vm8 = vmpackc.low %vm1698_vm4, %vm1698_vm4  ;;  %vm954_vm4 = vcmp.eq.s32.totalorder %v5799_v38, 1 }
 0x16c   : > { %v6274_v37 = vpop.permute.xlu1 %1108  ;;  %v8464_v7 = vsel %vm6288_vm2, 4294967295, %v8463_v7  ;;  %vm6304_vm5 = vcmp.ne.s16.totalorder %v4164_v58, 0  ;;  %v1730_v52 = vsel %vm1714_vm8, 65537, %v8288_v51 }
 0x16d   : > { %2023 = vrot.lane.b32.xlu1 %v1638_v60, %s8222_s29  ;;  %vm6284_vm12 = vcmp.ne.s16.totalorder %v4175_v41, 0  ;;  %8465 = vst [vmem:[#allocation52_spill] sm:$0xff] %v8464_v7  ;;  %v1774_v41 = vsel %vm6288_vm2, %v5816_v10, 0  ;;  %v1593_v60 = vsel %vm1577_vm9, 65537, %v8288_v51  ;;  %v8469_v57 = vsel %vm6304_vm5, 4294967295, %v8468_v57  ;;  %v8471_v10 = vld [vmem:[#allocation8_spill] sm:$0xff] }
 0x16e   : > { %v8461_v11 = vsel %vm6284_vm12, 4294967295, %v8460_v11  ;;  %v1642_v49 = vsel %vm6284_vm12, %v6270_v5, 0  ;;  %vm1713_vm12 = vmpackc.low %vm1697_vm14, %vm1697_vm14  ;;  %8470 = vst [vmem:[#allocation41_spill] sm:$0xff] %v8469_v57 }
 0x16f   : > { %8462 = vst [vmem:[#allocation58_spill] sm:$0xff] %v8461_v11  ;;  %2031 = vrot.lane.b32.xlu0 %v1642_v49, %s8222_s29  ;;  %v1594_v11 = vsel %vm1578_vm15, 65537, %v8288_v51  ;;  %v1729_v58 = vsel %vm1713_vm12, 65537, %v8288_v51 }
 0x170   : > { %v4172_v24 = vcombine.low %v1593_v60, %v1594_v11  ;;  %v6320_v60 = vpack.c.bf16 %v5780_v28, %v5686_v9  ;;  %v4180_v7 = vcombine.low %v1729_v58, %v1730_v52  ;;  %v8481_v52 = vld [vmem:[#allocation20_spill] sm:$0xff] }
 0x171   : > { %v1677_v16 = vpop.permute.xlu1 %1676  ;;  %2047 = vrot.lane.b32.xlu1 %v1774_v41, %s4898_s15  ;;  %v8472_v41 = vld [vmem:[#allocation25_spill] sm:$0xff] }
 0x172   : > { %vm1703_vm7 = vcmp.eq.s32.totalorder %v1677_v16, 1  ;;  %v8473_v47 = vpack.c.bf16 %v8472_v41, %v5385_v43  ;;  %v8477_v41 = vmov 0 }
 0x173   : > { %vm1719_vm6 = vmpackc.low %vm1703_vm7, %vm1703_vm7 }
 0x174   : > { %v1503_v16 = vsel %vm6304_vm5, %v8473_v47, 0  ;;  %v1735_v56 = vsel %vm1719_vm6, 65537, %v8288_v51  ;;  %v8480_v47 = vld [vmem:[#allocation27_spill] sm:$0xff]  ;;  %vm955_vm6 = vcmp.eq.s32.totalorder %v5824_v48, 1 }
 0x175   : > { %v1680_v49 = vpop.permute.xlu1 %1679  ;;  %778 = vperm.xlu1 %4729, %v8471_v10   ;;  %vm971_vm14 = vmpackc.low %vm955_vm6, %vm955_vm6 }
 0x176   : > { %vm1704_vm2 = vcmp.eq.s32.totalorder %v1680_v49, 1  ;;  %v8474_v49 = vmov 0 }
 0x177   : > { %vm1720_vm0 = vmpackc.low %vm1704_vm2, %vm1704_vm2  ;;  %vm6323_vm2 = vcmp.ne.s16.totalorder %v4172_v24, 0 }
 0x178   : > { %v1736_v11 = vsel %vm1720_vm0, 65537, %v8288_v51  ;;  %v8475_v49 = vsel %vm6323_vm2, 4294967295, %v8474_v49  ;;  %v1639_v57 = vsel %vm6323_vm2, %v8480_v47, 0  ;;  %vm6345_vm0 = vcmp.ne.s16.totalorder %v4180_v7, 0 }
 0x179   : > { %v4183_v50 = vcombine.low %v1735_v56, %v1736_v11  ;;  %2001 = vrot.lane.b32.xlu1 %v1503_v16, %s4896_s20  ;;  %8476 = vst [vmem:[#allocation10_spill] sm:$0xff] %v8475_v49  ;;  %v8482_v16 = vld [vmem:[#allocation21_spill] sm:$0xff]  ;;  %v8168_v7 = vmov 8  }
 0x17a   : > { %v6327_v43 = vpop.permute.xlu1 %1255  ;;  %v6341_v24 = vpack.c.bf16 %v8482_v16, %v8481_v52 }
 0x17b   : > { %vm6329_vm9 = vcmp.ne.s16.totalorder %v4183_v50, 0  ;;  %v8483_v50 = vmov 0 }
 0x17c   : > { %v8478_v41 = vsel %vm6329_vm9, 4294967295, %v8477_v41  ;;  %v1778_v56 = vsel %vm6329_vm9, %v6320_v60, 0  ;;  %v8484_v50 = vsel %vm6345_vm0, 4294967295, %v8483_v50  ;;  %v1775_v11 = vsel %vm6345_vm0, %v6341_v24, 0  ;;  %vm970_vm0 = vmpackc.low %vm954_vm4, %vm954_vm4 }
 0x17d   : > { %8479 = vst [vmem:[#allocation50_spill] sm:$0xff] %v8478_v41  ;;  %2025 = vrot.lane.b32.xlu1 %v1639_v57, %s8222_s29  ;;  %2055 = vrot.lane.b32.xlu0 %v1778_v56, %s4898_s15  ;;  %8485 = vst [vmem:[#allocation51_spill] sm:$0xff] %v8484_v50  ;;  %v8486_v57 = vld [vmem:[#allocation9_spill] sm:$0xff]  ;;  %v8487_v56 = vld [vmem:[#allocation36_spill] sm:$0xff]  ;;  %v6360_v41 = vpop.permute.xlu0 %772  ;;  %vm1131_vm9 = vcmp.eq.s32.totalorder %v5875_v23, 1  ;;  %v986_v23 = vsel %vm970_vm0, 65537, %v8288_v51 }
 0x17e   : > { %vm1434_vm15 = vcmp.eq.s32.totalorder %v8487_v56, 1  ;;  %v8490_v56 = vld [vmem:[#allocation7_spill] sm:$0xff]  ;;  %v8491_v50 = vld [vmem:[#allocation53_spill] sm:$0xff]  ;;  %vm1147_vm6 = vmpackc.low %vm1131_vm9, %vm1131_vm9 }
 0x17f   : > { %v1411_v58 = vpop.permute.xlu1 %1410  ;;  %vm1450_vm2 = vmpackc.low %vm1434_vm15, %vm1434_vm15  ;;  %vm1569_vm5 = vcmp.eq.s32.totalorder %v8491_v50, 1 }
 0x180   : > { %vm1433_vm12 = vcmp.eq.s32.totalorder %v1411_v58, 1  ;;  %v8489_v58 = vld [vmem:[#allocation5_spill] sm:$0xff]  ;;  %v1466_v5 = vsel %vm1450_vm2, 65537, %v8288_v51  ;;  %vm1275_vm2 = vcmp.eq.s32.totalorder %v5822_v31, 1  ;;  %v8492_v31 = vmov 0 }
 0x181   : > { %2049 = vrot.lane.b32.xlu1 %v1775_v11, %s4898_s15  ;;  %802 = vperm.xlu0 %4728, %v5088_v22   ;;  %v8488_v11 = vld [vmem:[#allocation60_spill] sm:$0xff]  ;;  %vm1449_vm8 = vmpackc.low %vm1433_vm12, %vm1433_vm12 }
 0x182   : > { %vm1132_vm7 = vcmp.eq.s32.totalorder %v8488_v11, 1  ;;  %v1465_v38 = vsel %vm1449_vm8, 65537, %v8288_v51  ;;  %v6374_v11 = vpop.permute.xlu0 %1927  ;;  %vm1585_vm12 = vmpackc.low %vm1569_vm5, %vm1569_vm5  ;;  %vm1276_vm5 = vcmp.eq.s32.totalorder %v5936_v45, 1 }
 0x183   : > { %vm1148_vm10 = vmpackc.low %vm1132_vm7, %vm1132_vm7 }
 0x184   : > { %v6355_v49 = vpop.permute.xlu1 %937  ;;  %v1164_v50 = vsel %vm1148_vm10, 65537, %v8288_v51  ;;  %vm1291_vm4 = vmpackc.low %vm1275_vm2, %vm1275_vm2 }
 0x185   : > { %784 = vperm.xlu1 %4729, %v8486_v57   ;;  %4736 = vset.pattern.permute.xlu0 %v8168_v7 }
 0x186   : > { %1785 = vperm.xlu0 %4736, %v5038_v8   ;;  %v987_v8 = vsel %vm971_vm14, 65537, %v8288_v51  ;;  %v6386_v28 = vpop.permute.xlu0 %1951  ;;  %vm1292_vm14 = vmpackc.low %vm1276_vm5, %vm1276_vm5  ;;  %vm957_vm5 = vcmp.eq.s32.totalorder %v5978_v29, 1 }
 0x187   : > { %v4141_v26 = vcombine.low %v986_v23, %v987_v8  ;;  %v8494_v23 = vmov 0 }
 0x188   : > { %v6365_v48 = vpop.permute.xlu1 %940 }
 0x189   : > { %4730 = vset.pattern.permute.xlu1 %v8168_v7  ;;  %vm6397_vm10 = vcmp.ne.s16.totalorder %v4141_v26, 0  ;;  %v6417_v26 = vpack.c.bf16 %v6063_v30, %v5901_v42 }
 0x18a   : > { %1782 = vperm.xlu1 %4730, %v8489_v58   ;;  %1797 = vperm.xlu0 %4736, %v8490_v56   ;;  %v4168_v58 = vcombine.low %v1465_v38, %v1466_v5  ;;  %v1163_v56 = vsel %vm1147_vm6, 65537, %v8288_v51  ;;  %v8493_v31 = vsel %vm6397_vm10, 4294967295, %v8492_v31  ;;  %v6408_v45 = vpop.permute.xlu0 %775 }
 0x18c   : > { %vm6401_vm0 = vcmp.ne.s16.totalorder %v4168_v58, 0  ;;  %v1308_v58 = vsel %vm1292_vm14, 65537, %v8288_v51 }
 0x18d   : > { %v1550_v7 = vpop.permute.xlu1 %1549  ;;  %v8495_v23 = vsel %vm6401_vm0, 4294967295, %v8494_v23 }
 0x18e   : > { %vm1570_vm15 = vcmp.eq.s32.totalorder %v1550_v7, 1  ;;  %1788 = vperm.xlu1 %4730, %v5118_v33   ;;  %1809 = vperm.xlu0 %4736, %v8486_v57   ;;  %v1601_v7 = vsel %vm1585_vm12, 65537, %v8288_v51  ;;  %v1371_v33 = vpack.c.bf16 %v5984_v6, %v5839_v4  ;;  %v4149_v57 = vcombine.low %v1163_v56, %v1164_v50  ;;  %8496 = vst [vmem:[#allocation33_spill] sm:$0xff] %v8495_v23  ;;  %v4755_v4 = vld [vmem:[%s8018_s4 + $0x88] sm:$0xff]   ;;  %v8513_v23 = vld [vmem:[#allocation37_spill] sm:$0xff] }
 0x18f   : > { %vm1586_vm9 = vmpackc.low %vm1570_vm15, %vm1570_vm15  ;;  %4511 = vmatprep.subr.bf16.mxu1 %v4755_v4  ;;  %v8497_v6 = vmov 0  ;;  %v8503_v56 = vld [vmem:[#allocation30_spill] sm:$0xff]  ;;  %vm1436_vm14 = vcmp.eq.s32.totalorder %v8513_v23, 1 }
 0x190   : > { %v1602_v5 = vsel %vm1586_vm9, 65537, %v8288_v51  ;;  %vm6421_vm7 = vcmp.ne.s16.totalorder %v4149_v57, 0  ;;  %4512 = vmatpush3.bf16.msra.mxu1 %v4755_v4  ;;  %v6438_v57 = vpop.permute.xlu0 %1975  ;;  %v8515_v23 = vld [vmem:[#allocation62_spill] sm:$0xff] }
 0x191   : > { %v4176_v8 = vcombine.low %v1601_v7, %v1602_v5  ;;  %v8498_v6 = vsel %vm6421_vm7, 4294967295, %v8497_v6  ;;  %v1208_v5 = vsel %vm6421_vm7, %v8503_v56, 0 }
 0x192   : > { %v6393_v38 = vpop.permute.xlu1 %1114  ;;  %1791 = vperm.xlu1 %4730, %v8406_v59   ;;  %1821 = vperm.xlu0 %4736, %v5085_v21   ;;  %v1031_v21 = vsel %vm6397_vm10, %v6341_v24, 0  ;;  %v1507_v59 = vsel %vm6401_vm0, %v1371_v33, 0  ;;  %8499 = vst [vmem:[#allocation55_spill] sm:$0xff] %v8498_v6  ;;  %v1307_v24 = vsel %vm1291_vm4, 65537, %v8288_v51  ;;  %v8510_v6 = vmov 0 }
 0x193   : > { %vm6425_vm8 = vcmp.ne.s16.totalorder %v4176_v8, 0  ;;  %v4157_v33 = vcombine.low %v1307_v24, %v1308_v58  ;;  %v6451_v24 = vpack.c.bf16 %v5956_v27, %v5788_v3  ;;  %vm1134_vm0 = vcmp.eq.s32.totalorder %v8515_v23, 1  ;;  %v8516_v23 = vld [vmem:[#allocation11_spill] sm:$0xff] }
 0x194   : > { %v8501_v36 = vsel %vm6425_vm8, 4294967295, %v8500_v36  ;;  %v1643_v7 = vsel %vm6425_vm8, %v6417_v26, 0  ;;  %vm809_vm10 = vcmp.eq.s32.totalorder %v6360_v41, 1 }
 0x195   : > { %8502 = vst [vmem:[#allocation22_spill] sm:$0xff] %v8501_v36  ;;  %vm6445_vm2 = vcmp.ne.s16.totalorder %v4157_v33, 0 }
 0x196   : > { %1931 = vrot.lane.b32.xlu1 %v1031_v21, %s4896_s20  ;;  %2009 = vrot.lane.b32.xlu0 %v1507_v59, %s4896_s20  ;;  %v8504_v59 = vld [vmem:[#allocation12_spill] sm:$0xff] }
 0x197   : > { %v1683_v50 = vpop.permute.xlu1 %1682  ;;  %4731 = vset.pattern.permute.xlu1 %v8288_v51 }
 0x198   : > { %vm1705_vm6 = vcmp.eq.s32.totalorder %v1683_v50, 1  ;;  %v8505_v50 = vmov 0 }
 0x199   : > { %vm1721_vm12 = vmpackc.low %vm1705_vm6, %vm1705_vm6  ;;  %v8506_v50 = vsel %vm6445_vm2, 4294967295, %v8505_v50  ;;  %vm956_vm6 = vcmp.eq.s32.totalorder %v5964_v63, 1 }
 0x19a   : > { %1955 = vrot.lane.b32.xlu1 %v1208_v5, %s8222_s29  ;;  %2033 = vrot.lane.b32.xlu0 %v1643_v7, %s8222_s29  ;;  %v1737_v4 = vsel %vm1721_vm12, 65537, %v8288_v51  ;;  %8507 = vst [vmem:[#allocation66_spill] sm:$0xff] %v8506_v50  ;;  %v6453_v5 = vpop.permute.xlu0 %1929  ;;  %vm973_vm12 = vmpackc.low %vm957_vm5, %vm957_vm5  ;;  %v8517_v50 = vmov 0 }
 0x19b   : > { %v1686_v8 = vpop.permute.xlu1 %1685  ;;  %vm972_vm8 = vmpackc.low %vm956_vm6, %vm956_vm6 }
 0x19c   : > { %vm1706_vm15 = vcmp.eq.s32.totalorder %v1686_v8, 1  ;;  %v8508_v8 = vld [vmem:[#allocation26_spill] sm:$0xff]  ;;  %vm1150_vm5 = vmpackc.low %vm1134_vm0, %vm1134_vm0  ;;  %vm1278_vm0 = vcmp.eq.s32.totalorder %v6102_v2, 1 }
 0x19d   : > { %vm1722_vm9 = vmpackc.low %vm1706_vm15, %vm1706_vm15  ;;  %v8509_v36 = vpack.c.bf16 %v5515_v61, %v8508_v8  ;;  %v8514_v61 = vmov 8   ;;  %v988_v8 = vsel %vm972_vm8, 65537, %v8288_v51 }
 0x19e   : > { %v1738_v21 = vsel %vm1722_vm9, 65537, %v8288_v51  ;;  %787 = vperm.xlu1 %4731, %v8504_v59   ;;  %vm1452_vm15 = vmpackc.low %vm1436_vm14, %vm1436_vm14  ;;  %vm1133_vm9 = vcmp.eq.s32.totalorder %v6019_v20, 1  ;;  %v1372_v20 = vpack.c.bf16 %v6114_v0, %v5990_v55  ;;  %v1166_v0 = vsel %vm1150_vm5, 65537, %v8288_v51 }
 0x19f   : > { %v4184_v58 = vcombine.low %v1737_v4, %v1738_v21  ;;  %v1352_v33 = vsel %vm6445_vm2, %v8509_v36, 0  ;;  %v6476_v36 = vpop.permute.xlu0 %1953  ;;  %v989_v21 = vsel %vm973_vm12, 65537, %v8288_v51  ;;  %v1468_v63 = vsel %vm1452_vm15, 65537, %v8288_v51  ;;  %vm1149_vm2 = vmpackc.low %vm1133_vm9, %vm1133_vm9 }
 0x1a0   : > { %v6455_v7 = vpop.permute.xlu1 %1261  ;;  %vm1294_vm6 = vmpackc.low %vm1278_vm0, %vm1278_vm0 }
 0x1a1   : > { %vm6463_vm4 = vcmp.ne.s16.totalorder %v4184_v58, 0 }
 0x1a2   : > { %v8511_v6 = vsel %vm6463_vm4, 4294967295, %v8510_v6  ;;  %1979 = vrot.lane.b32.xlu1 %v1352_v33, %s4898_s15  ;;  %v1779_v4 = vsel %vm6463_vm4, %v6451_v24, 0 }
 0x1a3   : > { %8512 = vst [vmem:[#allocation46_spill] sm:$0xff] %v8511_v6  ;;  %2057 = vrot.lane.b32.xlu0 %v1779_v4, %s4898_s15  ;;  %4732 = vset.pattern.permute.xlu1 %v8514_v61  ;;  %v4142_v4 = vcombine.low %v988_v8, %v989_v21  ;;  %v1165_v6 = vsel %vm1149_vm2, 65537, %v8288_v51  ;;  %v1310_v8 = vsel %vm1294_vm6, 65537, %v8288_v51  ;;  %vm958_vm6 = vcmp.eq.s32.totalorder %v6212_v1, 1 }
 0x1a4   : > { %v4150_v21 = vcombine.low %v1165_v6, %v1166_v0  ;;  %v8523_v6 = vmov 0 }
 0x1a5   : > { %v1417_v29 = vpop.permute.xlu1 %1416  ;;  %vm6505_vm8 = vcmp.ne.s16.totalorder %v4142_v4, 0  ;;  %v8526_v4 = vld [vmem:[#allocation45_spill] sm:$0xff] }
 0x1a6   : > { %vm1435_vm7 = vcmp.eq.s32.totalorder %v1417_v29, 1  ;;  %1794 = vperm.xlu1 %4732, %v8437_v46   ;;  %v6486_v29 = vpop.permute.xlu0 %781  ;;  %v1032_v2 = vsel %vm6505_vm8, %v5930_v18, 0  ;;  %vm6516_vm12 = vcmp.ne.s16.totalorder %v4150_v21, 0 }
 0x1a7   : > { %vm1451_vm4 = vmpackc.low %vm1435_vm7, %vm1435_vm7  ;;  %v8524_v6 = vsel %vm6516_vm12, 4294967295, %v8523_v6  ;;  %v1209_v18 = vsel %vm6516_vm12, %v8526_v4, 0 }
 0x1a8   : > { %v1467_v58 = vsel %vm1451_vm4, 65537, %v8288_v51  ;;  %vm1277_vm4 = vcmp.eq.s32.totalorder %v5860_v54, 1  ;;  %v8522_v54 = vld [vmem:[#allocation54_spill] sm:$0xff]  ;;  %8525 = vst [vmem:[#allocation24_spill] sm:$0xff] %v8524_v6 }
 0x1a9   : > { %v4169_v33 = vcombine.low %v1467_v58, %v1468_v63  ;;  %v8520_v58 = vmov 0  ;;  %vm1293_vm2 = vmpackc.low %vm1277_vm4, %vm1277_vm4  ;;  %vm1571_vm14 = vcmp.eq.s32.totalorder %v8522_v54, 1  ;;  %v6533_v54 = vpack.c.bf16 %v6198_v62, %v6069_v12 }
 0x1aa   : > { %v6488_v46 = vpop.permute.xlu1 %943  ;;  %1800 = vperm.xlu1 %4732, %v8516_v23   ;;  %v8521_v58 = vsel %vm6505_vm8, 4294967295, %v8520_v58  ;;  %vm1587_vm15 = vmpackc.low %vm1571_vm14, %vm1571_vm14 }
 0x1ab   : > { %vm6492_vm7 = vcmp.ne.s16.totalorder %v4169_v33, 0  ;;  %v1603_v23 = vsel %vm1587_vm15, 65537, %v8288_v51 }
 0x1ac   : > { %v8518_v50 = vsel %vm6492_vm7, 4294967295, %v8517_v50  ;;  %v1508_v55 = vsel %vm6492_vm7, %v1372_v20, 0  ;;  %v6510_v20 = vpop.permute.xlu0 %1977 }
 0x1ad   : > { %8519 = vst [vmem:[#allocation61_spill] sm:$0xff] %v8518_v50  ;;  %2011 = vrot.lane.b32.xlu0 %v1508_v55, %s4896_s20  ;;  %v8527_v50 = vmov 0 }
 0x1ae   : > { %v6502_v63 = vpop.permute.xlu1 %946  ;;  %1803 = vperm.xlu1 %4732, %v8471_v10   ;;  %v1309_v10 = vsel %vm1293_vm2, 65537, %v8288_v51  ;;  %vm959_vm2 = vcmp.eq.s32.totalorder %v6238_v32, 1 }
 0x1af   : > { %v4158_v55 = vcombine.low %v1309_v10, %v1310_v8  ;;  %v8530_v8 = vmov 0  ;;  %vm975_vm15 = vmpackc.low %vm959_vm2, %vm959_vm2 }
 0x1b0   : > { %v6527_v0 = vpop.permute.xlu0 %2003 }
 0x1b1   : > { %vm6545_vm0 = vcmp.ne.s16.totalorder %v4158_v55, 0 }
 0x1b2   : > { %1933 = vrot.lane.b32.xlu1 %v1032_v2, %s4896_s20  ;;  %v8531_v8 = vsel %vm6545_vm0, 4294967295, %v8530_v8 }
 0x1b3   : > { %v1556_v33 = vpop.permute.xlu1 %1555  ;;  %4733 = vset.pattern.permute.xlu1 %v8288_v51 }
 0x1b4   : > { %vm1572_vm9 = vcmp.eq.s32.totalorder %v1556_v33, 1  ;;  %v6550_v62 = vpop.permute.xlu0 %2027 }
 0x1b5   : > { %vm1588_vm5 = vmpackc.low %vm1572_vm9, %vm1572_vm9  ;;  %vm1135_vm9 = vcmp.eq.s32.totalorder %v6274_v37, 1 }
 0x1b6   : > { %v1604_v21 = vsel %vm1588_vm5, 65537, %v8288_v51  ;;  %1957 = vrot.lane.b32.xlu1 %v1209_v18, %s8222_s29  ;;  %vm1151_vm8 = vmpackc.low %vm1135_vm9, %vm1135_vm9 }
 0x1b7   : > { %v4177_v2 = vcombine.low %v1603_v23, %v1604_v21  ;;  %v8532_v23 = vpack.c.bf16 %v5650_v15, %v5644_v35  ;;  %v8533_v15 = vld [vmem:[#allocation63_spill] sm:$0xff]  ;;  %v991_v35 = vsel %vm975_vm15, 65537, %v8288_v51  ;;  %vm804_vm15 = vcmp.eq.s32.totalorder %v5952_v17, 1 }
 0x1b8   : > { %v6535_v33 = vpop.permute.xlu1 %1120  ;;  %v6562_v32 = vpop.permute.xlu0 %2051  ;;  %vm1136_vm7 = vcmp.eq.s32.totalorder %v8533_v15, 1 }
 0x1b9   : > { %vm6537_vm4 = vcmp.ne.s16.totalorder %v4177_v2, 0  ;;  %v1353_v21 = vsel %vm6545_vm0, %v8532_v23, 0  ;;  %vm1152_vm2 = vmpackc.low %vm1136_vm7, %vm1136_vm7  ;;  %vm1280_vm7 = vcmp.eq.s32.totalorder %v6327_v43, 1 }
 0x1ba   : > { %v8528_v50 = vsel %vm6537_vm4, 4294967295, %v8527_v50  ;;  %793 = vperm.xlu1 %4733, %v5256_v53   ;;  %v1644_v10 = vsel %vm6537_vm4, %v6533_v54, 0  ;;  %vm974_vm4 = vmpackc.low %vm958_vm6, %vm958_vm6 }
 0x1bb   : > { %8529 = vst [vmem:[#allocation69_spill] sm:$0xff] %v8528_v50  ;;  %2035 = vrot.lane.b32.xlu0 %v1644_v10, %s8222_s29  ;;  %v990_v37 = vsel %vm974_vm4, 65537, %v8288_v51  ;;  %v1168_v50 = vsel %vm1152_vm2, 65537, %v8288_v51  ;;  %vm1296_vm4 = vmpackc.low %vm1280_vm7, %vm1280_vm7 }
 0x1bc   : > { %v6570_v23 = vpop.permute.xlu0 %790  ;;  %v1312_v43 = vsel %vm1296_vm4, 65537, %v8288_v51 }
 0x1bd   : > { %v1689_v18 = vpop.permute.xlu1 %1688 }
 0x1be   : > { %vm1707_vm14 = vcmp.eq.s32.totalorder %v1689_v18, 1  ;;  %1981 = vrot.lane.b32.xlu1 %v1353_v21, %s4898_s15  ;;  %v4143_v18 = vcombine.low %v990_v37, %v991_v35  ;;  %v8542_v37 = vld [vmem:[#allocation59_spill] sm:$0xff] }
 0x1bf   : > { %4734 = vset.pattern.permute.xlu1 %v8514_v61  ;;  %vm1723_vm5 = vmpackc.low %vm1707_vm14, %vm1707_vm14 }
 0x1c0   : > { %v1739_v1 = vsel %vm1723_vm5, 65537, %v8288_v51  ;;  %vm820_vm5 = vmpackc.low %vm804_vm15, %vm804_vm15 }
 0x1c1   : > { %v1692_v55 = vpop.permute.xlu1 %1691  ;;  %v836_v17 = vsel %vm820_vm5, 65537, %v8288_v51 }
 0x1c2   : > { %vm1708_vm12 = vcmp.eq.s32.totalorder %v1692_v55, 1  ;;  %1806 = vperm.xlu1 %4734, %v5243_v39   ;;  %v1167_v39 = vsel %vm1151_vm8, 65537, %v8288_v51  ;;  %v8534_v55 = vmov 0  ;;  %vm1279_vm8 = vcmp.eq.s32.totalorder %v5880_v25, 1 }
 0x1c3   : > { %vm1724_vm0 = vmpackc.low %vm1708_vm12, %vm1708_vm12  ;;  %v4151_v35 = vcombine.low %v1167_v39, %v1168_v50  ;;  %vm6585_vm12 = vcmp.ne.s16.totalorder %v4143_v18, 0 }
 0x1c4   : > { %v1740_v2 = vsel %vm1724_vm0, 65537, %v8288_v51  ;;  %vm1295_vm0 = vmpackc.low %vm1279_vm8, %vm1279_vm8  ;;  %vm961_vm8 = vcmp.eq.s32.totalorder %v6365_v48, 1 }
 0x1c5   : > { %v4185_v10 = vcombine.low %v1739_v1, %v1740_v2  ;;  %v6592_v2 = vpop.permute.xlu0 %2005  ;;  %vm6598_vm6 = vcmp.ne.s16.totalorder %v4151_v35, 0  ;;  %v1311_v50 = vsel %vm1295_vm0, 65537, %v8288_v51  ;;  %v8543_v35 = vld [vmem:[#allocation13_spill] sm:$0xff]  ;;  %vm960_vm0 = vcmp.eq.s32.totalorder %v6355_v49, 1  ;;  %vm977_vm15 = vmpackc.low %vm961_vm8, %vm961_vm8 }
 0x1c6   : > { %v761_v21 = vpop.permute.xlu1 %760  ;;  %1812 = vperm.xlu1 %4734, %v8504_v59   ;;  %v8537_v59 = vmov 0 }
 0x1c7   : > { %vm6574_vm14 = vcmp.ne.s16.totalorder %v4185_v10, 0  ;;  %v8538_v59 = vsel %vm6585_vm12, 4294967295, %v8537_v59  ;;  %v4159_v10 = vcombine.low %v1311_v50, %v1312_v43  ;;  %vm805_vm9 = vcmp.eq.s32.totalorder %v761_v21, 1  ;;  %v8547_v50 = vld [vmem:[#allocation65_spill] sm:$0xff] }
 0x1c8   : > { %v8535_v55 = vsel %vm6574_vm14, 4294967295, %v8534_v55  ;;  %v1780_v15 = vsel %vm6574_vm14, %v6106_v40, 0  ;;  %v1033_v40 = vsel %vm6585_vm12, %v6095_v13, 0  ;;  %v1210_v13 = vsel %vm6598_vm6, %v8542_v37, 0  ;;  %vm821_vm2 = vmpackc.low %vm805_vm9, %vm805_vm9 }
 0x1c9   : > { %8536 = vst [vmem:[#allocation67_spill] sm:$0xff] %v8535_v55  ;;  %2059 = vrot.lane.b32.xlu0 %v1780_v15, %s4898_s15  ;;  %v6609_v18 = vpop.permute.xlu0 %2029  ;;  %vm6615_vm7 = vcmp.ne.s16.totalorder %v4159_v10, 0  ;;  %v837_v43 = vsel %vm821_vm2, 65537, %v8288_v51  ;;  %vm976_vm2 = vmpackc.low %vm960_vm0, %vm960_vm0  ;;  %vm1282_vm0 = vcmp.eq.s32.totalorder %v6455_v7, 1 }
 0x1ca   : > { %1815 = vperm.xlu1 %4734, %v5074_v19   ;;  %v8539_v19 = vmov 0  ;;  %v4130_v6 = vcombine.low %v836_v17, %v837_v43 }
 0x1cb   : > { %v6590_v1 = vpop.permute.xlu1 %1264  ;;  %v8540_v19 = vsel %vm6598_vm6, 4294967295, %v8539_v19  ;;  %vm1137_vm6 = vcmp.eq.s32.totalorder %v6393_v38, 1  ;;  %v992_v38 = vsel %vm976_vm2, 65537, %v8288_v51  ;;  %vm8557_vm2 = vcmask 523264  }
 0x1cc   : > { %8541 = vst [vmem:[#allocation8_spill] sm:$0xff] %v8540_v19  ;;  %vm6638_vm8 = vcmp.ne.s16.totalorder %v4130_v6, 0 }
 0x1cd   : > { %v6612_v15 = vpop.permute.xlu0 %2053  ;;  %v884_v6 = vsel %vm6638_vm8, %v6533_v54, 0 }
 0x1ce   : > { %1935 = vrot.lane.b32.xlu1 %v1033_v40, %s4896_s20  ;;  %v8544_v40 = vmov 0 }
 0x1cf   : > { %4735 = vset.pattern.permute.xlu1 %v8288_v51  ;;  %v8545_v40 = vsel %vm6615_vm7, 4294967295, %v8544_v40 }
 0x1d0   : > { %v764_v25 = vpop.permute.xlu1 %763  ;;  %8546 = vst [vmem:[#allocation25_spill] sm:$0xff] %v8545_v40 }
 0x1d1   : > { %vm806_vm9 = vcmp.eq.s32.totalorder %v764_v25, 1  ;;  %v8551_v25 = vmov 0 }
 0x1d2   : > { %1959 = vrot.lane.b32.xlu1 %v1210_v13, %s8222_s29  ;;  %v8548_v13 = vpack.c.bf16 %v8455_v34, %v8547_v50  ;;  %vm822_vm14 = vmpackc.low %vm806_vm9, %vm806_vm9  ;;  %v8549_v34 = vld [vmem:[#allocation56_spill] sm:$0xff]  ;;  %v993_v50 = vsel %vm977_vm15, 65537, %v8288_v51  ;;  %v8552_v25 = vsel %vm6638_vm8, 4294967295, %v8551_v25  ;;  %vm8554_vm15 = vcmask 261120  }
 0x1d3   : > { %v1362_v49 = vpack.c.bf16 %v5686_v9, %v8549_v34  ;;  %8553 = vst [vmem:[#allocation27_spill] sm:$0xff] %v8552_v25  ;;  %v4144_v9 = vcombine.low %v992_v38, %v993_v50  ;;  %vm8559_vm8 = vcmask 785408   ;;  %v8567_v38 = vld [vmem:[#allocation42_spill] sm:$0xff]  ;;  %v8768_v25 = vld [vmem:[#allocation32_spill] sm:$0xff] }
 0x1d4   : > { %v767_v39 = vpop.permute.xlu1 %766  ;;  %v1354_v19 = vsel %vm6615_vm7, %v8548_v13, 0 }
 0x1d5   : > { %vm807_vm4 = vcmp.eq.s32.totalorder %v767_v39, 1 }
 0x1d6   : > { %799 = vperm.xlu1 %4735, %v8543_v35   ;;  %vm823_vm5 = vmpackc.low %vm807_vm4, %vm807_vm4 }
 0x1d7   : > { %vm1153_vm4 = vmpackc.low %vm1137_vm6, %vm1137_vm6 }
 0x1d8   : > { %v1926_v21 = vpop.permute.xlu1 %1925  ;;  %v1169_v55 = vsel %vm1153_vm4, 65537, %v8288_v51 }
 0x1da   : > { %1983 = vrot.lane.b32.xlu1 %v1354_v19, %s4898_s15  ;;  %v6629_v10 = vpop.permute.xlu0 %796  ;;  %v8550_v19 = vld [vmem:[#allocation64_spill] sm:$0xff] }
 0x1db   : > { %4737 = vset.pattern.permute.xlu1 %v8514_v61  ;;  %vm1138_vm7 = vcmp.eq.s32.totalorder %v8550_v19, 1  ;;  %v839_v61 = vsel %vm823_vm5, 65537, %v8288_v51  ;;  %v8555_v19 = vld [vmem:[#allocation81_spill] sm:$0xff]  ;;  %vm8556_vm5 = vmmov %vm8554_vm15 }
 0x1dc   : > { %v1950_v48 = vpop.permute.xlu1 %1949  ;;  %vm1154_vm9 = vmpackc.low %vm1138_vm7, %vm1138_vm7  ;;  %vm1281_vm6 = vcmp.eq.s32.totalorder %v8555_v19, 1  ;;  %v2063_v7 = vsel %vm8556_vm5, %v884_v6, %v1926_v21  ;;  %v8563_v21 = vmov 0  ;;  %v8572_v6 = vld [vmem:[#allocation17_spill] sm:$0xff] }
 0x1dd   : > { %vm8558_vm7 = vmmov %vm8557_vm2  ;;  %v1170_v54 = vsel %vm1154_vm9, 65537, %v8288_v51  ;;  %vm962_vm9 = vcmp.eq.s32.totalorder %v6488_v46, 1 }
 0x1de   : > { %1818 = vperm.xlu1 %4737, %v5256_v53   ;;  %v2008_v39 = vpop.permute.xlu0 %2007  ;;  %v838_v53 = vsel %vm822_vm14, 65537, %v8288_v51  ;;  %vm1298_vm14 = vmpackc.low %vm1282_vm0, %vm1282_vm0  ;;  %v2087_v50 = vsel %vm8558_vm7, %v2063_v7, %v1950_v48  ;;  %vm6667_vm0 = vcmp.ne.s16.totalorder %v4144_v9, 0  ;;  %v8571_v9 = vld [vmem:[#allocation68_spill] sm:$0xff] }
 0x1df   : > { %v4131_v43 = vcombine.low %v838_v53, %v839_v61  ;;  %v2144_v13 = vsel %vm8554_vm15, %v1362_v49, %v2008_v39  ;;  %vm963_vm15 = vcmp.eq.s32.totalorder %v6502_v63, 1  ;;  %vm1297_vm12 = vmpackc.low %vm1281_vm6, %vm1281_vm6  ;;  %v4152_v49 = vcombine.low %v1169_v55, %v1170_v54  ;;  %v8575_v7 = vld [vmem:[#allocation76_spill] sm:$0xff] }
 0x1e0   : > { %v770_v17 = vpop.permute.xlu1 %769  ;;  %v8560_v39 = vmov 0  ;;  %v8564_v21 = vsel %vm6667_vm0, 4294967295, %v8563_v21  ;;  %v1314_v48 = vsel %vm1298_vm14, 65537, %v8288_v51  ;;  %vm1139_vm6 = vcmp.eq.s32.totalorder %v6535_v33, 1  ;;  %vm6675_vm5 = vmpackc.low %vm809_vm10, %vm809_vm10 }
 0x1e1   : > { %vm6662_vm4 = vcmp.ne.s16.totalorder %v4131_v43, 0  ;;  %v1313_v63 = vsel %vm1297_vm12, 65537, %v8288_v51  ;;  %v1034_v53 = vsel %vm6667_vm0, %v6320_v60, 0  ;;  %vm978_vm14 = vmpackc.low %vm962_vm9, %vm962_vm9  ;;  %vm6686_vm7 = vcmp.ne.s16.totalorder %v4152_v49, 0 }
 0x1e2   : > { %1824 = vperm.xlu1 %4737, %v8543_v35   ;;  %v2032_v34 = vpop.permute.xlu0 %2031  ;;  %v8561_v39 = vsel %vm6662_vm4, 4294967295, %v8560_v39  ;;  %v4160_v46 = vcombine.low %v1313_v63, %v1314_v48  ;;  %v8568_v33 = vmov 0  ;;  %vm1140_vm10 = vcmp.eq.s32.totalorder %v8571_v9, 1  ;;  %vm1155_vm12 = vmpackc.low %vm1139_vm6, %vm1139_vm6 }
 0x1e3   : > { %v6655_v40 = vsel %vm8557_vm2, %v2144_v13, %v2032_v34  ;;  %8562 = vst [vmem:[#allocation20_spill] sm:$0xff] %v8561_v39  ;;  %vm808_vm2 = vcmp.eq.s32.totalorder %v770_v17, 1  ;;  %v8569_v33 = vsel %vm6686_vm7, 4294967295, %v8568_v33  ;;  %v8573_v13 = vld [vmem:[#allocation18_spill] sm:$0xff]  ;;  %v994_v19 = vsel %vm978_vm14, 65537, %v8288_v51  ;;  %vm1156_vm0 = vmpackc.low %vm1140_vm10, %vm1140_vm10 }
 0x1e4   : > { %v1974_v61 = vpop.permute.xlu1 %1973  ;;  %8570 = vst [vmem:[#allocation21_spill] sm:$0xff] %v8569_v33  ;;  %v1358_v17 = vpack.c.bf16 %v8573_v13, %v8572_v6  ;;  %vm1283_vm9 = vcmp.eq.s32.totalorder %v6590_v1, 1  ;;  %v841_v54 = vsel %vm6675_vm5, 65537, %v8288_v51  ;;  %vm6706_vm6 = vcmp.ne.s16.totalorder %v4160_v46, 0 }
 0x1e5   : > { %v2104_v35 = vsel %vm8559_vm8, %v2087_v50, %v1974_v61  ;;  %vm979_vm8 = vmpackc.low %vm963_vm15, %vm963_vm15  ;;  %v1211_v50 = vsel %vm6686_vm7, %v8575_v7, 0  ;;  %v8576_v61 = vld [vmem:[#allocation82_spill] sm:$0xff]  ;;  %v1171_v1 = vsel %vm1155_vm12, 65537, %v8288_v51  ;;  %vm8581_vm5 = vcmask 785408  }
 0x1e6   : > { %2398 = vmatmul.mubr.bf16.vlgmr.msra.gmra.mrb[0].mxu0 %v2104_v35  ;;  %1827 = vperm.xlu1 %4737, %v5088_v22   ;;  %v885_v22 = vsel %vm6662_vm4, %v8567_v38, 0  ;;  %v995_v43 = vsel %vm979_vm8, 65537, %v8288_v51  ;;  %vm824_vm15 = vmpackc.low %vm808_vm2, %vm808_vm2  ;;  %vm8574_vm4 = vcmask 261120   ;;  %vm1284_vm8 = vcmp.eq.s32.totalorder %v8576_v61, 1  ;;  %v8592_v61 = vld [vmem:[#allocation86_spill] sm:$0xff] }
 0x1e7   : > { %v2066_v60 = vsel %vm8574_vm4, %v885_v22, %v6374_v11  ;;  %v4145_v35 = vcombine.low %v994_v19, %v995_v43  ;;  %v840_v49 = vsel %vm824_vm15, 65537, %v8288_v51  ;;  %vm8579_vm2 = vcmask 523264   ;;  %vm1299_vm14 = vmpackc.low %vm1283_vm9, %vm1283_vm9 }
 0x1e8   : > { %v2000_v41 = vpop.permute.xlu1 %1999  ;;  %v2089_v63 = vsel %vm8579_vm2, %v2066_v60, %v6386_v28  ;;  %vm8580_vm10 = vmmov %vm8579_vm2  ;;  %v1172_v22 = vsel %vm1156_vm0, 65537, %v8288_v51  ;;  %v8582_v46 = vpack.c.bf16 %v5901_v42, %v5895_v14  ;;  %v8584_v6 = vmov 0 }
 0x1e9   : > { %v2132_v48 = vsel %vm8574_vm4, %v1358_v17, %v2000_v41  ;;  %vm1300_vm12 = vmpackc.low %vm1284_vm8, %vm1284_vm8  ;;  %v4153_v43 = vcombine.low %v1171_v1, %v1172_v22  ;;  %v4132_v41 = vcombine.low %v840_v49, %v841_v54  ;;  %vm6726_vm9 = vcmp.ne.s16.totalorder %v4145_v35, 0  ;;  %v8595_v35 = vld [vmem:[#allocation19_spill] sm:$0xff] }
 0x1ea   : > { %1937 = vrot.lane.b32.xlu1 %v1034_v53, %s4896_s20  ;;  %v1355_v9 = vsel %vm6706_vm6, %v8582_v46, 0  ;;  %vm8583_vm15 = vmmov %vm8581_vm5  ;;  %v8585_v6 = vsel %vm6726_vm9, 4294967295, %v8584_v6  ;;  %v1315_v13 = vsel %vm1299_vm14, 65537, %v8288_v51  ;;  %v1316_v42 = vsel %vm1300_vm12, 65537, %v8288_v51 }
 0x1eb   : > { %v2107_v28 = vsel %vm8583_vm15, %v2089_v63, %v6438_v57  ;;  %v1035_v17 = vsel %vm6726_vm9, %v6451_v24, 0  ;;  %vm6735_vm0 = vcmp.ne.s16.totalorder %v4132_v41, 0  ;;  %v8586_v60 = vmov 0 }
 0x1ec   : > { %v2024_v34 = vpop.permute.xlu1 %2023  ;;  %v8587_v60 = vsel %vm6735_vm0, 4294967295, %v8586_v60  ;;  %vm6740_vm8 = vcmp.ne.s16.totalorder %v4153_v43, 0  ;;  %v8589_v57 = vmov 0  ;;  %v8593_v54 = vmov 0 }
 0x1ed   : > { %v2154_v55 = vsel %vm8580_vm10, %v2132_v48, %v2024_v34  ;;  %v4161_v34 = vcombine.low %v1315_v13, %v1316_v42  ;;  %8588 = vst [vmem:[#allocation9_spill] sm:$0xff] %v8587_v60  ;;  %v8590_v57 = vsel %vm6740_vm8, 4294967295, %v8589_v57  ;;  %v1212_v24 = vsel %vm6740_vm8, %v8592_v61, 0  ;;  %vm8603_vm8 = vmmov %vm8583_vm15 }
 0x1ee   : > { %1961 = vrot.lane.b32.xlu1 %v1211_v50, %s8222_s29  ;;  %8591 = vst [vmem:[#allocation36_spill] sm:$0xff] %v8590_v57  ;;  %v886_v50 = vsel %vm6735_vm0, %v8459_v44, 0  ;;  %v1359_v1 = vpack.c.bf16 %v8481_v52, %v8595_v35  ;;  %vm8596_vm2 = vcmask 261120   ;;  %v8597_v44 = vld [vmem:[#allocation28_spill] sm:$0xff]  ;;  %vm8679_vm9 = vcmask 785408   ;;  %v4786_v57 = vld [vmem:[%s8022_s8 + $0xf0] sm:$0xff]  }
 0x1ef   : > { %vm6751_vm4 = vcmp.ne.s16.totalorder %v4161_v34, 0  ;;  %v6757_v49 = vpop.permute.xlu0 %2055  ;;  %v2069_v63 = vsel %vm8596_vm2, %v886_v50, %v6453_v5  ;;  %vm8599_vm14 = vmmov %vm8596_vm2 }
 0x1f0   : > { %v2048_v38 = vpop.permute.xlu1 %2047  ;;  %v8594_v54 = vsel %vm6751_vm4, 4294967295, %v8593_v54  ;;  %v2091_v52 = vsel %vm8580_vm10, %v2069_v63, %v6476_v36  ;;  %vm8601_vm12 = vmmov %vm8596_vm2 }
 0x1f1   : > { %v2171_v53 = vsel %vm8581_vm5, %v2154_v55, %v2048_v38  ;;  %v1360_v55 = vpack.c.bf16 %v8597_v44, %v8482_v16  ;;  %v8598_v38 = vpack.c.bf16 %v6069_v12, %v6063_v30  ;;  %vm8600_vm5 = vmmov %vm8580_vm10  ;;  %v2110_v43 = vsel %vm8603_vm8, %v2091_v52, %v6510_v20  ;;  %v8613_v44 = vld [vmem:[#allocation74_spill] sm:$0xff]  ;;  %v8619_v52 = vld [vmem:[#allocation40_spill] sm:$0xff] }
 0x1f2   : > { %2405 = vmatprep.mubr.bf16.mxu0 %v2171_v53  ;;  %1985 = vrot.lane.b32.xlu1 %v1355_v9, %s4898_s15  ;;  %vm8602_vm2 = vmmov %vm8600_vm5 }
 0x1f3   : > { %2406 = vmatmul.mubr.bf16.gmra.mrb[4].mxu0 %v2107_v28  ;;  %v1356_v22 = vsel %vm6751_vm4, %v8598_v38, 0  ;;  %v2138_v16 = vsel %vm8601_vm12, %v1360_v55, %v6527_v0 }
 0x1f4   : > { %v779_v14 = vpop.permute.xlu1 %778  ;;  %v2158_v12 = vsel %vm8602_vm2, %v2138_v16, %v6550_v62  ;;  %vm810_vm2 = vcmp.eq.s32.totalorder %v6408_v45, 1 }
 0x1f5   : > { %vm811_vm7 = vcmp.eq.s32.totalorder %v779_v14, 1  ;;  %vm826_vm0 = vmpackc.low %vm810_vm2, %vm810_vm2 }
 0x1f6   : > { %1939 = vrot.lane.b32.xlu1 %v1035_v17, %s4896_s20  ;;  %v8608_v17 = vld [vmem:[#allocation23_spill] sm:$0xff]  ;;  %v842_v50 = vsel %vm826_vm0, 65537, %v8288_v51  ;;  %s405_s20 = sand.u32 1, %s4878_s22  }
 0x1f8   : > { %v2002_v19 = vpop.permute.xlu1 %2001 }
 0x1f9   : > { %v2135_v53 = vsel %vm8599_vm14, %v1359_v1, %v2002_v19  ;;  %vm8604_vm14 = vmmov %vm8603_vm8 }
 0x1fa   : > { %1963 = vrot.lane.b32.xlu1 %v1212_v24, %s8222_s29  ;;  %v2177_v36 = vsel %vm8604_vm14, %v2158_v12, %v6562_v32  ;;  %v8605_v32 = vmov 0 }
 0x1fc   : > { %v2026_v48 = vpop.permute.xlu1 %2025 }
 0x1fd   : > { %v2156_v46 = vsel %vm8600_vm5, %v2135_v53, %v2026_v48  ;;  %v8610_v48 = vmov 0  ;;  %v8618_v53 = vld [vmem:[#allocation39_spill] sm:$0xff] }
 0x1fe   : > { %1987 = vrot.lane.b32.xlu1 %v1356_v22, %s4898_s15  ;;  %v8615_v22 = vmov 0 }
 0x200   : > { %v2050_v9 = vpop.permute.xlu1 %2049  ;;  %v6773_v5 = vpop.permute.xlu0 %802 }
 0x201   : > { %v2174_v30 = vsel %vm8583_vm15, %v2156_v46, %v2050_v9  ;;  %v1361_v46 = vpack.c.bf16 %v8619_v52, %v8618_v53 }
 0x202   : > { %2413 = vmatprep.mubr.bf16.mxu0 %v2174_v30 }
 0x203   : > { %2414 = vmatmul.mubr.bf16.gmra.mrb[8].mxu0 %v2110_v43 }
 0x204   : > { %v6784_v41 = vpop.permute.xlu1 %784  ;;  %2421 = vmatprep.mubr.bf16.mxu0 %v2177_v36 }
 0x205   : > { %v1786_v28 = vpop.permute.xlu0 %1785 }
 0x206   : > { %vm1830_vm10 = vcmp.eq.s32.totalorder %v1786_v28, 1 }
 0x207   : > { %vm1846_vm5 = vmpackc.low %vm1830_vm10, %vm1830_vm10 }
 0x208   : > { %v1862_v13 = vsel %vm1846_vm5, 65537, %v8288_v51  ;;  %vm8609_vm5 = vcmask 261120  }
 0x209   : > { %v1783_v0 = vpop.permute.xlu1 %1782  ;;  %v1798_v16 = vpop.permute.xlu0 %1797 }
 0x20a   : > { %vm1829_vm12 = vcmp.eq.s32.totalorder %v1783_v0, 1  ;;  %vm1834_vm0 = vcmp.eq.s32.totalorder %v1798_v16, 1 }
 0x20b   : > { %vm1845_vm15 = vmpackc.low %vm1829_vm12, %vm1829_vm12 }
 0x20c   : > { %v1861_v62 = vsel %vm1845_vm15, 65537, %v8288_v51  ;;  %vm827_vm12 = vmpackc.low %vm811_vm7, %vm811_vm7 }
 0x20d   : > { %v1789_v20 = vpop.permute.xlu1 %1788  ;;  %v4186_v42 = vcombine.low %v1861_v62, %v1862_v13  ;;  %v843_v24 = vsel %vm827_vm12, 65537, %v8288_v51  ;;  %vm8614_vm7 = vmmov %vm8609_vm5 }
 0x20e   : > { %vm1831_vm8 = vcmp.eq.s32.totalorder %v1789_v20, 1  ;;  %v4133_v63 = vcombine.low %v842_v50, %v843_v24 }
 0x20f   : > { %vm6789_vm14 = vcmp.ne.s16.totalorder %v4186_v42, 0  ;;  %vm1847_vm10 = vmpackc.low %vm1831_vm8, %vm1831_vm8 }
 0x210   : > { %v8606_v32 = vsel %vm6789_vm14, 4294967295, %v8605_v32  ;;  %v1909_v34 = vsel %vm6789_vm14, %v8608_v17, 0  ;;  %v1863_v45 = vsel %vm1847_vm10, 65537, %v8288_v51  ;;  %vm6809_vm8 = vcmp.ne.s16.totalorder %v4133_v63, 0 }
 0x211   : > { %8607 = vst [vmem:[#allocation60_spill] sm:$0xff] %v8606_v32  ;;  %v1792_v19 = vpop.permute.xlu1 %1791  ;;  %4513 = vmatprep.mubr.msk.bf16.mxu1 %vm8609_vm5, %v1909_v34  ;;  %v8616_v22 = vsel %vm6809_vm8, 4294967295, %v8615_v22  ;;  %v887_v30 = vsel %vm6809_vm8, %v8480_v47, 0  ;;  %v8634_v63 = vmov 0  ;;  %v4784_v32 = vld [vmem:[%s8022_s8 + $0xe8] sm:$0xff]  }
 0x212   : > { %vm1832_vm15 = vcmp.eq.s32.totalorder %v1792_v19, 1  ;;  %8617 = vst [vmem:[#allocation7_spill] sm:$0xff] %v8616_v22 }
 0x213   : > { %vm1848_vm4 = vmpackc.low %vm1832_vm15, %vm1832_vm15  ;;  %vm8624_vm15 = vcmask 785408  }
 0x214   : > { %v1864_v14 = vsel %vm1848_vm4, 65537, %v8288_v51  ;;  %vm8620_vm4 = vmmov %vm8609_vm5  ;;  %vm8622_vm5 = vcmask 523264  }
 0x215   : > { %v4187_v35 = vcombine.low %v1863_v45, %v1864_v14  ;;  %v1932_v1 = vpop.permute.xlu1 %1931  ;;  %vm8621_vm10 = vmmov %vm8620_vm4 }
 0x216   : > { %v2072_v12 = vsel %vm8620_vm4, %v887_v30, %v1932_v1  ;;  %v2141_v43 = vsel %vm8621_vm10, %v1361_v46, %v6592_v2  ;;  %vm8623_vm12 = vmmov %vm8622_vm5 }
 0x217   : > { %vm6801_vm2 = vcmp.ne.s16.totalorder %v4187_v35, 0  ;;  %v2160_v0 = vsel %vm8623_vm12, %v2141_v43, %v6609_v18  ;;  %v8626_v18 = vmov 0 }
 0x218   : > { %v8611_v48 = vsel %vm6801_vm2, 4294967295, %v8610_v48  ;;  %v1910_v55 = vsel %vm6801_vm2, %v8613_v44, 0  ;;  %vm8625_vm2 = vmmov %vm8624_vm15 }
 0x219   : > { %8612 = vst [vmem:[#allocation5_spill] sm:$0xff] %v8611_v48  ;;  %v1956_v38 = vpop.permute.xlu1 %1955  ;;  %4514 = vmatmul.mubr.msk.bf16.vlgmr.msra.gmra.mrb[0].mxu1 %vm8614_vm7, %v1910_v55  ;;  %vm1850_vm7 = vmpackc.low %vm1834_vm0, %vm1834_vm0  ;;  %v2180_v62 = vsel %vm8625_vm2, %v2160_v0, %v6612_v15  ;;  %vm812_vm2 = vcmp.eq.s32.totalorder %v6486_v29, 1  ;;  %v8630_v29 = vmov 0  ;;  %v1810_v55 = vpop.permute.xlu0 %1809 }
 0x21a   : > { %v2093_v36 = vsel %vm8622_vm5, %v2072_v12, %v1956_v38  ;;  %v1866_v20 = vsel %vm1850_vm7, 65537, %v8288_v51  ;;  %vm813_vm5 = vcmp.eq.s32.totalorder %v6784_v41, 1  ;;  %vm828_vm8 = vmpackc.low %vm812_vm2, %vm812_vm2  ;;  %v8637_v38 = vld [vmem:[#allocation79_spill] sm:$0xff] }
 0x21d   : > { %v6815_v9 = vpop.permute.xlu1 %787 }
 0x221   : > { %v1980_v28 = vpop.permute.xlu1 %1979 }
 0x222   : > { %v2113_v13 = vsel %vm8624_vm15, %v2093_v36, %v1980_v28  ;;  %vm8629_vm15 = vcmask 261120  }
 0x223   : > { %2422 = vmatmul.mubr.bf16.gmra.mrb[12].mxu0 %v2113_v13  ;;  %v1822_v13 = vpop.permute.xlu0 %1821 }
 0x224   : > { %2429 = vmatprep.mubr.bf16.mxu0 %v2180_v62  ;;  %v8642_v62 = vmov 0 }
 0x225   : > { %v1795_v47 = vpop.permute.xlu1 %1794 }
 0x226   : > { %vm1833_vm4 = vcmp.eq.s32.totalorder %v1795_v47, 1 }
 0x227   : > { %vm1849_vm14 = vmpackc.low %vm1833_vm4, %vm1833_vm4  ;;  %v2010_v47 = vpop.permute.xlu0 %2009 }
 0x228   : > { %v1865_v2 = vsel %vm1849_vm14, 65537, %v8288_v51  ;;  %vm829_vm14 = vmpackc.low %vm813_vm5, %vm813_vm5 }
 0x229   : > { %v4188_v42 = vcombine.low %v1865_v2, %v1866_v20  ;;  %v1801_v17 = vpop.permute.xlu1 %1800  ;;  %v845_v45 = vsel %vm829_vm14, 65537, %v8288_v51 }
 0x22a   : > { %vm1835_vm10 = vcmp.eq.s32.totalorder %v1801_v17, 1 }
 0x22b   : > { %vm6832_vm12 = vcmp.ne.s16.totalorder %v4188_v42, 0  ;;  %vm1851_vm0 = vmpackc.low %vm1835_vm10, %vm1835_vm10 }
 0x22c   : > { %v8627_v18 = vsel %vm6832_vm12, 4294967295, %v8626_v18  ;;  %v1911_v15 = vsel %vm6832_vm12, %v8503_v56, 0  ;;  %v1867_v41 = vsel %vm1851_vm0, 65537, %v8288_v51  ;;  %v844_v56 = vsel %vm828_vm8, 65537, %v8288_v51  ;;  %vm8633_vm10 = vmmov %vm8629_vm15 }
 0x22d   : > { %8628 = vst [vmem:[#allocation53_spill] sm:$0xff] %v8627_v18  ;;  %v1804_v34 = vpop.permute.xlu1 %1803  ;;  %4517 = vmatprep.mubr.msk.bf16.mxu1 %vm8629_vm15, %v1911_v15  ;;  %v4134_v24 = vcombine.low %v844_v56, %v845_v45  ;;  %vm1838_vm8 = vcmp.eq.s32.totalorder %v1810_v55, 1  ;;  %vm8638_vm2 = vmmov %vm8633_vm10  ;;  %vm8639_vm0 = vcmask 523264   ;;  %vm8640_vm15 = vcmask 785408  }
 0x22e   : > { %vm1836_vm7 = vcmp.eq.s32.totalorder %v1804_v34, 1  ;;  %vm1854_vm14 = vmpackc.low %vm1838_vm8, %vm1838_vm8  ;;  %v8650_v45 = vmov 0 }
 0x22f   : > { %vm1852_vm4 = vmpackc.low %vm1836_vm7, %vm1836_vm7  ;;  %vm6853_vm5 = vcmp.ne.s16.totalorder %v4134_v24, 0  ;;  %v1870_v43 = vsel %vm1854_vm14, 65537, %v8288_v51  ;;  %v8654_v24 = vld [vmem:[#allocation87_spill] sm:$0xff] }
 0x230   : > { %v1868_v19 = vsel %vm1852_vm4, 65537, %v8288_v51  ;;  %v8635_v63 = vsel %vm6853_vm5, 4294967295, %v8634_v63  ;;  %v888_v53 = vsel %vm6853_vm5, %v8637_v38, 0  ;;  %vm8641_vm7 = vmmov %vm8640_vm15 }
 0x231   : > { %v4189_v14 = vcombine.low %v1867_v41, %v1868_v19  ;;  %v1934_v50 = vpop.permute.xlu1 %1933  ;;  %8636 = vst [vmem:[#allocation12_spill] sm:$0xff] %v8635_v63  ;;  %v2183_v30 = vsel %vm8641_vm7, %v6655_v40, %v6757_v49  ;;  %vm8645_vm7 = vcmask 261120   ;;  %v2034_v19 = vpop.permute.xlu0 %2033 }
 0x232   : > { %v2075_v52 = vsel %vm8638_vm2, %v888_v53, %v1934_v50 }
 0x233   : > { %vm6845_vm12 = vcmp.ne.s16.totalorder %v4189_v14, 0  ;;  %v8653_v14 = vld [vmem:[#allocation71_spill] sm:$0xff] }
 0x234   : > { %v8631_v29 = vsel %vm6845_vm12, 4294967295, %v8630_v29  ;;  %v1912_v35 = vsel %vm6845_vm12, %v8526_v4, 0  ;;  %v1363_v50 = vpack.c.bf16 %v5788_v3, %v8653_v14 }
 0x235   : > { %8632 = vst [vmem:[#allocation30_spill] sm:$0xff] %v8631_v29  ;;  %v1958_v1 = vpop.permute.xlu1 %1957  ;;  %4518 = vmatmul.mubr.msk.bf16.gmra.mrb[4].mxu1 %vm8633_vm10, %v1912_v35 }
 0x236   : > { %v2095_v46 = vsel %vm8639_vm0, %v2075_v52, %v1958_v1  ;;  %vm814_vm0 = vcmp.eq.s32.totalorder %v6815_v9, 1  ;;  %v2058_v1 = vpop.permute.xlu0 %2057 }
 0x239   : > { %v6857_v44 = vpop.permute.xlu1 %793 }
 0x23d   : > { %v1982_v4 = vpop.permute.xlu1 %1981 }
 0x23e   : > { %v2116_v16 = vsel %vm8640_vm15, %v2095_v46, %v1982_v4  ;;  %vm815_vm15 = vcmp.eq.s32.totalorder %v6570_v23, 1  ;;  %v8646_v23 = vmov 0 }
 0x23f   : > { %2430 = vmatmul.mubr.bf16.gmra.mrb[16].mxu0 %v2116_v16  ;;  %vm831_vm5 = vmpackc.low %vm815_vm15, %vm815_vm15  ;;  %vm8657_vm15 = vcmask 523264  }
 0x240   : > { %2437 = vmatprep.mubr.bf16.mxu0 %v2183_v30 }
 0x241   : > { %v1807_v12 = vpop.permute.xlu1 %1806 }
 0x242   : > { %vm1837_vm4 = vcmp.eq.s32.totalorder %v1807_v12, 1 }
 0x243   : > { %vm1853_vm10 = vmpackc.low %vm1837_vm4, %vm1837_vm4 }
 0x244   : > { %v1869_v36 = vsel %vm1853_vm10, 65537, %v8288_v51  ;;  %vm830_vm4 = vmpackc.low %vm814_vm0, %vm814_vm0 }
 0x245   : > { %v4190_v28 = vcombine.low %v1869_v36, %v1870_v43  ;;  %v1813_v0 = vpop.permute.xlu1 %1812  ;;  %v846_v2 = vsel %vm830_vm4, 65537, %v8288_v51  ;;  %vm8659_vm4 = vcmask 785408   ;;  %v8661_v36 = vmov 0 }
 0x246   : > { %vm1839_vm2 = vcmp.eq.s32.totalorder %v1813_v0, 1 }
 0x247   : > { %vm6871_vm8 = vcmp.ne.s16.totalorder %v4190_v28, 0  ;;  %vm1855_vm14 = vmpackc.low %vm1839_vm2, %vm1839_vm2 }
 0x248   : > { %v8643_v62 = vsel %vm6871_vm8, 4294967295, %v8642_v62  ;;  %v1913_v40 = vsel %vm6871_vm8, %v8542_v37, 0  ;;  %v1871_v9 = vsel %vm1855_vm14, 65537, %v8288_v51  ;;  %v847_v37 = vsel %vm831_vm5, 65537, %v8288_v51  ;;  %vm8649_vm2 = vmmov %vm8645_vm7 }
 0x249   : > { %8644 = vst [vmem:[#allocation26_spill] sm:$0xff] %v8643_v62  ;;  %v1816_v49 = vpop.permute.xlu1 %1815  ;;  %4521 = vmatprep.mubr.msk.bf16.mxu1 %vm8645_vm7, %v1913_v40  ;;  %v4135_v15 = vcombine.low %v846_v2, %v847_v37  ;;  %vm8655_vm5 = vmmov %vm8649_vm2  ;;  %vm1842_vm14 = vcmp.eq.s32.totalorder %v1822_v13, 1  ;;  %v2012_v13 = vpop.permute.xlu0 %2011 }
 0x24a   : > { %vm1840_vm10 = vcmp.eq.s32.totalorder %v1816_v49, 1  ;;  %vm8656_vm0 = vmmov %vm8649_vm2 }
 0x24b   : > { %vm1856_vm12 = vmpackc.low %vm1840_vm10, %vm1840_vm10 }
 0x24c   : > { %v1872_v20 = vsel %vm1856_vm12, 65537, %v8288_v51  ;;  %vm6892_vm12 = vcmp.ne.s16.totalorder %v4135_v15, 0  ;;  %vm8658_vm7 = vmmov %vm8657_vm15  ;;  %v8672_v15 = vld [vmem:[#allocation84_spill] sm:$0xff] }
 0x24d   : > { %v4191_v42 = vcombine.low %v1871_v9, %v1872_v20  ;;  %v1936_v17 = vpop.permute.xlu1 %1935  ;;  %v8651_v45 = vsel %vm6892_vm12, 4294967295, %v8650_v45  ;;  %v889_v35 = vsel %vm6892_vm12, %v8654_v24, 0  ;;  %vm8660_vm10 = vmmov %vm8659_vm4  ;;  %vm816_vm12 = vcmp.eq.s32.totalorder %v6857_v44, 1  ;;  %v2036_v2 = vpop.permute.xlu0 %2035 }
 0x24e   : > { %8652 = vst [vmem:[#allocation62_spill] sm:$0xff] %v8651_v45  ;;  %v2078_v55 = vsel %vm8655_vm5, %v889_v35, %v1936_v17  ;;  %v8671_v17 = vld [vmem:[#allocation35_spill] sm:$0xff] }
 0x24f   : > { %vm6884_vm8 = vcmp.ne.s16.totalorder %v4191_v42, 0  ;;  %v8668_v42 = vmov 0 }
 0x250   : > { %v8647_v23 = vsel %vm6884_vm8, 4294967295, %v8646_v23  ;;  %v1914_v34 = vsel %vm6884_vm8, %v8575_v7, 0  ;;  %v2147_v7 = vsel %vm8656_vm0, %v1363_v50, %v2010_v47  ;;  %vm817_vm0 = vcmp.eq.s32.totalorder %v6629_v10, 1 }
 0x251   : > { %8648 = vst [vmem:[#allocation37_spill] sm:$0xff] %v8647_v23  ;;  %v1960_v41 = vpop.permute.xlu1 %1959  ;;  %4522 = vmatmul.mubr.msk.bf16.gmra.mrb[8].mxu1 %vm8649_vm2, %v1914_v34  ;;  %v2164_v52 = vsel %vm8658_vm7, %v2147_v7, %v2034_v19  ;;  %vm1858_vm2 = vmpackc.low %vm1842_vm14, %vm1842_vm14  ;;  %v1364_v34 = vpack.c.bf16 %v8672_v15, %v5956_v27  ;;  %v8674_v19 = vld [vmem:[#allocation48_spill] sm:$0xff]  ;;  %v2060_v50 = vpop.permute.xlu0 %2059 }
 0x252   : > { %v2097_v38 = vsel %vm8657_vm15, %v2078_v55, %v1960_v41  ;;  %v2186_v3 = vsel %vm8660_vm10, %v2164_v52, %v2058_v1  ;;  %v1874_v16 = vsel %vm1858_vm2, 65537, %v8288_v51  ;;  %vm832_vm15 = vmpackc.low %vm816_vm12, %vm816_vm12  ;;  %vm8664_vm10 = vcmask 261120  }
 0x253   : > { %vm833_vm14 = vmpackc.low %vm817_vm0, %vm817_vm0  ;;  %v848_v28 = vsel %vm832_vm15, 65537, %v8288_v51 }
 0x254   : > { %v849_v10 = vsel %vm833_vm14, 65537, %v8288_v51  ;;  %vm8673_vm14 = vmmov %vm8664_vm10 }
 0x255   : > { %v800_v56 = vpop.permute.xlu1 %799  ;;  %v4136_v40 = vcombine.low %v848_v28, %v849_v10 }
 0x257   : > { %vm6927_vm15 = vcmp.ne.s16.totalorder %v4136_v40, 0 }
 0x258   : > { %v8669_v42 = vsel %vm6927_vm15, 4294967295, %v8668_v42  ;;  %v890_v14 = vsel %vm6927_vm15, %v8674_v19, 0  ;;  %v6962_v19 = vld [vmem:[%s8019_s5] ss:$0 sm:$0xff] }
 0x259   : > { %v1984_v53 = vpop.permute.xlu1 %1983  ;;  %8670 = vst [vmem:[#allocation45_spill] sm:$0xff] %v8669_v42 }
 0x25a   : > { %v2119_v46 = vsel %vm8659_vm4, %v2097_v38, %v1984_v53 }
 0x25b   : > { %2438 = vmatmul.mubr.bf16.gmra.mrb[20].mxu0 %v2119_v46  ;;  %v8681_v46 = vmov 0 }
 0x25c   : > { %2445 = vmatprep.mubr.bf16.mxu0 %v2186_v3 }
 0x25d   : > { %v1819_v4 = vpop.permute.xlu1 %1818 }
 0x25e   : > { %vm1841_vm8 = vcmp.eq.s32.totalorder %v1819_v4, 1 }
 0x25f   : > { %vm1857_vm5 = vmpackc.low %vm1841_vm8, %vm1841_vm8 }
 0x260   : > { %v1873_v30 = vsel %vm1857_vm5, 65537, %v8288_v51  ;;  %vm818_vm5 = vcmp.eq.s32.totalorder %v800_v56, 1 }
 0x261   : > { %v4192_v12 = vcombine.low %v1873_v30, %v1874_v16  ;;  %v1825_v43 = vpop.permute.xlu1 %1824 }
 0x262   : > { %vm1843_vm7 = vcmp.eq.s32.totalorder %v1825_v43, 1 }
 0x263   : > { %vm6911_vm4 = vcmp.ne.s16.totalorder %v4192_v12, 0  ;;  %vm1859_vm8 = vmpackc.low %vm1843_vm7, %vm1843_vm7  ;;  %vm819_vm7 = vcmp.eq.s32.totalorder %v6773_v5, 1 }
 0x264   : > { %v8662_v36 = vsel %vm6911_vm4, 4294967295, %v8661_v36  ;;  %v1915_v44 = vsel %vm6911_vm4, %v8592_v61, 0  ;;  %v1875_v49 = vsel %vm1859_vm8, 65537, %v8288_v51  ;;  %v8665_v61 = vmov 0  ;;  %vm834_vm8 = vmpackc.low %vm818_vm5, %vm818_vm5 }
 0x265   : > { %8663 = vst [vmem:[#allocation11_spill] sm:$0xff] %v8662_v36  ;;  %v1828_v0 = vpop.permute.xlu1 %1827  ;;  %4525 = vmatprep.mubr.msk.bf16.mxu1 %vm8664_vm10, %v1915_v44  ;;  %vm835_vm10 = vmpackc.low %vm819_vm7, %vm819_vm7  ;;  %v850_v35 = vsel %vm834_vm8, 65537, %v8288_v51 }
 0x266   : > { %vm1844_vm2 = vcmp.eq.s32.totalorder %v1828_v0, 1  ;;  %v851_v7 = vsel %vm835_vm10, 65537, %v8288_v51  ;;  %vm8680_vm5 = vmmov %vm8679_vm9 }
 0x267   : > { %vm1860_vm12 = vmpackc.low %vm1844_vm2, %vm1844_vm2  ;;  %v4137_v53 = vcombine.low %v850_v35, %v851_v7 }
 0x268   : > { %v1876_v47 = vsel %vm1860_vm12, 65537, %v8288_v51  ;;  %vm8675_vm2 = vmmov %vm8673_vm14 }
 0x269   : > { %v4193_v9 = vcombine.low %v1875_v49, %v1876_v47  ;;  %v1938_v20 = vpop.permute.xlu1 %1937  ;;  %vm8676_vm12 = vmmov %vm8675_vm2  ;;  %vm6949_vm7 = vcmp.ne.s16.totalorder %v4137_v53, 0 }
 0x26a   : > { %v2081_v56 = vsel %vm8675_vm2, %v890_v14, %v1938_v20  ;;  %v2150_v24 = vsel %vm8676_vm12, %v1364_v34, %v2012_v13  ;;  %v8682_v46 = vsel %vm6949_vm7, 4294967295, %v8681_v46  ;;  %v891_v4 = vsel %vm6949_vm7, %v6417_v26, 0 }
 0x26b   : > { %vm6923_vm0 = vcmp.ne.s16.totalorder %v4193_v9, 0  ;;  %8683 = vst [vmem:[#allocation63_spill] sm:$0xff] %v8682_v46 }
 0x26c   : > { %v8666_v61 = vsel %vm6923_vm0, 4294967295, %v8665_v61  ;;  %v1916_v37 = vsel %vm6923_vm0, %v8671_v17, 0  ;;  %vm8677_vm0 = vcmask 523264  }
 0x26d   : > { %8667 = vst [vmem:[#allocation54_spill] sm:$0xff] %v8666_v61  ;;  %v1962_v41 = vpop.permute.xlu1 %1961  ;;  %4526 = vmatmul.mubr.msk.bf16.gmra.mrb[12].mxu1 %vm8673_vm14, %v1916_v37  ;;  %vm8678_vm4 = vmmov %vm8677_vm0 }
 0x26e   : > { %v2099_v5 = vsel %vm8677_vm0, %v2081_v56, %v1962_v41  ;;  %v2166_v27 = vsel %vm8678_vm4, %v2150_v24, %v2036_v2  ;;  %vm8684_vm4 = vmmov %vm8675_vm2 }
 0x26f   : > { %v2189_v38 = vsel %vm8680_vm5, %v2166_v27, %v2060_v50 }
 0x271   : > { %v1986_v1 = vpop.permute.xlu1 %1985 }
 0x272   : > { %v2122_v55 = vsel %vm8679_vm9, %v2099_v5, %v1986_v1  ;;  %vm8685_vm9 = vmmov %vm8677_vm0 }
 0x273   : > { %2446 = vmatmul.mubr.bf16.gmra.mrb[24].mxu0 %v2122_v55  ;;  %vm8686_vm0 = vmmov %vm8680_vm5 }
 0x274   : > { %2453 = vmatprep.mubr.bf16.mxu0 %v2189_v38  ;;  %vm8687_vm14 = vmmov %vm8685_vm9 }
 0x275   : > { %v1940_v52 = vpop.permute.xlu1 %1939  ;;  %vm8688_vm8 = vmmov %vm8685_vm9 }
 0x276   : > { %v2084_v16 = vsel %vm8684_vm4, %v891_v4, %v1940_v52  ;;  %vm8689_vm10 = vmmov %vm8688_vm8 }
 0x277   : > { %vm8690_vm2 = vmmov %vm8688_vm8 }
 0x278   : > { %vm8691_vm12 = vmmov %vm8690_vm2 }
 0x279   : > { %v1964_v3 = vpop.permute.xlu1 %1963  ;;  %vm8692_vm5 = vmmov %vm8690_vm2 }
 0x27a   : > { %v2101_v30 = vsel %vm8685_vm9, %v2084_v16, %v1964_v3  ;;  %vm8693_vm4 = vmmov %vm8690_vm2 }
 0x27b   : > { %vm8694_vm9 = vmmov %vm8690_vm2 }
 0x27d   : > { %v1988_v51 = vpop.permute.xlu1 %1987 }
 0x27e   : > { %v2125_v12 = vsel %vm8686_vm0, %v2101_v30, %v1988_v51  ;;  %vm8695_vm0 = vmmov %vm8690_vm2 }
 0x27f   : > { %2454 = vmatmul.mubr.bf16.gmra.mrb[28].mxu0 %v2125_v12 }
 0x2b9   : > { %v4301_v43 = vpop.f32.mrb[0].mxu0 }
 0x2ba   : > { %v4302_v44 = vpop.f32.mrb[1].mxu0 }
 0x2bb   : > { %v4303_v28 = vadd.f32 %v4302_v44, %v4301_v43  ;;  %v4304_v0 = vpop.f32.mrb[2].mxu0 }
 0x2bc   : > { %v4305_v10 = vpop.f32.mrb[3].mxu0 }
 0x2bd   : > { %v4306_v13 = vadd.f32 %v4305_v10, %v4304_v0  ;;  %v2400_v56 = vadd.f32 %v4303_v28, %v6962_v19 }
 0x2bf   : > { %v2403_v55 = vadd.f32 %v4306_v13, %v6962_v19 }
 0x2c6   : > { %v4307_v40 = vpop.f32.mrb[4].mxu0 }
 0x2c7   : > { %v4308_v49 = vpop.f32.mrb[5].mxu0 }
 0x2c8   : > { %v4309_v47 = vadd.f32 %v4308_v49, %v4307_v40  ;;  %v4310_v9 = vpop.f32.mrb[6].mxu0 }
 0x2c9   : > { %v4311_v20 = vpop.f32.mrb[7].mxu0 }
 0x2ca   : > { %v4312_v26 = vadd.f32 %v4311_v20, %v4310_v9  ;;  %v2408_v14 = vadd.f32 %v4309_v47, %v6962_v19 }
 0x2cc   : > { %v2411_v5 = vadd.f32 %v4312_v26, %v6962_v19 }
 0x2d6   : > { %v4313_v2 = vpop.f32.mrb[8].mxu0 }
 0x2d7   : > { %v4314_v17 = vpop.f32.mrb[9].mxu0 }
 0x2d8   : > { %v4315_v37 = vadd.f32 %v4314_v17, %v4313_v2  ;;  %v4316_v15 = vpop.f32.mrb[10].mxu0 }
 0x2d9   : > { %v4317_v34 = vpop.f32.mrb[11].mxu0 }
 0x2da   : > { %v4318_v41 = vadd.f32 %v4317_v34, %v4316_v15  ;;  %v2416_v44 = vadd.f32 %v4315_v37, %v6962_v19 }
 0x2dc   : > { %v2419_v49 = vadd.f32 %v4318_v41, %v6962_v19 }
 0x2ec   : > { %v4515_v50 = vpop.f32.mrb[0].mxu1 }
 0x2ed   : > { %v6966_v24 = vadd.f32 %v4515_v50, %v2408_v14  ;;  %v2496_v35 = vpop.f32.mrb[1].mxu1 }
 0x2ee   : > { %v6969_v1 = vadd.f32 %v2496_v35, %v2400_v56  ;;  %v4516_v27 = vpop.f32.mrb[2].mxu1 }
 0x2ef   : > { %v6972_v7 = vadd.f32 %v4516_v27, %v2411_v5  ;;  %v2499_v38 = vpop.f32.mrb[3].mxu1 }
 0x2f0   : > { %v6974_v53 = vadd.f32 %v2499_v38, %v2403_v55 }
 0x2f6   : > { %v4319_v52 = vpop.f32.mrb[12].mxu0 }
 0x2f7   : > { %v4320_v3 = vpop.f32.mrb[13].mxu0 }
 0x2f8   : > { %v4321_v4 = vadd.f32 %v4320_v3, %v4319_v52  ;;  %v4322_v16 = vpop.f32.mrb[14].mxu0 }
 0x2f9   : > { %v4323_v30 = vpop.f32.mrb[15].mxu0 }
 0x2fa   : > { %v4324_v51 = vadd.f32 %v4323_v30, %v4322_v16  ;;  %v2424_v12 = vadd.f32 %v4321_v4, %v6962_v19 }
 0x2fc   : > { %v2427_v10 = vadd.f32 %v4324_v51, %v6962_v19 }
 0x308   : > { %v4519_v43 = vpop.f32.mrb[4].mxu1 }
 0x309   : > { %v6978_v28 = vadd.f32 %v4519_v43, %v2424_v12  ;;  %v2512_v0 = vpop.f32.mrb[5].mxu1 }
 0x30a   : > { %v6981_v13 = vadd.f32 %v2512_v0, %v2416_v44  ;;  %v4520_v40 = vpop.f32.mrb[6].mxu1  ;;  %v2604_v44 = vmul.f32 %v6974_v53, %v6974_v53 }
 0x30b   : > { %v6984_v47 = vadd.f32 %v4520_v40, %v2427_v10  ;;  %v2515_v9 = vpop.f32.mrb[7].mxu1  ;;  %v2603_v10 = vmul.f32 %v6969_v1, %v6969_v1  ;;  %v2562_v40 = vsel %vm8687_vm14, %v6974_v53, 0.0  ;;  %vm8696_vm14 = vmmov %vm8695_vm0 }
 0x30c   : > { %v6986_v20 = vadd.f32 %v2515_v9, %v2419_v49  ;;  %v2561_v49 = vsel %vm8688_vm8, %v6969_v1, 0.0  ;;  %v2620_v9 = vsel %vm8689_vm10, %v2604_v44, 0.0  ;;  %vm8697_vm8 = vmmov %vm8695_vm0 }
 0x30d   : > { %vm8698_vm10 = vmmov %vm8695_vm0 }
 0x312   : > { %v4325_v26 = vpop.f32.mrb[16].mxu0 }
 0x313   : > { %v4326_v2 = vpop.f32.mrb[17].mxu0 }
 0x314   : > { %v4327_v17 = vadd.f32 %v4326_v2, %v4325_v26  ;;  %v4328_v15 = vpop.f32.mrb[18].mxu0  ;;  %v2563_v26 = vadd.f32 %v2562_v40, %v2561_v49  ;;  %v2605_v2 = vmul.f32 %v6966_v24, %v6966_v24  ;;  %v2570_v40 = vsel %vm8697_vm8, %v6986_v20, 0.0  ;;  %vm8705_vm8 = vmmov %vm8695_vm0 }
 0x315   : > { %v4329_v37 = vpop.f32.mrb[19].mxu0 }
 0x316   : > { %v4330_v34 = vadd.f32 %v4329_v37, %v4328_v15  ;;  %v2432_v50 = vadd.f32 %v4327_v17, %v6962_v19  ;;  %v2619_v17 = vsel %vm8690_vm2, %v2603_v10, 0.0  ;;  %v2564_v37 = vsel %vm8691_vm12, %v6966_v24, 0.0  ;;  %vm8699_vm2 = vmmov %vm8695_vm0 }
 0x317   : > { %v2621_v15 = vadd.f32 %v2620_v9, %v2619_v17  ;;  %vm8700_vm12 = vmmov %vm8695_vm0 }
 0x318   : > { %v2435_v41 = vadd.f32 %v4330_v34, %v6962_v19  ;;  %v2565_v34 = vadd.f32 %v2564_v37, %v2563_v26 }
 0x324   : > { %v4523_v14 = vpop.f32.mrb[8].mxu1 }
 0x325   : > { %v2528_v56 = vpop.f32.mrb[9].mxu1 }
 0x326   : > { %v6989_v35 = vadd.f32 %v2528_v56, %v2432_v50  ;;  %v4524_v5 = vpop.f32.mrb[10].mxu1  ;;  %v2606_v50 = vmul.f32 %v6972_v7, %v6972_v7  ;;  %v2607_v56 = vmul.f32 %v6981_v13, %v6981_v13 }
 0x327   : > { %v2531_v27 = vpop.f32.mrb[11].mxu1 }
 0x328   : > { %v6992_v55 = vadd.f32 %v2531_v27, %v2435_v41 }
 0x32a   : > { %v2612_v17 = vmul.f32 %v6992_v55, %v6992_v55 }
 0x32e   : > { %v4331_v38 = vpop.f32.mrb[20].mxu0 }
 0x32f   : > { %v4332_v52 = vpop.f32.mrb[21].mxu0 }
 0x330   : > { %v4333_v3 = vadd.f32 %v4332_v52, %v4331_v38  ;;  %v4334_v4 = vpop.f32.mrb[22].mxu0  ;;  %v2566_v38 = vsel %vm8693_vm4, %v6972_v7, 0.0  ;;  %v2568_v52 = vsel %vm8694_vm9, %v6981_v13, 0.0  ;;  %vm8702_vm4 = vmmov %vm8695_vm0 }
 0x331   : > { %v4335_v16 = vpop.f32.mrb[23].mxu0  ;;  %vm8703_vm9 = vmmov %vm8695_vm0 }
 0x332   : > { %v2440_v30 = vadd.f32 %v4333_v3, %v6962_v19  ;;  %v4336_v51 = vadd.f32 %v4335_v16, %v4334_v4  ;;  %v2567_v4 = vadd.f32 %v2566_v38, %v2565_v34  ;;  %v2609_v34 = vmul.f32 %v6978_v28, %v6978_v28 }
 0x334   : > { %v6995_v12 = vadd.f32 %v4523_v14, %v2440_v30  ;;  %v2443_v43 = vadd.f32 %v4336_v51, %v6962_v19  ;;  %v2622_v14 = vsel %vm8692_vm5, %v2605_v2, 0.0  ;;  %v2624_v30 = vsel %vm8695_vm0, %v2606_v50, 0.0  ;;  %vm8701_vm5 = vmmov %vm8695_vm0 }
 0x335   : > { %v2623_v41 = vadd.f32 %v2622_v14, %v2621_v15  ;;  %v2626_v51 = vsel %vm8696_vm14, %v2607_v56, 0.0  ;;  %v2569_v44 = vadd.f32 %v2568_v52, %v2567_v4  ;;  %v2611_v50 = vmul.f32 %v6989_v35, %v6989_v35  ;;  %vm8704_vm14 = vmmov %vm8695_vm0 }
 0x336   : > { %v7000_v0 = vadd.f32 %v4524_v5, %v2443_v43  ;;  %v2608_v43 = vmul.f32 %v6986_v20, %v6986_v20  ;;  %v2613_v38 = vmul.f32 %v6995_v12, %v6995_v12 }
 0x337   : > { %v2625_v10 = vadd.f32 %v2624_v30, %v2623_v41  ;;  %v2571_v14 = vadd.f32 %v2570_v40, %v2569_v44  ;;  %v2583_v41 = vsel %vm8699_vm2, %v6992_v55, 0.0  ;;  %v2572_v30 = vsel %vm8700_vm12, %v6978_v28, 0.0  ;;  %vm8707_vm2 = vmmov %vm8695_vm0 }
 0x338   : > { %v2628_v2 = vsel %vm8698_vm10, %v2608_v43, 0.0  ;;  %v2582_v43 = vsel %vm8701_vm5, %v6989_v35, 0.0  ;;  %v2641_v44 = vsel %vm8702_vm4, %v2612_v17, 0.0  ;;  %v2614_v17 = vmul.f32 %v7000_v0, %v7000_v0  ;;  %vm8706_vm10 = vmmov %vm8695_vm0 }
 0x339   : > { %v2627_v9 = vadd.f32 %v2626_v51, %v2625_v10  ;;  %v2585_v10 = vsel %vm8703_vm9, %v6995_v12, 0.0  ;;  %vm8708_vm12 = vmmov %vm8695_vm0 }
 0x33a   : > { %vm8709_vm5 = vmmov %vm8695_vm0 }
 0x33b   : > { %v2629_v51 = vadd.f32 %v2628_v2, %v2627_v9  ;;  %v2640_v9 = vsel %vm8704_vm14, %v2611_v50, 0.0  ;;  %v2643_v2 = vsel %vm8705_vm8, %v2613_v38, 0.0  ;;  %vm8710_vm4 = vmmov %vm8695_vm0 }
 0x33c   : > { %vm8711_vm9 = vmmov %vm8695_vm0 }
 0x33d   : > { %vm8712_vm14 = vmmov %vm8695_vm0 }
 0x33e   : > { %vm8713_vm8 = vmmov %vm8695_vm0 }
 0x340   : > { %v7019_v5 = vpop.f32.mrb[12].mxu1 }
 0x341   : > { %v2544_v27 = vpop.f32.mrb[13].mxu1 }
 0x342   : > { %v7025_v3 = vpop.f32.mrb[14].mxu1 }
 0x343   : > { %v2547_v16 = vpop.f32.mrb[15].mxu1 }
 0x346   : > { %v4337_v49 = vpop.f32.mrb[24].mxu0 }
 0x347   : > { %v4338_v26 = vpop.f32.mrb[25].mxu0 }
 0x348   : > { %v4339_v15 = vadd.f32 %v4338_v26, %v4337_v49  ;;  %v4340_v37 = vpop.f32.mrb[26].mxu0  ;;  %v2630_v26 = vsel %vm8695_vm0, %v2609_v34, 0.0  ;;  %v2574_v34 = vsel %vm8706_vm10, %v6984_v47, 0.0  ;;  %vm8714_vm10 = vmmov %vm8695_vm0 }
 0x349   : > { %v4341_v56 = vpop.f32.mrb[27].mxu0 }
 0x34a   : > { %v2448_v52 = vadd.f32 %v4339_v15, %v6962_v19  ;;  %v4342_v4 = vadd.f32 %v4341_v56, %v4340_v37  ;;  %v2610_v15 = vmul.f32 %v6984_v47, %v6984_v47  ;;  %v2573_v37 = vadd.f32 %v2572_v30, %v2571_v14 }
 0x34b   : > { %v2584_v56 = vadd.f32 %v2583_v41, %v2582_v43  ;;  %v2645_v30 = vsel %vm8709_vm5, %v2614_v17, 0.0  ;;  %vm8717_vm5 = vcmask 1041409  }
 0x34c   : > { %v7052_v40 = vadd.f32 %v2544_v27, %v2448_v52  ;;  %v2451_v49 = vadd.f32 %v4342_v4, %v6962_v19  ;;  %v2631_v27 = vadd.f32 %v2630_v26, %v2629_v51  ;;  %v2642_v52 = vadd.f32 %v2641_v44, %v2640_v9 }
 0x34d   : > { %v2586_v36 = vadd.f32 %v2585_v10, %v2584_v56  ;;  %v2587_v4 = vsel %vm8707_vm2, %v7000_v0, 0.0  ;;  %v2575_v50 = vadd.f32 %v2574_v34, %v2573_v37  ;;  %v2632_v38 = vsel %vm8708_vm12, %v2610_v15, 0.0  ;;  %vm8715_vm2 = vmmov %vm8695_vm0 }
 0x34e   : > { %v7062_v61 = vadd.f32 %v2547_v16, %v2451_v49  ;;  %v2615_v14 = vmul.f32 %v7052_v40, %v7052_v40  ;;  %v2644_v41 = vadd.f32 %v2643_v2, %v2642_v52  ;;  %v2589_v16 = vsel %vm8710_vm4, %v7052_v40, 0.0  ;;  %vm8716_vm12 = vmmov %vm8695_vm0 }
 0x34f   : > { %v2633_v43 = vadd.f32 %v2632_v38, %v2631_v27  ;;  %v2588_v44 = vadd.f32 %v2587_v4, %v2586_v36  ;;  %v2576_v37 = vrot.slane %v2575_v50, 4  ;;  %vm8718_vm4 = vmmov %vm8717_vm5 }
 0x350   : > { %v2647_v49 = vsel %vm8711_vm9, %v2615_v14, 0.0  ;;  %v2616_v26 = vmul.f32 %v7062_v61, %v7062_v61  ;;  %v2646_v2 = vadd.f32 %v2645_v30, %v2644_v41  ;;  %v2591_v17 = vsel %vm8695_vm0, %v7062_v61, 0.0 }
 0x351   : > { %v2590_v52 = vadd.f32 %v2589_v16, %v2588_v44  ;;  %v2634_v36 = vrot.slane %v2633_v43, 4  ;;  %vm2665_vm9 = vcmask 1048064  }
 0x352   : > { %v4343_v51 = vpop.f32.mrb[28].mxu0  ;;  %v2648_v27 = vadd.f32 %v2647_v49, %v2646_v2  ;;  %v2649_v4 = vsel %vm8712_vm14, %v2616_v26, 0.0  ;;  %vm8722_vm14 = vmmov %vm8718_vm4 }
 0x353   : > { %v4344_v10 = vpop.f32.mrb[29].mxu0 }
 0x354   : > { %v4345_v56 = vadd.f32 %v4344_v10, %v4343_v51  ;;  %v4346_v9 = vpop.f32.mrb[30].mxu0  ;;  %v2592_v51 = vadd.f32 %v2591_v17, %v2590_v52  ;;  %v2577_v10 = vadd.f32 %v2576_v37, %v2575_v50  ;;  %v2650_v44 = vadd.f32 %v2649_v4, %v2648_v27 }
 0x355   : > { %v4347_v15 = vpop.f32.mrb[31].mxu0 }
 0x356   : > { %v2456_v34 = vadd.f32 %v4345_v56, %v6962_v19  ;;  %v4348_v23 = vadd.f32 %v4347_v15, %v4346_v9  ;;  %v2635_v56 = vadd.f32 %v2634_v36, %v2633_v43  ;;  %v2578_v9 = vrot.slane %v2577_v10, 2 }
 0x358   : > { %v7082_v14 = vadd.f32 %v7019_v5, %v2456_v34  ;;  %v2459_v38 = vadd.f32 %v4348_v23, %v6962_v19  ;;  %v2579_v15 = vadd.f32 %v2578_v9, %v2577_v10 }
 0x35a   : > { %v2593_v41 = vsel %vm8713_vm8, %v7082_v14, 0.0  ;;  %v2617_v30 = vmul.f32 %v7082_v14, %v7082_v14  ;;  %v7090_v16 = vadd.f32 %v7025_v3, %v2459_v38  ;;  %v2636_v3 = vrot.slane %v2635_v56, 2 }
 0x35b   : > { %v2594_v49 = vadd.f32 %v2593_v41, %v2592_v51  ;;  %v2580_v4 = vrot.slane %v2579_v15, 1 }
 0x35c   : > { %v2651_v26 = vsel %vm8714_vm10, %v2617_v30, 0.0  ;;  %v2595_v5 = vsel %vm8715_vm2, %v7090_v16, 0.0  ;;  %v2618_v23 = vmul.f32 %v7090_v16, %v7090_v16  ;;  %v2637_v27 = vadd.f32 %v2636_v3, %v2635_v56 }
 0x35d   : > { %v2652_v19 = vadd.f32 %v2651_v26, %v2650_v44  ;;  %v2596_v50 = vadd.f32 %v2595_v5, %v2594_v49  ;;  %v2581_v44 = vadd.f32 %v2580_v4, %v2579_v15  ;;  %v4756_v15 = vld [vmem:[%s8022_s8 + $0x40] sm:$0xff]   ;;  %v4760_v4 = vld [vmem:[%s8022_s8 + $0x50] sm:$0xff]  }
 0x35e   : > { %v2653_v37 = vsel %vm8716_vm12, %v2618_v23, 0.0  ;;  %v2638_v30 = vrot.slane %v2637_v27, 1  ;;  %4359 = vmatprep.subr.bf16.mxu1 %v4756_v15 }
 0x35f   : > { %v2597_v2 = vrot.slane %v2596_v50, 4  ;;  %v2654_v52 = vadd.f32 %v2653_v37, %v2652_v19 }
 0x360   : > { %v2639_v23 = vadd.f32 %v2638_v30, %v2637_v27  ;;  %v4761_v30 = vld [vmem:[%s8022_s8 + $0x10] sm:$0xff]  }
 0x361   : > { %v2598_v17 = vadd.f32 %v2597_v2, %v2596_v50  ;;  %v2655_v34 = vrot.slane %v2654_v52, 4 }
 0x363   : > { %v2599_v43 = vrot.slane %v2598_v17, 2  ;;  %v2656_v36 = vadd.f32 %v2655_v34, %v2654_v52  ;;  %v4758_v34 = vld [vmem:[%s8022_s8 + $0x48] sm:$0xff]  }
 0x365   : > { %v2600_v38 = vadd.f32 %v2599_v43, %v2598_v17  ;;  %v2657_v51 = vrot.slane %v2656_v36, 2  ;;  %v4757_v17 = vld [vmem:[%s8022_s8] sm:$0xff]   ;;  %v8719_v43 = vlaneseq }
 0x366   : > { %4360 = vmatpush3.bf16.msra.mxu1 %v4757_v17 }
 0x367   : > { %v2601_v41 = vrot.slane %v2600_v38, 1  ;;  %v2658_v62 = vadd.f32 %v2657_v51, %v2656_v36  ;;  %v2673_v27 = vand.u32 127, %v8719_v43  ;;  %v4759_v36 = vld [vmem:[%s8022_s8 + $0x8] sm:$0xff]   ;;  %4361 = vmatprep.subr.bf16.mxu1 %v4758_v34  ;;  %v4771_v51 = vld [vmem:[%s8022_s8 + $0x80] sm:$0xff]  }
 0x368   : > { %v4766_v43 = vld [vmem:[%s8022_s8 + $0x68] sm:$0xff]  }
 0x369   : > { %v2602_v49 = vadd.f32 %v2601_v41, %v2600_v38  ;;  %v2659_v26 = vrot.slane %v2658_v62, 1  ;;  %v4770_v38 = vld [vmem:[%s8022_s8 + $0xc0] sm:$0xff]   ;;  %v2678_v41 = vand.u32 1, %v2673_v27 }
 0x36a   : > { %4423 = vmatprep.subr.bf16.mxu0 %v4770_v38  ;;  %4362 = vmatpush3.bf16.msra.mxu1 %v4759_v36  ;;  %v4767_v38 = vld [vmem:[%s8022_s8 + $0x28] sm:$0xff]  }
 0x36b   : > { %v2663_v5 = vsel %vm8717_vm5, %v2602_v49, %v2581_v44  ;;  %v7099_v19 = vadd.f32 %v2659_v26, %v2658_v62  ;;  %4424 = vmatpush3.bf16.msra.mxu0 %v4771_v51  ;;  %4363 = vmatprep.subr.bf16.mxu1 %v4760_v4  ;;  %v4762_v26 = vld [vmem:[%s8022_s8 + $0x58] sm:$0xff]   ;;  %vm7135_vm0 = vcmp.eq.s32.totalorder %v2678_v41, 0 }
 0x36c   : > { %2666 = vrot.lane.b32.xlu0 %v2663_v5, %s8222_s29 }
 0x36d   : > { %v2703_v10 = vsel %vm8718_vm4, %v7099_v19, %v2639_v23 }
 0x36e   : > { %2705 = vrot.lane.b32.xlu1 %v2703_v10, %s8222_s29  ;;  %4364 = vmatpush3.bf16.msra.mxu1 %v4761_v30  ;;  %v4768_v30 = vld [vmem:[%s8022_s8 + $0x70] sm:$0xff]  }
 0x36f   : > { %4365 = vmatprep.subr.bf16.mxu1 %v4762_v26 }
 0x3de   : > { %v2667_v56 = vpop.permute.xlu0 %2666 }
 0x3df   : > { %v2668_v50 = vsel %vm2665_vm9, %v2667_v56, %v2663_v5 }
 0x3e0   : > { %v2706_v9 = vpop.permute.xlu1 %2705  ;;  %2669 = vrot.lane.b32.xlu0 %v2668_v50, %s8222_s29 }
 0x3e1   : > { %v2707_v37 = vsel %vm2665_vm9, %v2706_v9, %v2703_v10  ;;  %v4764_v9 = vld [vmem:[%s8022_s8 + $0x60] sm:$0xff]  }
 0x3e2   : > { %2708 = vrot.lane.b32.xlu1 %v2707_v37, %s8222_s29 }
 0x452   : > { %v2670_v2 = vpop.permute.xlu0 %2669 }
 0x453   : > { %v2671_v52 = vsel %vm2665_vm9, %v2670_v2, %v2663_v5 }
 0x454   : > { %v2709_v62 = vpop.permute.xlu1 %2708  ;;  %2691 = vrot.lane.b32.xlu1 %v2671_v52, %s4900_s17  ;;  %2688 = vrot.lane.b32.xlu0 %v2671_v52, %s4901_s18 }
 0x455   : > { %v2710_v3 = vsel %vm2665_vm9, %v2709_v62, %v2703_v10  ;;  %v4763_v10 = vld [vmem:[%s8022_s8 + $0x18] sm:$0xff]   ;;  %v4765_v62 = vld [vmem:[%s8022_s8 + $0x20] sm:$0xff]   ;;  %vm8744_vm9 = vnez %v8493_v31  ;;  %v8747_v31 = vld [vmem:[#allocation66_spill] sm:$0xff] }
 0x456   : > { %4366 = vmatpush3.bf16.msra.mxu1 %v4763_v10 }
 0x457   : > { %4367 = vmatprep.subr.bf16.mxu1 %v4764_v9 }
 0x458   : > { %2715 = vrot.lane.b32.xlu1 %v2710_v3, %s4900_s17  ;;  %2712 = vrot.lane.b32.xlu0 %v2710_v3, %s4901_s18  ;;  %s4284_s18 = sshll.u32 %s4991_s25, 11  ;;  %s7973_s25 = scalar_lea.sflag [#allocation3], %s405_s20 }
 0x45a   : > { %4368 = vmatpush3.bf16.msra.mxu1 %v4765_v62 }
 0x45b   : > { %4369 = vmatprep.subr.bf16.mxu1 %v4766_v43  ;;  %v4222_v43 = vld [vmem:[%s8021_s7] ss:$0 sm:$0xff] }
 0x45e   : > { %4370 = vmatpush3.bf16.msra.mxu1 %v4767_v38 }
 0x45f   : > { %4371 = vmatprep.subr.bf16.mxu1 %v4768_v30 }
 0x4c6   : > { %v2692_v56 = vpop.permute.xlu1 %2691  ;;  %v2689_v50 = vpop.permute.xlu0 %2688 }
 0x4c7   : > { %v2694_v37 = vsel %vm7135_vm0, %v2689_v50, %v2692_v56 }
 0x4c8   : > { %v2696_v2 = vrot.slane %v2694_v37, 1  ;;  %v2699_v52 = vadd.f32 %v2694_v37, %v2581_v44 }
 0x4ca   : > { %v2700_v3 = vadd.f32 %v2696_v2, %v2602_v49  ;;  %v2726_v15 = vmul.f32 0.0078125, %v2699_v52  ;;  %v2716_v17 = vpop.permute.xlu1 %2715  ;;  %v2713_v34 = vpop.permute.xlu0 %2712  ;;  %v4221_v52 = vld [vmem:[%s8020_s6] ss:$0 sm:$0xff] }
 0x4cb   : > { %v2718_v27 = vsel %vm7135_vm0, %v2713_v34, %v2716_v17 }
 0x4cc   : > { %v2727_v36 = vmul.f32 0.0078125, %v2700_v3  ;;  %v2720_v4 = vrot.slane %v2718_v27, 1  ;;  %v2723_v44 = vadd.f32 %v2718_v27, %v2639_v23  ;;  %v2730_v49 = vmul.f32 %v2726_v15, %v2726_v15  ;;  %v4769_v23 = vld [vmem:[%s8022_s8 + $0x30] sm:$0xff]  }
 0x4cd   : > { %4372 = vmatpush3.bf16.msra.mxu1 %v4769_v23 }
 0x4ce   : > { %v2724_v51 = vadd.f32 %v2720_v4, %v7099_v19  ;;  %v2728_v41 = vmul.f32 0.0078125, %v2723_v44  ;;  %v2731_v26 = vmul.f32 %v2727_v36, %v2727_v36 }
 0x4d0   : > { %v2729_v5 = vmul.f32 0.0078125, %v2724_v51  ;;  %v2732_v10 = vsub.f32 %v2728_v41, %v2730_v49  ;;  %v8723_v49 = vld [vmem:[#allocation15_spill] sm:$0xff]  ;;  %v8724_v41 = vld [vmem:[#allocation16_spill] sm:$0xff] }
 0x4d2   : > { %v2733_v56 = vsub.f32 %v2729_v5, %v2731_v26  ;;  %v2734_v50 = vmax.f32 %v2732_v10, 0.0 }
 0x4d4   : > { %v2735_v9 = vmax.f32 %v2733_v56, 0.0  ;;  %v2736_v37 = vadd.f32 1e-06, %v2734_v50 }
 0x4d6   : > { %v2737_v19 = vadd.f32 1e-06, %v2735_v9  ;;  %4798 = vrsqrt.f32 %v2736_v37 }
 0x4d8   : > { %4800 = vrsqrt.f32 %v2737_v19 }
 0x4e0   : > { %v4799_v2 = vpop.eup %4798 }
 0x4e1   : > { %v2746_v3 = vmul.f32 %v4799_v2, %v4221_v52 }
 0x4e2   : > { %v4801_v62 = vpop.eup %4800 }
 0x4e3   : > { %v2747_v17 = vmul.f32 %v4801_v62, %v4221_v52  ;;  %v2748_v27 = vmul.f32 %v2746_v3, %v2726_v15  ;;  %v2765_v51 = vrot.slane %v2746_v3, %v8723_v49  ;;  %v4773_v15 = vld [vmem:[%s8022_s8 + $0x38] sm:$0xff]  }
 0x4e5   : > { %v2749_v34 = vmul.f32 %v2747_v17, %v2727_v36  ;;  %v7175_v26 = vrot.slane %v2747_v17, %v8723_v49  ;;  %v4772_v36 = vld [vmem:[%s8022_s8 + $0x78] sm:$0xff]   ;;  %v2770_v23 = vmul.f32 %v2765_v51, %v6969_v1  ;;  %v2771_v56 = vmul.f32 %v2765_v51, %v6974_v53 }
 0x4e6   : > { %v2772_v37 = vmul.f32 %v2765_v51, %v6966_v24  ;;  %v2773_v19 = vmul.f32 %v2765_v51, %v6972_v7  ;;  %4373 = vmatprep.subr.bf16.mxu1 %v4772_v36  ;;  %v2774_v52 = vmul.f32 %v2765_v51, %v6981_v13  ;;  %v2775_v62 = vmul.f32 %v2765_v51, %v6986_v20  ;;  %v7201_v24 = vld [vmem:[%s8022_s8 + $0x100] sm:$0xff]  }
 0x4e7   : > { %v2758_v4 = vrot.slane %v2749_v34, 7  ;;  %v2785_v2 = vmul.f32 %v7175_v26, %v7090_v16  ;;  %v2776_v1 = vmul.f32 %v2765_v51, %v6978_v28  ;;  %4374 = vmatpush3.bf16.msra.mxu1 %v4773_v15  ;;  %8725 = vst [vmem:[#allocation59_spill] sm:$0xff] %v7201_v24  ;;  %v2777_v15 = vmul.f32 %v2765_v51, %v6984_v47 }
 0x4e8   : > { %4529 = vmatprep.subr.bf16.mxu1 %v7201_v24  ;;  %v2784_v18 = vmul.f32 %v7175_v26, %v7082_v14 }
 0x4e9   : > { %v2759_v44 = vsel %vm8722_vm14, %v2758_v4, %v2748_v27 }
 0x4ea   : > { %v2761_v38 = vsub.f32 %v4222_v43, %v2759_v44  ;;  %v4775_v44 = vld [vmem:[%s8022_s8 + $0xc8] sm:$0xff]  }
 0x4eb   : > { %4425 = vmatprep.subr.bf16.mxu0 %v4775_v44  ;;  %v4777_v44 = vld [vmem:[%s8022_s8 + $0xd0] sm:$0xff]  }
 0x4ec   : > { %v2793_v30 = vrot.slane %v2761_v38, %v8724_v41  ;;  %v4776_v38 = vld [vmem:[%s8022_s8 + $0x88] sm:$0xff]  }
 0x4ed   : > { %4426 = vmatpush3.bf16.msra.mxu0 %v4776_v38  ;;  %v4778_v38 = vld [vmem:[%s8022_s8 + $0x90] sm:$0xff]  }
 0x4ee   : > { %v2794_v5 = vcombine.high %v2793_v30, %v2793_v30  ;;  %v2801_v10 = vrot.slane %v2793_v30, %v8724_v41  ;;  %4427 = vmatprep.subr.bf16.mxu0 %v4777_v44 }
 0x4f0   : > { %v2808_v50 = vrot.slane %v2794_v5, %v8724_v41  ;;  %v2812_v9 = vrot.slane %v2801_v10, %v8723_v49 }
 0x4f1   : > { %4428 = vmatpush3.bf16.msra.mxu0 %v4778_v38 }
 0x4f2   : > { %v7196_v53 = vrot.slane %v2808_v50, %v8723_v49  ;;  %v2819_v3 = vadd.f32 %v2812_v9, %v2770_v23  ;;  %v2820_v17 = vadd.f32 %v2812_v9, %v2771_v56  ;;  %v2821_v34 = vadd.f32 %v2812_v9, %v2772_v37 }
 0x4f3   : > { %v2822_v7 = vadd.f32 %v2812_v9, %v2773_v19  ;;  %v2823_v16 = vadd.f32 %v2812_v9, %v2774_v52  ;;  %v2824_v43 = vadd.f32 %v2812_v9, %v2775_v62  ;;  %v2825_v13 = vadd.f32 %v2812_v9, %v2776_v1  ;;  %v8726_v52 = vld [vmem:[#allocation14_spill] sm:$0xff] }
 0x4f4   : > { %v2834_v20 = vadd.f32 %v7196_v53, %v2785_v2  ;;  %v7204_v27 = vmax.f32 %v2819_v3, 0.0  ;;  %v7206_v28 = vmax.f32 %v2820_v17, 0.0  ;;  %v7208_v4 = vmax.f32 %v2821_v34, 0.0 }
 0x4f5   : > { %v7217_v49 = vmax.f32 %v2822_v7, 0.0  ;;  %v7219_v41 = vmax.f32 %v2823_v16, 0.0  ;;  %v7221_v30 = vmax.f32 %v2824_v43, 0.0  ;;  %v2778_v50 = vmul.f32 %v7175_v26, %v6989_v35 }
 0x4f6   : > { %v7223_v5 = vmax.f32 %v2834_v20, 0.0  ;;  %v2852_v10 = vrot.slane %v7204_v27, 7  ;;  %v2853_v36 = vrot.slane %v7206_v28, 7  ;;  %v2854_v23 = vrot.slane %v7208_v4, 7 }
 0x4f7   : > { %v2855_v56 = vrot.slane %v7217_v49, 7  ;;  %v2779_v37 = vmul.f32 %v7175_v26, %v6992_v55  ;;  %v2856_v47 = vrot.slane %v7219_v41, 7  ;;  %v7240_v51 = vmax.f32 %v2825_v13, 0.0 }
 0x4f8   : > { %v7236_v19 = vpack.c.bf16 %v7204_v27, %v7223_v5  ;;  %v8224_v2 = vrot.slane %v7223_v5, 7  ;;  %vm8727_vm8 = vcmp.lt.s32.totalorder %v8726_v52, 1  ;;  %v2857_v55 = vrot.slane %v7221_v30, 7 }
 0x4f9   : > { %v7244_v62 = vsel %vm8727_vm8, %v2854_v23, %v2855_v56  ;;  %vm8728_vm10 = vmmov %vm8727_vm8  ;;  %v2780_v1 = vmul.f32 %v7175_v26, %v6995_v12  ;;  %v7268_v16 = vpack.c.bf16 %v7208_v4, %v7206_v28  ;;  %v2826_v43 = vadd.f32 %v2812_v9, %v2777_v15 }
 0x4fa   : > { %v7248_v35 = vsel %vm8728_vm10, %v2853_v36, %v2854_v23  ;;  %v2908_v17 = vsel %vm6125_vm11, %v7236_v19, 0  ;;  %vm8730_vm2 = vmmov %vm8727_vm8  ;;  %v2781_v13 = vmul.f32 %v7175_v26, %v7000_v0  ;;  %v2782_v20 = vmul.f32 %v7175_v26, %v7052_v40 }
 0x4fb   : > { %v7258_v34 = vsel %vm8730_vm2, %v2852_v10, %v2853_v36  ;;  %vm8731_vm12 = vmmov %vm8730_vm2  ;;  %3036 = vrot.lane.b32.xlu1 %v2908_v17, %s8732_s0  ;;  %v2858_v0 = vrot.slane %v7240_v51, 7  ;;  %v2827_v36 = vadd.f32 %v7196_v53, %v2778_v50  ;;  %v7297_v3 = vmax.f32 %v2826_v43, 0.0 }
 0x4fc   : > { %v7264_v7 = vsel %vm8731_vm12, %v8224_v2, %v2852_v10  ;;  %v2965_v10 = vpack.c.bf16 %v7244_v62, %v7248_v35  ;;  %vm8733_vm11 = vmmov %vm8730_vm2  ;;  %v2828_v17 = vadd.f32 %v7196_v53, %v2779_v37  ;;  %v2909_v40 = vsel %vm5634_vm13, %v7268_v16, 0  ;;  %v4780_v37 = vld [vmem:[%s8022_s8 + $0x98] sm:$0xff]  }
 0x4fd   : > { %v2964_v12 = vpack.c.bf16 %v7258_v34, %v7264_v7  ;;  %v7287_v9 = vsel %vm8733_vm11, %v2855_v56, %v2856_v47  ;;  %vm8735_vm5 = vmmov %vm8730_vm2  ;;  %v4779_v56 = vld [vmem:[%s8022_s8 + $0xd8] sm:$0xff]   ;;  %v2829_v43 = vadd.f32 %v7196_v53, %v2780_v1  ;;  %v2859_v44 = vrot.slane %v7297_v3, 7 }
 0x4fe   : > { %v7295_v23 = vsel %vm8735_vm5, %v2856_v47, %v2857_v55  ;;  %v7311_v47 = vmax.f32 %v2827_v36, 0.0  ;;  %v2830_v50 = vadd.f32 %v7196_v53, %v2781_v13  ;;  %v2783_v2 = vmul.f32 %v7175_v26, %v7062_v61  ;;  %4429 = vmatprep.subr.bf16.mxu0 %v4779_v56  ;;  %vm8738_vm13 = vmmov %vm8730_vm2 }
 0x4ff   : > { %v2972_v15 = vsel %vm6228_vm1, %v2964_v12, 0  ;;  %v7309_v12 = vpack.c.bf16 %v7219_v41, %v7217_v49  ;;  %3038 = vrot.lane.b32.xlu1 %v2909_v40, %s8732_s0  ;;  %v2973_v1 = vsel %vm5794_vm3, %v2965_v10, 0  ;;  %v2966_v38 = vpack.c.bf16 %v7295_v23, %v7287_v9  ;;  %vm8739_vm1 = vmmov %vm8730_vm2  ;;  %v8740_v10 = vld [vmem:[#allocation73_spill] sm:$0xff]  ;;  %4430 = vmatpush3.bf16.msra.mxu0 %v4780_v37 }
 0x500   : > { %3060 = vrot.lane.b32.xlu0 %v2972_v15, %s8732_s0  ;;  %v7319_v15 = vmax.f32 %v2828_v17, 0.0  ;;  %v7330_v29 = vsel %vm8738_vm13, %v2857_v55, %v2858_v0  ;;  %v2831_v40 = vadd.f32 %v7196_v53, %v2782_v20  ;;  %v7335_v17 = vsel %vm8739_vm1, %v2858_v0, %v2859_v44  ;;  %v4783_v37 = vld [vmem:[%s8022_s8 + $0xa0] sm:$0xff]   ;;  %vm8745_vm0 = vmmov %vm8739_vm1 }
 0x501   : > { %v7337_v13 = vmax.f32 %v2829_v43, 0.0  ;;  %v7339_v61 = vmax.f32 %v2830_v50, 0.0  ;;  %v2832_v56 = vadd.f32 %v7196_v53, %v2783_v2  ;;  %vm8741_vm3 = vnez %v8740_v10  ;;  %v4782_v2 = vld [vmem:[%s8022_s8 + $0xe0] sm:$0xff]   ;;  %vm8746_vm14 = vmmov %vm8745_vm0 }
 0x502   : > { %v2910_v36 = vsel %vm8741_vm3, %v7309_v12, 0  ;;  %v7348_v55 = vpack.c.bf16 %v7240_v51, %v7221_v30  ;;  %v2860_v20 = vrot.slane %v7311_v47, 7  ;;  %v2861_v0 = vrot.slane %v7319_v15, 7  ;;  %v8742_v43 = vld [vmem:[#allocation77_spill] sm:$0xff]  ;;  %4431 = vmatprep.subr.bf16.mxu0 %v4782_v2  ;;  %v4785_v2 = vld [vmem:[%s8022_s8 + $0xa8] sm:$0xff]   ;;  %vm8750_vm2 = vmmov %vm8745_vm0 }
 0x503   : > { %3040 = vrot.lane.b32.xlu1 %v2910_v36, %s8732_s0  ;;  %vm8743_vm4 = vnez %v8742_v43  ;;  %v7362_v10 = vpack.c.bf16 %v7311_v47, %v7297_v3  ;;  %v2862_v36 = vrot.slane %v7337_v13, 7  ;;  %v2863_v48 = vrot.slane %v7339_v61, 7  ;;  %4432 = vmatpush3.bf16.msra.mxu0 %v4783_v37  ;;  %vm8751_vm12 = vmmov %vm8745_vm0 }
 0x504   : > { %3062 = vrot.lane.b32.xlu0 %v2973_v1, %s8732_s0  ;;  %v2974_v50 = vsel %vm8743_vm4, %v2966_v38, 0  ;;  %v2967_v1 = vpack.c.bf16 %v7335_v17, %v7330_v29  ;;  %v7371_v43 = vmax.f32 %v2831_v40, 0.0  ;;  %v7373_v38 = vmax.f32 %v2832_v56, 0.0  ;;  %4433 = vmatprep.subr.bf16.mxu0 %v4784_v32  ;;  %vm8754_vm13 = vmmov %vm8745_vm0 }
 0x505   : > { %v2911_v14 = vsel %vm8744_vm9, %v7348_v55, 0  ;;  %v7384_v26 = vsel %vm8745_vm0, %v2860_v20, %v2861_v0  ;;  %v7388_v40 = vsel %vm8746_vm14, %v2859_v44, %v2860_v20  ;;  %v2833_v56 = vadd.f32 %v7196_v53, %v2784_v18  ;;  %vm8755_vm1 = vmmov %vm8745_vm0 }
 0x506   : > { %vm8748_vm8 = vnez %v8747_v31  ;;  %vm8749_vm10 = vnez %v8521_v58  ;;  %v7402_v44 = vpack.c.bf16 %v7337_v13, %v7319_v15  ;;  %v2968_v53 = vpack.c.bf16 %v7384_v26, %v7388_v40  ;;  %vm8761_vm9 = vmmov %vm8745_vm0 }
 0x507   : > { %3042 = vrot.lane.b32.xlu1 %v2911_v14, %s8732_s0  ;;  %v2912_v46 = vsel %vm8749_vm10, %v7362_v10, 0  ;;  %v7404_v18 = vmax.f32 %v2833_v56, 0.0  ;;  %v7410_v20 = vsel %vm8750_vm2, %v2862_v36, %v2863_v48  ;;  %v2864_v32 = vrot.slane %v7371_v43, 7  ;;  %4434 = vmatpush3.bf16.msra.mxu0 %v4785_v2  ;;  %v4787_v2 = vld [vmem:[%s8022_s8 + $0xb0] sm:$0xff]  }
 0x508   : > { %3064 = vrot.lane.b32.xlu0 %v2974_v50, %s8732_s0  ;;  %v2975_v50 = vsel %vm8748_vm8, %v2967_v1, 0  ;;  %v2865_v1 = vrot.slane %v7373_v38, 7  ;;  %v7417_v58 = vsel %vm8751_vm12, %v2861_v0, %v2862_v36  ;;  %v2917_v14 = vrot.slane %v7206_v28, 1  ;;  %4435 = vmatprep.subr.bf16.mxu0 %v4786_v57  ;;  %v4788_v57 = vld [vmem:[%s8022_s8 + $0xf8] sm:$0xff]  }
 0x509   : > { %v2918_v56 = vrot.slane %v7208_v4, 1  ;;  %v2866_v31 = vrot.slane %v7404_v18, 7  ;;  %vm8752_vm11 = vnez %v8538_v59  ;;  %v7432_v36 = vpack.c.bf16 %v7371_v43, %v7339_v61 }
 0x50a   : > { %v2913_v0 = vsel %vm8752_vm11, %v7402_v44, 0  ;;  %vm8753_vm5 = vnez %v8531_v8  ;;  %v7443_v37 = vsel %vm8754_vm13, %v2864_v32, %v2865_v1  ;;  %v7447_v59 = vsel %vm8755_vm1, %v2863_v48, %v2864_v32  ;;  %v4789_v48 = vld [vmem:[%s8022_s8 + $0xb8] sm:$0xff]  }
 0x50b   : > { %3044 = vrot.lane.b32.xlu1 %v2912_v46, %s8732_s0  ;;  %v2976_v46 = vsel %vm8753_vm5, %v2968_v53, 0  ;;  %vm8756_vm3 = vcmp.lt.s32.totalorder %v8726_v52, 7  ;;  %v8757_v8 = vrot.slane %v7204_v27, 1  ;;  %v2919_v33 = vrot.slane %v7217_v49, 1  ;;  %4436 = vmatpush3.bf16.msra.mxu0 %v4787_v2  ;;  %v8810_v52 = vld [vmem:[#allocation61_spill] sm:$0xff] }
 0x50c   : > { %3066 = vrot.lane.b32.xlu0 %v2975_v50, %s8732_s0  ;;  %v2969_v50 = vpack.c.bf16 %v7410_v20, %v7417_v58  ;;  %v2945_v42 = vsel %vm8756_vm3, %v2917_v14, %v2918_v56  ;;  %vm8758_vm4 = vmmov %vm8756_vm3  ;;  %v2920_v45 = vrot.slane %v7219_v41, 1  ;;  %v8760_v32 = vrot.slane %v7223_v5, 7  ;;  %4437 = vmatprep.subr.bf16.mxu0 %v4788_v57 }
 0x50d   : > { %v7456_v53 = vsel %vm8758_vm4, %v8757_v8, %v2917_v14  ;;  %v2970_v2 = vpack.c.bf16 %v7443_v37, %v7447_v59  ;;  %v8762_v8 = vld [vmem:[#allocation25_spill] sm:$0xff]  ;;  %v7481_v22 = vpack.c.bf16 %v7404_v18, %v7373_v38  ;;  %v2921_v60 = vrot.slane %v7221_v30, 1  ;;  %vm8765_vm10 = vmmov %vm8756_vm3 }
 0x50e   : > { %8759 = vst [vmem:[#allocation13_spill] sm:$0xff] %v7456_v53  ;;  %v2868_v14 = vsel %vm8761_vm9, %v2866_v31, %v8760_v32  ;;  %vm8763_vm14 = vnez %v8762_v8  ;;  %vm8764_vm8 = vnez %v8564_v21  ;;  %v2943_v57 = vsel %vm8765_vm10, %v2919_v33, %v2920_v45  ;;  %vm8766_vm2 = vmmov %vm8756_vm3 }
 0x50f   : > { %3046 = vrot.lane.b32.xlu1 %v2913_v0, %s8732_s0  ;;  %v2977_v63 = vsel %vm8763_vm14, %v2969_v50, 0  ;;  %v2988_v0 = vpack.c.bf16 %v2945_v42, %v7456_v53  ;;  %v2944_v50 = vsel %vm8766_vm2, %v2918_v56, %v2919_v33  ;;  %4438 = vmatpush3.bf16.msra.mxu0 %v4789_v48  ;;  %v2922_v32 = vrot.slane %v7240_v51, 1  ;;  %vm8770_vm5 = vmmov %vm8766_vm2 }
 0x510   : > { %3068 = vrot.lane.b32.xlu0 %v2976_v46, %s8732_s0  ;;  %v7473_v46 = vsel %vm8745_vm0, %v2865_v1, %v2866_v31  ;;  %v2914_v1 = vsel %vm8764_vm8, %v7432_v36, 0  ;;  %v2923_v8 = vrot.slane %v7297_v3, 1  ;;  %v2978_v21 = vsel %vm6706_vm6, %v2970_v2, 0  ;;  %vm8772_vm6 = vmmov %vm8766_vm2 }
 0x511   : > { %v2971_v31 = vpack.c.bf16 %v2868_v14, %v7473_v46  ;;  %v2925_v39 = vrot.slane %v7319_v15, 1  ;;  %vm8767_vm12 = vnez %v8585_v6  ;;  %vm8769_vm11 = vnez %v8768_v25  ;;  %vm8773_vm1 = vmmov %vm8766_vm2 }
 0x512   : > { %v2915_v24 = vsel %vm8767_vm12, %v7481_v22, 0  ;;  %v2996_v33 = vsel %vm8769_vm11, %v2988_v0, 0  ;;  %v2989_v56 = vpack.c.bf16 %v2943_v57, %v2944_v50  ;;  %v2942_v48 = vsel %vm8770_vm5, %v2920_v45, %v2921_v60  ;;  %vm8774_vm3 = vmmov %vm8773_vm1 }
 0x513   : > { %3048 = vrot.lane.b32.xlu1 %v2914_v1, %s8732_s0  ;;  %vm8771_vm13 = vnez %v8594_v54  ;;  %v2926_v11 = vrot.slane %v7337_v13, 1  ;;  %v2927_v2 = vrot.slane %v7339_v61, 1  ;;  %v7514_v53 = vpack.c.bf16 %v7264_v7, %v2868_v14  ;;  %vm8775_vm4 = vmmov %vm8773_vm1 }
 0x514   : > { %3070 = vrot.lane.b32.xlu0 %v2977_v63, %s8732_s0  ;;  %v2924_v63 = vrot.slane %v7311_v47, 1  ;;  %v2979_v1 = vsel %vm8771_vm13, %v2971_v31, 0  ;;  %v2941_v25 = vsel %vm8772_vm6, %v2921_v60, %v2922_v32  ;;  %v2940_v45 = vsel %vm8774_vm3, %v2922_v32, %v2923_v8  ;;  %vm8776_vm9 = vmmov %vm8773_vm1 }
 0x515   : > { %v7523_v54 = vpack.c.bf16 %v2944_v50, %v2945_v42  ;;  %v2928_v31 = vrot.slane %v7371_v43, 1  ;;  %v2929_v7 = vrot.slane %v7373_v38, 1  ;;  %v2931_v14 = vrot.slane %v7223_v5, 1  ;;  %vm8777_vm0 = vmmov %vm8773_vm1 }
 0x516   : > { %v2939_v6 = vsel %vm8773_vm1, %v2923_v8, %v2924_v63  ;;  %v2938_v0 = vsel %vm8775_vm4, %v2924_v63, %v2925_v39  ;;  %v7533_v60 = vpack.c.bf16 %v7248_v35, %v7258_v34  ;;  %v7539_v42 = vpack.c.bf16 %v7287_v9, %v7244_v62  ;;  %v8778_v34 = vld [vmem:[#allocation47_spill] sm:$0xff]  ;;  %vm8780_vm8 = vmmov %vm8777_vm0 }
 0x517   : > { %3050 = vrot.lane.b32.xlu1 %v2915_v24, %s8732_s0  ;;  %v2930_v24 = vrot.slane %v7404_v18, 1  ;;  %v2937_v50 = vsel %vm8776_vm9, %v2925_v39, %v2926_v11  ;;  %v2936_v32 = vsel %vm8777_vm0, %v2926_v11, %v2927_v2  ;;  %v7546_v8 = vpack.c.bf16 %v2940_v45, %v2941_v25  ;;  %vm8781_vm10 = vmmov %vm8777_vm0 }
 0x518   : > { %3072 = vrot.lane.b32.xlu0 %v2978_v21, %s8732_s0  ;;  %v7535_v21 = vpack.c.bf16 %v2942_v48, %v2943_v57  ;;  %v7550_v35 = vpack.c.bf16 %v7330_v29, %v7295_v23  ;;  %vm8779_vm14 = vnez %v8778_v34  ;;  %v2935_v9 = vsel %vm8780_vm8, %v2927_v2, %v2928_v31  ;;  %vm8782_vm2 = vmmov %vm8777_vm0 }
 0x519   : > { %v3012_v62 = vsel %vm8779_vm14, %v7268_v16, 0  ;;  %v2934_v39 = vsel %vm8781_vm10, %v2928_v31, %v2929_v7  ;;  %v7560_v57 = vpack.c.bf16 %v2938_v0, %v2939_v6  ;;  %v2980_v63 = vpack.c.bf16 %v7206_v28, %v7204_v27  ;;  %vm8783_vm12 = vmmov %vm8777_vm0 }
 0x51a   : > { %v2933_v29 = vsel %vm8782_vm2, %v2929_v7, %v2930_v24  ;;  %v2932_v23 = vsel %vm8783_vm12, %v2930_v24, %v2931_v14  ;;  %v7570_v16 = vpack.c.bf16 %v7388_v40, %v7335_v17  ;;  %v2990_v2 = vpack.c.bf16 %v2941_v25, %v2942_v48  ;;  %v8786_v48 = vld [vmem:[#allocation52_spill] sm:$0xff]  ;;  %vm8803_vm14 = vmmov %vm8782_vm2 }
 0x51b   : > { %3084 = vrot.lane.b32.xlu1 %v2996_v33, %s8732_s0  ;;  %v7572_v33 = vpack.c.bf16 %v2936_v32, %v2937_v50  ;;  %v7579_v31 = vpack.c.bf16 %v7417_v58, %v7384_v26  ;;  %v2981_v7 = vpack.c.bf16 %v7217_v49, %v7208_v4  ;;  %v7584_v24 = vpack.c.bf16 %v2934_v39, %v2935_v9  ;;  %v4811_v49 = vld [vmem:[%s5082_s28 + $0x18] sm:$0xff] }
 0x51c   : > { %3074 = vrot.lane.b32.xlu0 %v2979_v1, %s8732_s0  ;;  %v8784_v1 = vld [vmem:[#allocation29_spill] sm:$0xff]  ;;  %v7588_v17 = vpack.c.bf16 %v7447_v59, %v7410_v20  ;;  %v2982_v40 = vpack.c.bf16 %v7221_v30, %v7219_v41  ;;  %vm8787_vm5 = vnez %v8786_v48  ;;  %v7599_v58 = vpack.c.bf16 %v7473_v46, %v7443_v37  ;;  %v8790_v46 = vld [vmem:[#allocation51_spill] sm:$0xff] }
 0x51d   : > { %vm8785_vm11 = vnez %v8784_v1  ;;  %v3013_v26 = vsel %vm8787_vm5, %v7309_v12, 0  ;;  %v2983_v25 = vpack.c.bf16 %v7297_v3, %v7240_v51  ;;  %v8788_v20 = vld [vmem:[#allocation41_spill] sm:$0xff]  ;;  %v2991_v34 = vpack.c.bf16 %v2939_v6, %v2940_v45  ;;  %v8792_v6 = vld [vmem:[#allocation78_spill] sm:$0xff]  ;;  %v8794_v48 = vld [vmem:[#allocation83_spill] sm:$0xff] }
 0x51e   : > { %v2997_v11 = vsel %vm8785_vm11, %v2989_v56, 0  ;;  %v7592_v56 = vpack.c.bf16 %v2932_v23, %v2933_v29  ;;  %vm8789_vm13 = vnez %v8788_v20  ;;  %v2985_v12 = vpack.c.bf16 %v7339_v61, %v7337_v13  ;;  %v8796_v20 = vld [vmem:[#allocation85_spill] sm:$0xff]  ;;  %v4793_v51 = vld [vmem:[%s8024_s10 + $0x8] sm:$0xff]  }
 0x51f   : > { %3086 = vrot.lane.b32.xlu1 %v2997_v11, %s8732_s0  ;;  %v2998_v59 = vsel %vm8789_vm13, %v2990_v2, 0  ;;  %v2986_v37 = vpack.c.bf16 %v7373_v38, %v7371_v43  ;;  %vm8791_vm6 = vnez %v8790_v46  ;;  %v2987_v11 = vpack.c.bf16 %v7223_v5, %v7404_v18  ;;  %v8798_v46 = vld [vmem:[#allocation34_spill] sm:$0xff]  ;;  %v8882_v3 = vld [vmem:[#allocation5_spill] sm:$0xff] }
 0x520   : > { %3108 = vrot.lane.b32.xlu0 %v3012_v62, %s8732_s0  ;;  %v2984_v62 = vpack.c.bf16 %v7319_v15, %v7311_v47  ;;  %v3014_v1 = vsel %vm8791_vm6, %v7348_v55, 0  ;;  %vm8793_vm1 = vnez %v8792_v6  ;;  %v2992_v2 = vpack.c.bf16 %v2937_v50, %v2938_v0  ;;  %v8800_v0 = vld [vmem:[#allocation31_spill] sm:$0xff]  ;;  %v4813_v5 = vld [vmem:[%s5082_s28 + $0x28] sm:$0xff] }
 0x521   : > { %v2999_v45 = vsel %vm8793_vm1, %v2991_v34, 0  ;;  %vm8795_vm3 = vnez %v8794_v48  ;;  %vm8797_vm4 = vnez %v8796_v20  ;;  %vm8799_vm9 = vnez %v8798_v46  ;;  %v8817_v46 = vld [vmem:[#allocation27_spill] sm:$0xff] }
 0x522   : > { %v3000_v55 = vsel %vm8797_vm4, %v2992_v2, 0  ;;  %vm8801_vm0 = vnez %v8800_v0  ;;  %v2994_v34 = vpack.c.bf16 %v2933_v29, %v2934_v39  ;;  %v8808_v39 = vld [vmem:[#allocation46_spill] sm:$0xff]  ;;  %vm8811_vm12 = vnez %v8810_v52  ;;  %v8825_v52 = vld [vmem:[#allocation20_spill] sm:$0xff] }
 0x523   : > { %3088 = vrot.lane.b32.xlu1 %v2998_v59, %s8732_s0  ;;  %v2993_v59 = vpack.c.bf16 %v2935_v9, %v2936_v32  ;;  %v8804_v32 = vld [vmem:[#allocation50_spill] sm:$0xff]  ;;  %vm8809_vm2 = vnez %v8808_v39  ;;  %vm8818_vm13 = vnez %v8817_v46  ;;  %vm8819_vm6 = vcmask 523264   ;;  %v7694_v46 = vld [vmem:[%s8024_s10] sm:$0xff]  }
 0x524   : > { %3110 = vrot.lane.b32.xlu0 %v3013_v26, %s8732_s0  ;;  %v3015_v26 = vsel %vm8795_vm3, %v7362_v10, 0  ;;  %v8802_v10 = vrot.slane %v7204_v27, 1  ;;  %vm8805_vm8 = vnez %v8804_v32  ;;  %v3018_v29 = vsel %vm8809_vm2, %v7481_v22, 0  ;;  %v8815_v22 = vld [vmem:[#allocation6_spill] sm:$0xff]  ;;  %vm8820_vm1 = vmmov %vm8819_vm6  ;;  %v8822_v32 = vld [vmem:[#allocation57_spill] sm:$0xff] }
 0x525   : > { %v3001_v50 = vsel %vm8801_vm0, %v2993_v59, 0  ;;  %v3017_v9 = vsel %vm8805_vm8, %v7432_v36, 0  ;;  %v8812_v36 = vld [vmem:[#allocation67_spill] sm:$0xff]  ;;  %vm8816_vm5 = vnez %v8815_v22  ;;  %vm8823_vm3 = vnez %v8822_v32  ;;  %vm8824_vm4 = vmmov %vm8820_vm1 }
 0x526   : > { %v2947_v6 = vsel %vm8803_vm14, %v2931_v14, %v8802_v10  ;;  %vm8813_vm11 = vnez %v8812_v36  ;;  %v8821_v10 = vld [vmem:[#allocation59_spill] sm:$0xff]  ;;  %v4791_v36 = vld [vmem:[%s8022_s8 + $0x118] sm:$0xff]   ;;  %vm8827_vm0 = vmmov %vm8820_vm1 }
 0x527   : > { %3090 = vrot.lane.b32.xlu1 %v2999_v45, %s8732_s0  ;;  %v2995_v2 = vpack.c.bf16 %v2947_v6, %v2932_v23  ;;  %v3019_v48 = vsel %vm8813_vm11, %v7236_v19, 0  ;;  %v8814_v23 = vld [vmem:[#allocation13_spill] sm:$0xff]  ;;  %v4781_v19 = vld [vmem:[%s8022_s8 + $0x108] sm:$0xff]   ;;  %vm8830_vm8 = vmmov %vm8827_vm0 }
 0x528   : > { %3112 = vrot.lane.b32.xlu0 %v3014_v1, %s8732_s0  ;;  %v3016_v1 = vsel %vm8799_vm9, %v7402_v44, 0  ;;  %v8806_v44 = vld [vmem:[#allocation33_spill] sm:$0xff]  ;;  %vm8826_vm9 = vnez %v8825_v52  ;;  %vm8833_vm2 = vmmov %vm8827_vm0  ;;  %v8837_v52 = vld [vmem:[#allocation7_spill] sm:$0xff] }
 0x529   : > { %vm8807_vm10 = vnez %v8806_v44  ;;  %v3003_v14 = vsel %vm8811_vm12, %v2995_v2, 0  ;;  %v4790_v2 = vld [vmem:[%s8022_s8 + $0x110] sm:$0xff]   ;;  %vm8836_vm11 = vmmov %vm8827_vm0 }
 0x52a   : > { %v3002_v45 = vsel %vm8807_vm10, %v2994_v34, 0 }
 0x52b   : > { %3092 = vrot.lane.b32.xlu1 %v3000_v55, %s8732_s0 }
 0x52c   : > { %3114 = vrot.lane.b32.xlu0 %v3015_v26, %s8732_s0  ;;  %v7659_v26 = vpack.c.bf16 %v8814_v23, %v2947_v6  ;;  %v8828_v23 = vld [vmem:[#allocation75_spill] sm:$0xff] }
 0x52d   : > { %vm8829_vm14 = vnez %v8828_v23 }
 0x52e   : > { %v2956_v59 = vsel %vm8816_vm5, %v7659_v26, 0  ;;  %vm8838_vm5 = vnez %v8837_v52 }
 0x52f   : > { %3094 = vrot.lane.b32.xlu1 %v3001_v50, %s8732_s0 }
 0x530   : > { %3116 = vrot.lane.b32.xlu0 %v3016_v1, %s8732_s0  ;;  %v2892_v1 = vsel %vm8818_vm13, %v7514_v53, 0  ;;  %vm8839_vm13 = vmmov %vm8827_vm0 }
 0x533   : > { %3096 = vrot.lane.b32.xlu1 %v3002_v45, %s8732_s0 }
 0x534   : > { %3118 = vrot.lane.b32.xlu0 %v3017_v9, %s8732_s0  ;;  %v2957_v9 = vsel %vm8823_vm3, %v7523_v54, 0 }
 0x537   : > { %3098 = vrot.lane.b32.xlu1 %v3003_v14, %s8732_s0  ;;  %v2893_v14 = vsel %vm8826_vm9, %v7533_v60, 0 }
 0x538   : > { %3120 = vrot.lane.b32.xlu0 %v3018_v29, %s8732_s0 }
 0x53c   : > { %3122 = vrot.lane.b32.xlu0 %v3019_v48, %s8732_s0  ;;  %s4125_s0 = sshll.u32 %s405_s20, 7 }
 0x53d   : > { %s7920_s17 = scalar_lea.vmem [#allocation2], %s4125_s0  ;;  %s4902_s0 = smov [#allocation2]  }
 0x53e   : > { %s4059_s19 = sshll.u32 %s7920_s17, 4  ;;  %s4828_s15 = sshll.u32 %s4902_s0, 4  ;;  %s7963_s19 = int_to_ptr.vmem [resolvable:$true] %s4059_s19  ;;  %s4829_s15 = int_to_ptr.vmem [resolvable:$false] %s4828_s15 }
 0x53f   : > { %s4824_s29 = scalar_lea.vmem %s7963_s19, 2048  ;;  %s4830_s1 = scalar_lea.vmem %s4829_s15, 4096 }
 0x540   : > { %p4825_p11 = scmp.ne.s32.totalorder %s7963_s19, %s4824_s29  ;;  %p4831_p0 = scmp.lt.s32.totalorder %s7963_s19, %s4829_s15 }
 0x541   : > { %p4832_p1 = scmp.lt.s32.totalorder %s4830_s1, %s4824_s29 }
 0x542   : > { %p4826_p12 = pnand %p4825_p11, %p5008_p5 }
 0x543   : > { %p4833_p2 = por %p4832_p1, %p4831_p0 }
 0x544   : > { %p4827_p13 = pneg %p4826_p12 }
 0x546   : > { %p4834_p3 = pnand %p4833_p2, %p4827_p13 }
 0x56d   : > { %v3037_v20 = vpop.permute.xlu1 %3036 }
 0x56e   : > { %v3126_v34 = vsel %vm8820_vm1, %v2892_v1, %v3037_v20  ;;  %v2958_v20 = vsel %vm8829_vm14, %v7535_v21, 0  ;;  %vm8842_vm1 = vmmov %vm8827_vm0 }
 0x56f   : > { %vm8848_vm14 = vmmov %vm8827_vm0 }
 0x571   : > { %v3039_v0 = vpop.permute.xlu1 %3038 }
 0x572   : > { %v3061_v55 = vpop.permute.xlu0 %3060  ;;  %v3130_v48 = vsel %vm8827_vm0, %v2893_v14, %v3039_v0  ;;  %v2895_v14 = vsel %vm8838_vm5, %v7550_v35, 0  ;;  %vm8857_vm5 = vmmov %vm8827_vm0 }
 0x573   : > { %v3158_v50 = vsel %vm8819_vm6, %v2956_v59, %v3061_v55 }
 0x574   : > { %3602 = vmatprep.mubr.bf16.mxu1 %v3158_v50  ;;  %v8831_v50 = vld [vmem:[#allocation9_spill] sm:$0xff] }
 0x575   : > { %3603 = vmatmul.mubr.bf16.vlgmr.msra.gmra.mrb[16].mxu1 %v3126_v34  ;;  %v3041_v44 = vpop.permute.xlu1 %3040  ;;  %vm8832_vm10 = vnez %v8831_v50  ;;  %v8843_v50 = vld [vmem:[#allocation44_spill] sm:$0xff] }
 0x576   : > { %4530 = vmatpush3.bf16.msra.mxu1 %v8821_v10  ;;  %v3063_v6 = vpop.permute.xlu0 %3062  ;;  %v8834_v10 = vld [vmem:[#allocation55_spill] sm:$0xff]  ;;  %vm8844_vm3 = vnez %v8843_v50 }
 0x577   : > { %v3162_v45 = vsel %vm8824_vm4, %v2957_v9, %v3063_v6  ;;  %4531 = vmatprep.subr.bf16.mxu1 %v4781_v19  ;;  %vm8835_vm12 = vnez %v8834_v10  ;;  %vm8845_vm4 = vmmov %vm8827_vm0  ;;  %v8846_v10 = vld [vmem:[#allocation12_spill] sm:$0xff] }
 0x578   : > { %3610 = vmatprep.mubr.bf16.mxu1 %v3162_v45  ;;  %v2959_v6 = vsel %vm8835_vm12, %v7546_v8, 0  ;;  %vm8847_vm9 = vnez %v8846_v10  ;;  %vm8854_vm12 = vmmov %vm8827_vm0 }
 0x579   : > { %v3043_v29 = vpop.permute.xlu1 %3042 }
 0x57a   : > { %v3065_v39 = vpop.permute.xlu0 %3064  ;;  %4532 = vmatpush3.bf16.msra.mxu1 %v4781_v19  ;;  %v2894_v19 = vsel %vm8832_vm10, %v7539_v42, 0  ;;  %vm8851_vm10 = vmmov %vm8827_vm0 }
 0x57b   : > { %4533 = vmatprep.subr.bf16.mxu1 %v4790_v2  ;;  %v3166_v55 = vsel %vm8830_vm8, %v2958_v20, %v3065_v39  ;;  %v3134_v34 = vsel %vm8833_vm2, %v2894_v19, %v3041_v44  ;;  %v8840_v44 = vld [vmem:[#allocation24_spill] sm:$0xff]  ;;  %v3004_v19 = vsel %vm8844_vm3, %v7533_v60, 0  ;;  %vm8863_vm3 = vmmov %vm8827_vm0 }
 0x57c   : > { %vm8841_vm6 = vnez %v8840_v44 }
 0x57d   : > { %3611 = vmatmul.mubr.bf16.gmra.mrb[20].mxu1 %v3130_v48  ;;  %v3045_v59 = vpop.permute.xlu1 %3044  ;;  %v2960_v48 = vsel %vm8841_vm6, %v7560_v57, 0 }
 0x57e   : > { %v3067_v22 = vpop.permute.xlu0 %3066  ;;  %3618 = vmatprep.mubr.bf16.mxu1 %v3166_v55  ;;  %4534 = vmatpush3.bf16.msra.mxu1 %v4790_v2 }
 0x57f   : > { %4535 = vmatprep.subr.bf16.mxu1 %v4791_v36  ;;  %v3170_v32 = vsel %vm8836_vm11, %v2959_v6, %v3067_v22 }
 0x581   : > { %v3047_v0 = vpop.permute.xlu1 %3046 }
 0x582   : > { %v3069_v1 = vpop.permute.xlu0 %3068  ;;  %4536 = vmatpush3.bf16.msra.mxu1 %v4791_v36  ;;  %v3138_v36 = vsel %vm8839_vm13, %v2895_v14, %v3043_v29  ;;  %v2896_v29 = vsel %vm8847_vm9, %v7570_v16, 0  ;;  %vm8858_vm13 = vmmov %vm8827_vm0 }
 0x583   : > { %4553 = vmatprep.subr.bf16.mxu1 %v7694_v46  ;;  %v3174_v23 = vsel %vm8842_vm1, %v2960_v48, %v3069_v1  ;;  %v3142_v1 = vsel %vm8848_vm14, %v2896_v29, %v3045_v59  ;;  %v8855_v59 = vld [vmem:[#allocation62_spill] sm:$0xff]  ;;  %vm8866_vm9 = vmmov %vm8827_vm0  ;;  %v8867_v29 = vld [vmem:[#allocation80_spill] sm:$0xff] }
 0x584   : > { %vm8856_vm11 = vnez %v8855_v59  ;;  %vm8868_vm14 = vnez %v8867_v29  ;;  %v4816_v29 = vld [vmem:[%s5082_s28 + $0x40] sm:$0xff] }
 0x585   : > { %3619 = vmatmul.mubr.bf16.gmra.mrb[24].mxu1 %v3134_v34  ;;  %v3049_v45 = vpop.permute.xlu1 %3048  ;;  %v2897_v48 = vsel %vm8856_vm11, %v7579_v31, 0 }
 0x586   : > { %3626 = vmatprep.mubr.bf16.mxu1 %v3170_v32  ;;  %v3071_v9 = vpop.permute.xlu0 %3070  ;;  %v8849_v32 = vld [vmem:[#allocation8_spill] sm:$0xff] }
 0x587   : > { %vm8850_vm8 = vnez %v8849_v32 }
 0x588   : > { %v2961_v52 = vsel %vm8850_vm8, %v7572_v33, 0 }
 0x589   : > { %v3051_v39 = vpop.permute.xlu1 %3050  ;;  %v3178_v60 = vsel %vm8851_vm10, %v2961_v52, %v3071_v9  ;;  %vm8871_vm10 = vmmov %vm8827_vm0 }
 0x58a   : > { %v3073_v2 = vpop.permute.xlu0 %3072 }
 0x58d   : > { %3627 = vmatmul.mubr.bf16.gmra.mrb[28].mxu1 %v3138_v36  ;;  %v3085_v55 = vpop.permute.xlu1 %3084  ;;  %v8852_v36 = vld [vmem:[#allocation43_spill] sm:$0xff] }
 0x58e   : > { %3634 = vmatprep.mubr.bf16.mxu1 %v3174_v23  ;;  %v3075_v20 = vpop.permute.xlu0 %3074  ;;  %v3190_v6 = vsel %vm8827_vm0, %v2980_v63, %v3085_v55  ;;  %vm8853_vm2 = vnez %v8852_v36  ;;  %v3146_v23 = vsel %vm8857_vm5, %v2897_v48, %v3047_v0  ;;  %v8859_v55 = vld [vmem:[#allocation10_spill] sm:$0xff]  ;;  %vm8878_vm5 = vmmov %vm8827_vm0  ;;  %v8889_v48 = vld [vmem:[#allocation53_spill] sm:$0xff] }
 0x58f   : > { %v3005_v44 = vsel %vm8853_vm2, %v7539_v42, 0  ;;  %vm8860_vm6 = vnez %v8859_v55  ;;  %vm8874_vm2 = vmmov %vm8827_vm0  ;;  %v8899_v55 = vld [vmem:[#allocation26_spill] sm:$0xff] }
 0x590   : > { %v3006_v42 = vsel %vm8860_vm6, %v7550_v35, 0  ;;  %vm8883_vm6 = vnez %v8882_v3 }
 0x591   : > { %v3087_v28 = vpop.permute.xlu1 %3086 }
 0x592   : > { %v3109_v22 = vpop.permute.xlu0 %3108  ;;  %v3194_v9 = vsel %vm8858_vm13, %v2981_v7, %v3087_v28  ;;  %v2898_v7 = vsel %vm6927_vm15, %v7588_v17, 0  ;;  %vm8872_vm15 = vmmov %vm8827_vm0 }
 0x593   : > { %v3222_v34 = vsel %vm8845_vm4, %v3004_v19, %v3109_v22  ;;  %v8861_v22 = vld [vmem:[#allocation21_spill] sm:$0xff]  ;;  %vm8864_vm4 = vmmov %vm8827_vm0  ;;  %v3150_v35 = vsel %vm8866_vm9, %v2898_v7, %v3049_v45 }
 0x594   : > { %3699 = vmatprep.mubr.bf16.mxu0 %v3222_v34  ;;  %vm8862_vm1 = vnez %v8861_v22  ;;  %vm8888_vm9 = vmmov %vm8827_vm0  ;;  %v8905_v22 = vld [vmem:[#allocation69_spill] sm:$0xff] }
 0x595   : > { %3635 = vmatmul.mubr.bf16.gmra.mrb[32].mxu1 %v3142_v1  ;;  %3700 = vmatmul.mubr.bf16.vlgmr.msra.gmra.mrb[32].mxu0 %v3190_v6  ;;  %v2962_v50 = vsel %vm8862_vm1, %v7584_v24, 0  ;;  %v3089_v0 = vpop.permute.xlu1 %3088  ;;  %v3007_v6 = vsel %vm8868_vm14, %v7570_v16, 0  ;;  %vm8884_vm1 = vmmov %vm8827_vm0 }
 0x596   : > { %3642 = vmatprep.mubr.bf16.mxu1 %v3178_v60  ;;  %v3111_v14 = vpop.permute.xlu0 %3110  ;;  %v3182_v34 = vsel %vm8864_vm4, %v2962_v50, %v3073_v2  ;;  %v3198_v10 = vsel %vm8827_vm0, %v2982_v40, %v3089_v0  ;;  %v8869_v2 = vld [vmem:[#allocation36_spill] sm:$0xff]  ;;  %v2899_v40 = vsel %vm6949_vm7, %v7599_v58, 0  ;;  %vm8881_vm7 = vmmov %vm8827_vm0  ;;  %v8912_v0 = vld [vmem:[#allocation54_spill] sm:$0xff] }
 0x597   : > { %v3226_v27 = vsel %vm8854_vm12, %v3005_v44, %v3111_v14  ;;  %vm8870_vm8 = vnez %v8869_v2  ;;  %v3154_v16 = vsel %vm8874_vm2, %v2899_v40, %v3051_v39  ;;  %vm8875_vm12 = vmmov %vm8827_vm0  ;;  %v8876_v14 = vld [vmem:[#allocation88_spill] sm:$0xff]  ;;  %v4822_v40 = vld [vmem:[%s5082_s28 + $0x70] sm:$0xff] }
 0x598   : > { %3707 = vmatprep.mubr.bf16.mxu0 %v3226_v27  ;;  %v2963_v1 = vsel %vm8870_vm8, %v7592_v56, 0  ;;  %vm8877_vm11 = vnez %v8876_v14  ;;  %v8879_v44 = vld [vmem:[#allocation60_spill] sm:$0xff]  ;;  %vm8887_vm4 = vmmov %vm8827_vm0  ;;  %vm8890_vm0 = vnez %v8889_v48 }
 0x599   : > { %v3186_v52 = vsel %vm8872_vm15, %v2963_v1, %v3075_v20  ;;  %v3091_v45 = vpop.permute.xlu1 %3090  ;;  %v3008_v36 = vsel %vm8877_vm11, %v7579_v31, 0  ;;  %vm8880_vm13 = vnez %v8879_v44  ;;  %v3021_v31 = vsel %vm8883_vm6, %v7535_v21, 0  ;;  %vm8891_vm14 = vmmov %vm8884_vm1  ;;  %v4818_v1 = vld [vmem:[%s5082_s28 + $0x50] sm:$0xff] }
 0x59a   : > { %v3113_v63 = vpop.permute.xlu0 %3112  ;;  %v3202_v60 = vsel %vm8875_vm12, %v2983_v25, %v3091_v45  ;;  %v3020_v27 = vsel %vm8880_vm13, %v7523_v54, 0  ;;  %v8885_v54 = vld [vmem:[#allocation58_spill] sm:$0xff]  ;;  %v3022_v21 = vsel %vm8890_vm0, %v7546_v8, 0  ;;  %vm8892_vm8 = vmmov %vm8884_vm1  ;;  %vm8900_vm11 = vnez %v8899_v55  ;;  %v4820_v45 = vld [vmem:[%s5082_s28 + $0x60] sm:$0xff] }
 0x59b   : > { %v3230_v19 = vsel %vm8863_vm3, %v3006_v42, %v3113_v63  ;;  %vm8886_vm3 = vnez %v8885_v54  ;;  %vm8897_vm2 = vmmov %vm8884_vm1  ;;  %v3024_v13 = vsel %vm8900_vm11, %v7572_v33, 0  ;;  %vm8906_vm6 = vnez %v8905_v22  ;;  %v7868_v55 = vld [vmem:[%s8023_s9] ss:$0 sm:$0xff] }
 0x59c   : > { %v3009_v63 = vsel %vm8886_vm3, %v7588_v17, 0  ;;  %vm8898_vm12 = vmmov %vm8884_vm1  ;;  %v3011_v50 = vsel %vm8906_vm6, %v7514_v53, 0  ;;  %v4809_v53 = vld [vmem:[%s5082_s28 + $0x8] sm:$0xff] }
 0x59d   : > { %3643 = vmatmul.mubr.bf16.gmra.mrb[36].mxu1 %v3146_v23  ;;  %3708 = vmatmul.mubr.bf16.gmra.mrb[36].mxu0 %v3194_v9  ;;  %v3093_v39 = vpop.permute.xlu1 %3092  ;;  %v8895_v23 = vld [vmem:[#allocation22_spill] sm:$0xff]  ;;  %vm8902_vm13 = vmmov %vm8884_vm1 }
 0x59e   : > { %3715 = vmatprep.mubr.bf16.mxu0 %v3230_v19  ;;  %3650 = vmatprep.mubr.bf16.mxu1 %v3182_v34  ;;  %v3115_v4 = vpop.permute.xlu0 %3114  ;;  %v3206_v25 = vsel %vm8884_vm1, %v2984_v62, %v3093_v39  ;;  %v8893_v62 = vld [vmem:[#allocation30_spill] sm:$0xff]  ;;  %vm8896_vm15 = vnez %v8895_v23  ;;  %vm8907_vm3 = vmmov %vm8884_vm1  ;;  %v8908_v19 = vld [vmem:[#allocation11_spill] sm:$0xff] }
 0x59f   : > { %v3234_v32 = vsel %vm8871_vm10, %v3007_v6, %v3115_v4  ;;  %vm8894_vm10 = vnez %v8893_v62  ;;  %v3010_v9 = vsel %vm8896_vm15, %v7599_v58, 0  ;;  %vm8911_vm0 = vmmov %vm8884_vm1  ;;  %v4810_v4 = vld [vmem:[%s5082_s28 + $0x10] sm:$0xff]  ;;  %v4817_v6 = vld [vmem:[%s5082_s28 + $0x48] sm:$0xff] }
 0x5a0   : > { %v3862_v7 = vpack.c.bf16 %v4811_v49, %v4810_v4  ;;  %v3865_v2 = vpack.c.bf16 %v4817_v6, %v4816_v29  ;;  %vm8923_vm6 = vmmov %vm8911_vm0 }
 0x5a1   : > { %v3095_v47 = vpop.permute.xlu1 %3094 }
 0x5a2   : > { %v3117_v41 = vpop.permute.xlu0 %3116  ;;  %v3210_v17 = vsel %vm8892_vm8, %v2985_v12, %v3095_v47  ;;  %v8903_v12 = vld [vmem:[#allocation37_spill] sm:$0xff]  ;;  %vm8914_vm8 = vmmov %vm8911_vm0 }
 0x5a3   : > { %v3238_v20 = vsel %vm8878_vm5, %v3008_v36, %v3117_v41  ;;  %vm8901_vm5 = vmmov %vm8884_vm1  ;;  %v4821_v41 = vld [vmem:[%s5082_s28 + $0x68] sm:$0xff] }
 0x5a4   : > { %v3867_v30 = vpack.c.bf16 %v4821_v41, %v4820_v45 }
 0x5a5   : > { %3651 = vmatmul.mubr.bf16.gmra.mrb[40].mxu1 %v3150_v35  ;;  %3716 = vmatmul.mubr.bf16.gmra.mrb[40].mxu0 %v3198_v10  ;;  %v3097_v61 = vpop.permute.xlu1 %3096  ;;  %v4812_v35 = vld [vmem:[%s5082_s28 + $0x20] sm:$0xff] }
 0x5a6   : > { %3723 = vmatprep.mubr.bf16.mxu0 %v3234_v32  ;;  %3658 = vmatprep.mubr.bf16.mxu1 %v3186_v52  ;;  %v3119_v28 = vpop.permute.xlu0 %3118  ;;  %v3214_v58 = vsel %vm8902_vm13, %v2986_v37, %v3097_v61  ;;  %v3863_v18 = vpack.c.bf16 %v4813_v5, %v4812_v35  ;;  %v4819_v32 = vld [vmem:[%s5082_s28 + $0x58] sm:$0xff] }
 0x5a7   : > { %v3242_v59 = vsel %vm8888_vm9, %v3009_v63, %v3119_v28  ;;  %vm8910_vm9 = vmmov %vm8884_vm1  ;;  %v3866_v52 = vpack.c.bf16 %v4819_v32, %v4818_v1 }
 0x5a9   : > { %v3099_v38 = vpop.permute.xlu1 %3098 }
 0x5aa   : > { %v3121_v15 = vpop.permute.xlu0 %3120  ;;  %v3218_v34 = vsel %vm8911_vm0, %v2987_v11, %v3099_v38  ;;  %v4814_v11 = vld [vmem:[%s5082_s28 + $0x30] sm:$0xff] }
 0x5ab   : > { %v3246_v8 = vsel %vm8898_vm12, %v3010_v9, %v3121_v15 }
 0x5ad   : > { %3659 = vmatmul.mubr.bf16.gmra.mrb[44].mxu1 %v3154_v16  ;;  %3724 = vmatmul.mubr.bf16.gmra.mrb[44].mxu0 %v3202_v60  ;;  %v4823_v16 = vld [vmem:[%s5082_s28 + $0x78] sm:$0xff] }
 0x5ae   : > { %3731 = vmatprep.mubr.bf16.mxu0 %v3238_v20  ;;  %4537 = vmatprep.mubr.msk.bf16.mxu1 %vm8881_vm7, %v3020_v27  ;;  %vm8904_vm7 = vnez %v8903_v12  ;;  %v3868_v60 = vpack.c.bf16 %v4823_v16, %v4822_v40 }
 0x5af   : > { %v3025_v42 = vsel %vm8904_vm7, %v7584_v24, 0  ;;  %v4808_v24 = vld [vmem:[%s5082_s28] sm:$0xff] }
 0x5b0   : > { %v3861_v37 = vpack.c.bf16 %v4809_v53, %v4808_v24 }
 0x5b5   : > { %3732 = vmatmul.mubr.bf16.gmra.mrb[48].mxu0 %v3206_v25  ;;  %4538 = vmatmul.mubr.msk.bf16.vlgmr.msra.gmra.mrb[48].mxu1 %vm8887_vm4, %v3021_v31  ;;  %vm8909_vm4 = vnez %v8908_v19 }
 0x5b6   : > { %4554 = vmatpush3.bf16.msra.mxu1 %v7694_v46  ;;  %3739 = vmatprep.mubr.bf16.mxu0 %v3242_v59  ;;  %v3023_v46 = vsel %vm8894_vm10, %v7560_v57, 0  ;;  %v3123_v57 = vpop.permute.xlu0 %3122  ;;  %v3026_v43 = vsel %vm8909_vm4, %v7592_v56, 0  ;;  %vm8915_vm10 = vcmask 261120   ;;  %vm8926_vm4 = vmmov %vm8911_vm0 }
 0x5b7   : > { %4541 = vmatprep.mubr.msk.bf16.mxu1 %vm8891_vm14, %v3022_v21  ;;  %4555 = vmatprep.subr.bf16.mxu1 %v4793_v51  ;;  %v3250_v33 = vsel %vm8907_vm3, %v3011_v50, %v3123_v57  ;;  %vm8913_vm14 = vnez %v8912_v0  ;;  %vm8916_vm15 = vmmov %vm8915_vm10 }
 0x5b8   : > { %v3027_v56 = vsel %vm8913_vm14, %v7659_v26, 0  ;;  %v4815_v26 = vld [vmem:[%s5082_s28 + $0x38] sm:$0xff]  ;;  %vm8925_vm3 = vmmov %vm8911_vm0  ;;  %s7961_s28 = scalar_lea.hbm %s8026_s12, %s4284_s18 }
 0x5b9   : > { %v3864_v10 = vpack.c.bf16 %v4815_v26, %v4814_v11  ;;  %vm8928_vm14 = vmmov %vm8911_vm0 }
 0x5ba   : > { %4556 = vmatpush3.bf16.msra.mxu1 %v4793_v51 }
 0x5bd   : > { %3740 = vmatmul.mubr.bf16.gmra.mrb[52].mxu0 %v3210_v17  ;;  %4542 = vmatmul.mubr.msk.bf16.gmra.mrb[52].mxu1 %vm8897_vm2, %v3023_v46  ;;  %vm8917_vm2 = vmmov %vm8915_vm10 }
 0x5be   : > { %3747 = vmatprep.mubr.bf16.mxu0 %v3246_v8  ;;  %4545 = vmatprep.mubr.msk.bf16.mxu1 %vm8901_vm5, %v3024_v13  ;;  %vm8918_vm12 = vmmov %vm8917_vm2 }
 0x5bf   : > { %vm8919_vm11 = vmmov %vm8917_vm2 }
 0x5c0   : > { %vm8920_vm5 = vmmov %vm8917_vm2 }
 0x5c1   : > { %vm8921_vm13 = vmmov %vm8917_vm2 }
 0x5c2   : > { %vm8922_vm7 = vmmov %vm8917_vm2 }
 0x5c5   : > { %3748 = vmatmul.mubr.bf16.gmra.mrb[56].mxu0 %v3214_v58  ;;  %4546 = vmatmul.mubr.msk.bf16.gmra.mrb[56].mxu1 %vm8884_vm1, %v3025_v42  ;;  %vm8924_vm1 = vmmov %vm8911_vm0 }
 0x5c6   : > { %3755 = vmatprep.mubr.bf16.mxu0 %v3250_v33  ;;  %4549 = vmatprep.mubr.msk.bf16.mxu1 %vm8910_vm9, %v3026_v43  ;;  %vm8927_vm9 = vmmov %vm8911_vm0 }
 0x5cd   : > { %3756 = vmatmul.mubr.bf16.gmra.mrb[60].mxu0 %v3218_v34  ;;  %4550 = vmatmul.mubr.msk.bf16.gmra.mrb[60].mxu1 %vm8914_vm8, %v3027_v56  ;;  %vm8929_vm8 = vmmov %vm8911_vm0 }
 0x5ce   : > { %4557 = vmatprep.mubr.msk.bf16.mxu1 %vm8915_vm10, %v3861_v37  ;;  %vm8930_vm10 = vmmov %vm8911_vm0 }
 0x5d5   : > { %4558 = vmatmul.mubr.msk.bf16.vlgmr.msra.gmra.mrb[48].mxu1 %vm8916_vm15, %v3862_v7  ;;  %vm8931_vm15 = vmmov %vm8911_vm0 }
 0x5d6   : > { %4561 = vmatprep.mubr.msk.bf16.mxu1 %vm8917_vm2, %v3863_v18  ;;  %vm8932_vm2 = vmmov %vm8911_vm0 }
 0x5dd   : > { %4562 = vmatmul.mubr.msk.bf16.gmra.mrb[52].mxu1 %vm8918_vm12, %v3864_v10  ;;  %vm8933_vm12 = vmmov %vm8911_vm0 }
 0x5de   : > { %4565 = vmatprep.mubr.msk.bf16.mxu1 %vm8919_vm11, %v3865_v2  ;;  %vm8934_vm11 = vmmov %vm8911_vm0 }
 0x5e5   : > { %4566 = vmatmul.mubr.msk.bf16.gmra.mrb[56].mxu1 %vm8920_vm5, %v3866_v52  ;;  %vm8935_vm5 = vmmov %vm8911_vm0 }
 0x5e6   : > { %4569 = vmatprep.mubr.msk.bf16.mxu1 %vm8921_vm13, %v3867_v30  ;;  %vm8936_vm13 = vmmov %vm8911_vm0 }
 0x5ed   : > { %4570 = vmatmul.mubr.msk.bf16.gmra.mrb[60].mxu1 %vm8922_vm7, %v3868_v60  ;;  %vm8937_vm7 = vmmov %vm8911_vm0 }
 0x648   : > { %v4375_v14 = vpop.f32.mrb[16].mxu1 }
 0x649   : > { %v4376_v36 = vpop.f32.mrb[17].mxu1 }
 0x64a   : > { %v4377_v20 = vadd.f32 %v4376_v36, %v4375_v14  ;;  %v4378_v44 = vpop.f32.mrb[18].mxu1 }
 0x64b   : > { %v4379_v27 = vpop.f32.mrb[19].mxu1 }
 0x64c   : > { %v4380_v39 = vadd.f32 %v4379_v27, %v4378_v44  ;;  %v3605_v12 = vadd.f32 %v4377_v20, %v7868_v55 }
 0x64e   : > { %v3608_v38 = vadd.f32 %v4380_v39, %v7868_v55 }
 0x650   : > { %v4381_v28 = vpop.f32.mrb[20].mxu1 }
 0x651   : > { %v4382_v51 = vpop.f32.mrb[21].mxu1 }
 0x652   : > { %v4383_v3 = vadd.f32 %v4382_v51, %v4381_v28  ;;  %v4384_v31 = vpop.f32.mrb[22].mxu1 }
 0x653   : > { %v4385_v25 = vpop.f32.mrb[23].mxu1 }
 0x654   : > { %v4386_v54 = vadd.f32 %v4385_v25, %v4384_v31  ;;  %v3613_v7 = vadd.f32 %v4383_v3, %v7868_v55 }
 0x656   : > { %v3616_v29 = vadd.f32 %v4386_v54, %v7868_v55 }
 0x658   : > { %v4387_v63 = vpop.f32.mrb[24].mxu1 }
 0x659   : > { %v4388_v59 = vpop.f32.mrb[25].mxu1 }
 0x65a   : > { %v4389_v48 = vadd.f32 %v4388_v59, %v4387_v63  ;;  %v4390_v21 = vpop.f32.mrb[26].mxu1 }
 0x65b   : > { %v4391_v47 = vpop.f32.mrb[27].mxu1 }
 0x65c   : > { %v4392_v15 = vadd.f32 %v4391_v47, %v4390_v21  ;;  %v3621_v40 = vadd.f32 %v4389_v48, %v7868_v55 }
 0x65e   : > { %v3624_v27 = vadd.f32 %v4392_v15, %v7868_v55 }
 0x660   : > { %v4393_v17 = vpop.f32.mrb[28].mxu1 }
 0x661   : > { %v4394_v62 = vpop.f32.mrb[29].mxu1 }
 0x662   : > { %v4395_v46 = vadd.f32 %v4394_v62, %v4393_v17  ;;  %v4396_v23 = vpop.f32.mrb[30].mxu1 }
 0x663   : > { %v4397_v9 = vpop.f32.mrb[31].mxu1 }
 0x664   : > { %v4398_v8 = vadd.f32 %v4397_v9, %v4396_v23  ;;  %v3629_v59 = vadd.f32 %v4395_v46, %v7868_v55 }
 0x666   : > { %v3632_v15 = vadd.f32 %v4398_v8, %v7868_v55 }
 0x668   : > { %v4399_v13 = vpop.f32.mrb[32].mxu1  ;;  %v4439_v61 = vpop.f32.mrb[32].mxu0 }
 0x669   : > { %v4400_v57 = vpop.f32.mrb[33].mxu1  ;;  %v4440_v58 = vpop.f32.mrb[33].mxu0 }
 0x66a   : > { %v4401_v42 = vadd.f32 %v4400_v57, %v4399_v13  ;;  %v4441_v22 = vadd.f32 %v4440_v58, %v4439_v61  ;;  %v4402_v50 = vpop.f32.mrb[34].mxu1  ;;  %v4442_v33 = vpop.f32.mrb[34].mxu0 }
 0x66b   : > { %v4403_v19 = vpop.f32.mrb[35].mxu1  ;;  %v4443_v43 = vpop.f32.mrb[35].mxu0 }
 0x66c   : > { %v4404_v24 = vadd.f32 %v4403_v19, %v4402_v50  ;;  %v4444_v53 = vadd.f32 %v4443_v43, %v4442_v33  ;;  %v7872_v37 = vadd.f32 %v4441_v22, %v3605_v12  ;;  %v3637_v22 = vadd.f32 %v4401_v42, %v7868_v55 }
 0x66e   : > { %v7874_v34 = vadd.f32 %v4444_v53, %v3608_v38  ;;  %v3640_v19 = vadd.f32 %v4404_v24, %v7868_v55 }
 0x670   : > { %v4405_v0 = vpop.f32.mrb[36].mxu1  ;;  %v4445_v56 = vpop.f32.mrb[36].mxu0 }
 0x671   : > { %v4406_v4 = vpop.f32.mrb[37].mxu1  ;;  %v4446_v49 = vpop.f32.mrb[37].mxu0 }
 0x672   : > { %v4407_v35 = vadd.f32 %v4406_v4, %v4405_v0  ;;  %v4447_v5 = vadd.f32 %v4446_v49, %v4445_v56  ;;  %v4408_v18 = vpop.f32.mrb[38].mxu1  ;;  %v4448_v11 = vpop.f32.mrb[38].mxu0 }
 0x673   : > { %v4409_v26 = vpop.f32.mrb[39].mxu1  ;;  %v4449_v10 = vpop.f32.mrb[39].mxu0 }
 0x674   : > { %v4410_v6 = vadd.f32 %v4409_v26, %v4408_v18  ;;  %v4450_v2 = vadd.f32 %v4449_v10, %v4448_v11  ;;  %v7878_v1 = vadd.f32 %v4447_v5, %v3613_v7  ;;  %v3645_v56 = vadd.f32 %v4407_v35, %v7868_v55 }
 0x676   : > { %v7880_v32 = vadd.f32 %v4450_v2, %v3616_v29  ;;  %v3648_v5 = vadd.f32 %v4410_v6, %v7868_v55 }
 0x678   : > { %v4411_v52 = vpop.f32.mrb[40].mxu1  ;;  %v4451_v45 = vpop.f32.mrb[40].mxu0 }
 0x679   : > { %v4412_v41 = vpop.f32.mrb[41].mxu1  ;;  %v4452_v30 = vpop.f32.mrb[41].mxu0 }
 0x67a   : > { %v4413_v16 = vadd.f32 %v4412_v41, %v4411_v52  ;;  %v4453_v60 = vadd.f32 %v4452_v30, %v4451_v45  ;;  %v4414_v14 = vpop.f32.mrb[42].mxu1  ;;  %v4454_v36 = vpop.f32.mrb[42].mxu0 }
 0x67b   : > { %v4415_v20 = vpop.f32.mrb[43].mxu1  ;;  %v4455_v44 = vpop.f32.mrb[43].mxu0 }
 0x67c   : > { %v7884_v39 = vadd.f32 %v4453_v60, %v3621_v40  ;;  %v4416_v28 = vadd.f32 %v4415_v20, %v4414_v14  ;;  %v4456_v51 = vadd.f32 %v4455_v44, %v4454_v36  ;;  %v3653_v24 = vadd.f32 %v4413_v16, %v7868_v55 }
 0x67e   : > { %v7886_v3 = vadd.f32 %v4456_v51, %v3624_v27  ;;  %v3656_v45 = vadd.f32 %v4416_v28, %v7868_v55  ;;  %v4268_v28 = vld [vmem:[%s8025_s11] ss:$0 sm:$0xff] }
 0x680   : > { %v4417_v31 = vpop.f32.mrb[44].mxu1  ;;  %v4457_v25 = vpop.f32.mrb[44].mxu0 }
 0x681   : > { %v4418_v54 = vpop.f32.mrb[45].mxu1  ;;  %v4458_v63 = vpop.f32.mrb[45].mxu0 }
 0x682   : > { %v4419_v48 = vadd.f32 %v4418_v54, %v4417_v31  ;;  %v4459_v21 = vadd.f32 %v4458_v63, %v4457_v25  ;;  %v4420_v47 = vpop.f32.mrb[46].mxu1  ;;  %v4460_v17 = vpop.f32.mrb[46].mxu0  ;;  %v4577_v63 = vadd.f32 %v4268_v28, %v7880_v32 }
 0x683   : > { %v4421_v62 = vpop.f32.mrb[47].mxu1  ;;  %v4461_v23 = vpop.f32.mrb[47].mxu0 }
 0x684   : > { %v7890_v9 = vadd.f32 %v4459_v21, %v3629_v59  ;;  %v4422_v13 = vadd.f32 %v4421_v62, %v4420_v47  ;;  %v4462_v61 = vadd.f32 %v4461_v23, %v4460_v17  ;;  %v3661_v60 = vadd.f32 %v4419_v48, %v7868_v55 }
 0x686   : > { %v7892_v57 = vadd.f32 %v4462_v61, %v3632_v15  ;;  %v3664_v16 = vadd.f32 %v4422_v13, %v7868_v55  ;;  %v4579_v55 = vadd.f32 %v4268_v28, %v7874_v34 }
 0x688   : > { %v4463_v58 = vpop.f32.mrb[48].mxu0  ;;  %v4585_v13 = vadd.f32 %v4268_v28, %v7892_v57 }
 0x689   : > { %v4464_v12 = vpop.f32.mrb[49].mxu0 }
 0x68a   : > { %v4465_v50 = vadd.f32 %v4464_v12, %v4463_v58  ;;  %v4466_v46 = vpop.f32.mrb[50].mxu0  ;;  %v4587_v12 = vadd.f32 %v4268_v28, %v7886_v3 }
 0x68b   : > { %v4467_v33 = vpop.f32.mrb[51].mxu0 }
 0x68c   : > { %v7896_v43 = vadd.f32 %v4465_v50, %v3637_v22  ;;  %v4468_v38 = vadd.f32 %v4467_v33, %v4466_v46 }
 0x68e   : > { %v7898_v53 = vadd.f32 %v4468_v38, %v3640_v19  ;;  %v4591_v46 = vadd.f32 %v4268_v28, %v7896_v43 }
 0x690   : > { %v4469_v8 = vpop.f32.mrb[52].mxu0 }
 0x691   : > { %v4470_v0 = vpop.f32.mrb[53].mxu0 }
 0x692   : > { %v4471_v4 = vadd.f32 %v4470_v0, %v4469_v8  ;;  %v4472_v49 = vpop.f32.mrb[54].mxu0  ;;  %v4595_v0 = vadd.f32 %v4268_v28, %v7898_v53 }
 0x693   : > { %v4473_v7 = vpop.f32.mrb[55].mxu0 }
 0x694   : > { %v3742_v42 = vadd.f32 %v4471_v4, %v3645_v56  ;;  %v4474_v18 = vadd.f32 %v4473_v7, %v4472_v49 }
 0x696   : > { %v3745_v11 = vadd.f32 %v4474_v18, %v3648_v5 }
 0x698   : > { %v4475_v26 = vpop.f32.mrb[56].mxu0  ;;  %v4593_v19 = vadd.f32 %v4268_v28, %v3745_v11 }
 0x699   : > { %v4476_v10 = vpop.f32.mrb[57].mxu0 }
 0x69a   : > { %v4477_v29 = vadd.f32 %v4476_v10, %v4475_v26  ;;  %v4478_v2 = vpop.f32.mrb[58].mxu0 }
 0x69b   : > { %v4479_v52 = vpop.f32.mrb[59].mxu0 }
 0x69c   : > { %v7904_v35 = vadd.f32 %v4477_v29, %v3653_v24  ;;  %v4480_v41 = vadd.f32 %v4479_v52, %v4478_v2 }
 0x69e   : > { %v7906_v30 = vadd.f32 %v4480_v41, %v3656_v45  ;;  %v4599_v5 = vadd.f32 %v4268_v28, %v7904_v35 }
 0x6a0   : > { %v4481_v6 = vpop.f32.mrb[60].mxu0  ;;  %v4603_v10 = vadd.f32 %v4268_v28, %v7906_v30 }
 0x6a1   : > { %v4482_v40 = vpop.f32.mrb[61].mxu0 }
 0x6a2   : > { %v4483_v14 = vadd.f32 %v4482_v40, %v4481_v6  ;;  %v4484_v36 = vpop.f32.mrb[62].mxu0 }
 0x6a3   : > { %v4485_v20 = vpop.f32.mrb[63].mxu0 }
 0x6a4   : > { %v3758_v44 = vadd.f32 %v4483_v14, %v3661_v60  ;;  %v4486_v27 = vadd.f32 %v4485_v20, %v4484_v36 }
 0x6a6   : > { %v3761_v51 = vadd.f32 %v4486_v27, %v3664_v16  ;;  %v4597_v43 = vadd.f32 %v4268_v28, %v3758_v44 }
 0x6a8   : > { %v4559_v31 = vpop.f32.mrb[48].mxu1  ;;  %v4601_v18 = vadd.f32 %v4268_v28, %v3761_v51 }
 0x6a9   : > { %v4573_v25 = vadd.f32 %v4559_v31, %v7878_v1  ;;  %v3950_v54 = vpop.f32.mrb[49].mxu1  ;;  %v4583_v1 = vadd.f32 %v4268_v28, %v7884_v39  ;;  %v4589_v39 = vadd.f32 %v4268_v28, %v3742_v42 }
 0x6aa   : > { %v4575_v59 = vadd.f32 %v3950_v54, %v7872_v37  ;;  %v4560_v48 = vpop.f32.mrb[50].mxu1  ;;  %v4581_v37 = vadd.f32 %v4268_v28, %v7890_v9 }
 0x6ab   : > { %v4574_v21 = vadd.f32 %v4573_v25, %v4268_v28  ;;  %v4578_v47 = vadd.f32 %v4577_v63, %v4560_v48  ;;  %v3953_v17 = vpop.f32.mrb[51].mxu1 }
 0x6ac   : > { %v4576_v62 = vadd.f32 %v4575_v59, %v4268_v28  ;;  %v4580_v23 = vadd.f32 %v4579_v55, %v3953_v17 }
 0x6ad   : > { %4031 = vst.msk [vmem:[%s7920_s17 + $0x10] sm:$0xff] %vm8923_vm6, %v4574_v21 }
 0x6ae   : > { %4032 = vst.msk [vmem:[%s7920_s17 + $0x18] sm:$0xff] %vm8924_vm1, %v4578_v47 }
 0x6af   : > { %4029 = vst.msk [vmem:[%s7920_s17] sm:$0xff] %vm8925_vm3, %v4576_v62 }
 0x6b0   : > { %4030 = vst.msk [vmem:[%s7920_s17 + $0x8] sm:$0xff] %vm8926_vm4, %v4580_v23  ;;  %v4563_v34 = vpop.f32.mrb[52].mxu1 }
 0x6b1   : > { %v4582_v32 = vadd.f32 %v4581_v37, %v4563_v34  ;;  %v3966_v15 = vpop.f32.mrb[53].mxu1 }
 0x6b2   : > { %v4584_v61 = vadd.f32 %v4583_v1, %v3966_v15  ;;  %v4564_v58 = vpop.f32.mrb[54].mxu1 }
 0x6b3   : > { %4035 = vst.msk [vmem:[%s7920_s17 + $0x30] sm:$0xff] %vm8927_vm9, %v4582_v32  ;;  %v4586_v22 = vadd.f32 %v4585_v13, %v4564_v58  ;;  %v3969_v50 = vpop.f32.mrb[55].mxu1 }
 0x6b4   : > { %4033 = vst.msk [vmem:[%s7920_s17 + $0x20] sm:$0xff] %vm8911_vm0, %v4584_v61  ;;  %v4588_v9 = vadd.f32 %v4587_v12, %v3969_v50 }
 0x6b5   : > { %4036 = vst.msk [vmem:[%s7920_s17 + $0x38] sm:$0xff] %vm8928_vm14, %v4586_v22 }
 0x6b6   : > { %4034 = vst.msk [vmem:[%s7920_s17 + $0x28] sm:$0xff] %vm8929_vm8, %v4588_v9 }
 0x6b8   : > { %v4567_v57 = vpop.f32.mrb[56].mxu1 }
 0x6b9   : > { %v4590_v3 = vadd.f32 %v4589_v39, %v4567_v57  ;;  %v3982_v33 = vpop.f32.mrb[57].mxu1 }
 0x6ba   : > { %v4592_v38 = vadd.f32 %v4591_v46, %v3982_v33  ;;  %v4568_v8 = vpop.f32.mrb[58].mxu1 }
 0x6bb   : > { %4039 = vst.msk [vmem:[%s7920_s17 + $0x50] sm:$0xff] %vm8930_vm10, %v4590_v3  ;;  %v4594_v56 = vadd.f32 %v4593_v19, %v4568_v8  ;;  %v3985_v4 = vpop.f32.mrb[59].mxu1 }
 0x6bc   : > { %4037 = vst.msk [vmem:[%s7920_s17 + $0x40] sm:$0xff] %vm8931_vm15, %v4592_v38  ;;  %v4596_v49 = vadd.f32 %v4595_v0, %v3985_v4 }
 0x6bd   : > { %4040 = vst.msk [vmem:[%s7920_s17 + $0x58] sm:$0xff] %vm8932_vm2, %v4594_v56 }
 0x6be   : > { %4038 = vst.msk [vmem:[%s7920_s17 + $0x48] sm:$0xff] %vm8933_vm12, %v4596_v49 }
 0x6c0   : > { %v4571_v7 = vpop.f32.mrb[60].mxu1 }
 0x6c1   : > { %v4598_v53 = vadd.f32 %v4597_v43, %v4571_v7  ;;  %v3998_v42 = vpop.f32.mrb[61].mxu1 }
 0x6c2   : > { %v4600_v11 = vadd.f32 %v4599_v5, %v3998_v42  ;;  %v4572_v26 = vpop.f32.mrb[62].mxu1 }
 0x6c3   : > { %4043 = vst.msk [vmem:[%s7920_s17 + $0x70] sm:$0xff] %vm8934_vm11, %v4598_v53  ;;  %v4602_v24 = vadd.f32 %v4601_v18, %v4572_v26  ;;  %v4001_v29 = vpop.f32.mrb[63].mxu1 }
 0x6c4   : > { %4041 = vst.msk [vmem:[%s7920_s17 + $0x60] sm:$0xff] %vm8935_vm5, %v4600_v11  ;;  %v4604_v2 = vadd.f32 %v4603_v10, %v4001_v29 }
 0x6c5   : > { %4044 = vst.msk [vmem:[%s7920_s17 + $0x78] sm:$0xff] %vm8936_vm13, %v4602_v24 }
 0x6c6   : > { %4042 = vst.msk [vmem:[%s7920_s17 + $0x68] sm:$0xff] %vm8937_vm7, %v4604_v2 }
 0x6c7   : > { %4837 = shalt.err (!%p4834_p3)
}
 0x6c8   : > { %s4838_s20 = scalar_lea.hbm %s7961_s28, 2048  ;;  %s4842_s26 = scalar_lea.hbm %s8026_s12, 4096 }
 0x6c9   : > { %p4839_p4 = scmp.ne.s32.totalorder %s7961_s28, %s4838_s20  ;;  %p4843_p9 = scmp.lt.u32.totalorder %s7961_s28, %s8026_s12 }
 0x6ca   : > { %p4844_p10 = scmp.lt.u32.totalorder %s4842_s26, %s4838_s20  ;;  %p4846_p12 = scmp.lt.u32.totalorder %s4838_s20, %s7961_s28 }
 0x6cb   : > { %p4840_p7 = pnand %p4839_p4, %p5008_p5 }
 0x6cc   : > { %p4845_p11 = por %p4844_p10, %p4843_p9 }
 0x6cd   : > { %p4841_p8 = pneg %p4840_p7 }
 0x6ce   : > { %p4847_p13 = por %p4846_p12, %p4845_p11 }
 0x6d0   : > { %p4848_p0 = pnand %p4847_p13, %p4841_p8 }
 0x6d2   : > { %4851 = shalt.err (!%p4848_p0)
}
 0x6d3   : > { %s4903_s29 = smov 128   ;;  %s4904_s15 = smov 8  }
 0x6d4   : > { %4621 = dma.vmem_to_hbm [thread:$0]  (%p5008_p5), %s7963_s19, 2048, %s7961_s28, %s7973_s25, %s4903_s29, %s4903_s29, %s4904_s15  }
 0x6d5 PF: > { %p4627_p1 = scmp.ge.s32.totalorder %s4886_s24, 2  ;;  %s4074_s1 = sand.u32 1, %s4874_s21  }
 0x6d6   : > { %s4075_s20 = scalar_lea.sflag [#allocation3], %s4074_s1 }
 0x6d7   : > { %p4624_p2 = pnand %p4627_p1, %p5012_p6 }
 0x6d9   : > { %4869 = dma.done.wait (!%p4624_p2), %s4075_s20, 2048  }
 0x6da   : > { %4871 = vsyncadd (!%p4624_p2), %s4075_s20, 4294965248  ;;  %p22_p3 = scmp.ge.s32.totalorder %s4995_s27, 4   ;;  %s8938_s21 = smov %s4878_s22 }
 0x6db   : > { %s8939_s22 = smov %s4882_s23  ;;  %s8940_s23 = smov %s5006_s30 }
 0x6dc   : > { %s8941_s24 = smov %s4995_s27  ;;  %24 = sbr.rel (!%p22_p3) target bundleno = 6 (0x6), region = 103 }
 0x6e3   :  { %4080 = vsyncpa [#allocation3], 1 }
 0x6e4   :  { %4082 = vsyncpa [#allocation3 + $0x1], 1 }

</bundles_post_ra>
